<compile_context>
chip_gen: v7x
topology: tpu7x:2x2x1
jax: 0.10.0
libtpu: 0.0.40
codegen_flags: <defaults>
</compile_context>

<pallas_src>
import jax
import jax.numpy as jnp
from jax.experimental import pallas as pl
from jax.experimental.pallas import tpu as pltpu

BN_EPS = 1e-5
LRELU_SLOPE = 0.2

# ---------------------------------------------------------------------------
# Packed layout for all small f32 parameters: a single (1, VEC_LEN) row.
# Every slot size is a multiple of 128 lanes, so every carve-out below is a
# lane-tile-aligned static slice (free).
# ---------------------------------------------------------------------------
_VEC_LAYOUT = (
    ("b11", 1024), ("s11", 1024),                              # fc1_1 bias, int8 scale
    ("b2", 512), ("s2", 512), ("g2", 512), ("be2", 512),       # fc2 bias/scale, BN2 g/b
    ("b3", 256), ("s3", 256), ("g3", 256), ("be3", 256),       # fc3 bias/scale, BN3 g/b
    ("w4", 256), ("b4", 128),                                  # fc4 row, fc4 bias (padded)
)
_VEC_OFFSETS = {}
_off = 0
for _name, _size in _VEC_LAYOUT:
    _VEC_OFFSETS[_name] = (_off, _size)
    _off += _size
VEC_LEN = _off  # 5504 = 43 * 128


def _vec(vec_ref, name):
    off, size = _VEC_OFFSETS[name]
    return vec_ref[:, off:off + size]          # (1, size) static lane-aligned slice


def _leaky_relu(x):
    # slope < 1  =>  max(x, slope*x) is exactly leaky_relu
    return jnp.maximum(x, LRELU_SLOPE * x)


def _batchnorm_train(x, gamma, beta):
    # BatchNorm1d training mode: biased batch statistics over axis 0.
    mu = jnp.mean(x, axis=0, keepdims=True)
    var = jnp.mean((x - mu) * (x - mu), axis=0, keepdims=True)
    inv = jax.lax.rsqrt(var + BN_EPS)
    return (x - mu) * inv * gamma + beta


def _dequant_bf16(w_i8_ref):
    # int8 -> f32 -> bf16; int8 values are exactly representable, so the per-channel
    # scale can be applied to the f32 accumulator after the MXU dot.
    return w_i8_ref[...].astype(jnp.float32).astype(jnp.bfloat16)


# ---------------------------------------------------------------------------
# Kernel: whole forward pass in one grid-less block (7 input DMAs, 1 output).
# ---------------------------------------------------------------------------
def discriminator_kernel(
    inp_ref,   # (B, 784)  f32
    lab_ref,   # (B, 10)   f32 one-hot
    w11_ref,   # (784, 1024) int8   fc1_1 weight (per-out-channel quantized)
    w2a_ref,   # (1024, 512) int8   fc2 weight, image half
    w3_ref,    # (512, 256)  int8   fc3 weight
    tbl_ref,   # (10, 512)   f32    folded label path
    vec_ref,   # (1, VEC_LEN) f32   packed small params
    out_ref,   # (B, 1)      f32
):
    inp = inp_ref[...]
    lab = lab_ref[...]

    # --- fc1_1 (int8 weight, per-out-channel scale) + leaky relu --------------------
    x = jnp.dot(inp.astype(jnp.bfloat16), _dequant_bf16(w11_ref),
                preferred_element_type=jnp.float32)
    x = x * _vec(vec_ref, "s11") + _vec(vec_ref, "b11")
    x = _leaky_relu(x)

    # --- folded label path: lrelu(lab @ w12 + b12) @ w2_label == lab @ table --------
    # (exact for one-hot labels; soft labels would break the leaky-ReLU linearity)
    y2 = jnp.dot(lab, tbl_ref[...], preferred_element_type=jnp.float32)

    # --- fc2 on cat([x, y]): image half via int8 matmul + folded label contribution --
    h = jnp.dot(x.astype(jnp.bfloat16), _dequant_bf16(w2a_ref),
                preferred_element_type=jnp.float32)
    h = h * _vec(vec_ref, "s2") + y2 + _vec(vec_ref, "b2")
    h = _leaky_relu(_batchnorm_train(h, _vec(vec_ref, "g2"), _vec(vec_ref, "be2")))

    # --- fc3 + BN + leaky relu -------------------------------------------------------
    h = jnp.dot(h.astype(jnp.bfloat16), _dequant_bf16(w3_ref),
                preferred_element_type=jnp.float32)
    h = h * _vec(vec_ref, "s3") + _vec(vec_ref, "b3")
    h = _leaky_relu(_batchnorm_train(h, _vec(vec_ref, "g3"), _vec(vec_ref, "be3")))

    # --- fc4 (N=1) on the VPU/XLU: multiply + lane reduce, then sigmoid --------------
    w4_row = _vec(vec_ref, "w4")                       # (1, 256)
    b4 = _vec(vec_ref, "b4")[:, :1]                    # (1, 1)
    o = jnp.sum(h * w4_row, axis=-1, keepdims=True) + b4
    out_ref[...] = jax.nn.sigmoid(o)


# ---------------------------------------------------------------------------
# Parameter init / offline preparation
# ---------------------------------------------------------------------------
def init_params(key):
    """Deterministic init matching discriminator.weight_init(mean=0, std=0.02):
    Linear weights ~ N(0, 0.02), Linear biases = 0, BN gamma = 1, beta = 0.
    Weights kept as (in, out) so forward is x @ W."""
    ks = jax.random.split(key, 5)
    std = 0.02
    return {
        "w11": jax.random.normal(ks[0], (784, 1024), jnp.float32) * std,
        "b11": jnp.zeros((1, 1024), jnp.float32),
        "w12": jax.random.normal(ks[1], (10, 1024), jnp.float32) * std,
        "b12": jnp.zeros((1, 1024), jnp.float32),
        "w2":  jax.random.normal(ks[2], (2048, 512), jnp.float32) * std,
        "b2":  jnp.zeros((1, 512), jnp.float32),
        "g2":  jnp.ones((1, 512), jnp.float32),
        "be2": jnp.zeros((1, 512), jnp.float32),
        "w3":  jax.random.normal(ks[3], (512, 256), jnp.float32) * std,
        "b3":  jnp.zeros((1, 256), jnp.float32),
        "g3":  jnp.ones((1, 256), jnp.float32),
        "be3": jnp.zeros((1, 256), jnp.float32),
        "w4":  jax.random.normal(ks[4], (256, 1), jnp.float32) * std,
        "b4":  jnp.zeros((1, 1), jnp.float32),
    }


def _quantize_int8(w):
    """Per-output-channel (column) symmetric int8 quantization."""
    amax = jnp.max(jnp.abs(w), axis=0, keepdims=True)           # (1, N)
    scale = jnp.maximum(amax, 1e-12) / 127.0
    q = jnp.clip(jnp.round(w / scale), -127.0, 127.0).astype(jnp.int8)
    return q, scale[0].astype(jnp.float32)                      # (K,N) i8, (N,) f32


def prepare_params(p):
    """One-time offline transforms: int8-quantize the big weights (no K padding),
    fold the one-hot label path into a (10, 512) table, and pack all small f32
    params into a single lane-aligned row."""
    w11_q, s11 = _quantize_int8(p["w11"])           # (784, 1024) i8
    w2a_q, s2 = _quantize_int8(p["w2"][:1024])      # (1024, 512) i8 (image half)
    w3_q, s3 = _quantize_int8(p["w3"])              # (512, 256)  i8

    # Fold fc1_2 + label-half of fc2 (exact for one-hot labels).
    pre = p["w12"] + p["b12"]                       # (10, 1024)
    tbl = jnp.maximum(pre, LRELU_SLOPE * pre) @ p["w2"][1024:]   # (10, 512) f32

    pieces = {
        "b11": p["b11"][0], "s11": s11,
        "b2": p["b2"][0], "s2": s2, "g2": p["g2"][0], "be2": p["be2"][0],
        "b3": p["b3"][0], "s3": s3, "g3": p["g3"][0], "be3": p["be3"][0],
        "w4": p["w4"][:, 0],
        "b4": jnp.pad(p["b4"][0], (0, 127)),        # pad scalar to a 128-lane slot
    }
    vec = jnp.zeros((1, VEC_LEN), jnp.float32)
    for name, size in _VEC_LAYOUT:
        off, _ = _VEC_OFFSETS[name]
        vec = vec.at[0, off:off + size].set(pieces[name])

    return {"w11": w11_q, "w2a": w2a_q, "w3": w3_q, "tbl": tbl, "vec": vec}


# ---------------------------------------------------------------------------
# Wrapper
# ---------------------------------------------------------------------------
def discriminator_forward(inp, lab, prep):
    B = inp.shape[0]
    args = (inp, lab, prep["w11"], prep["w2a"], prep["w3"], prep["tbl"], prep["vec"])
    vmem = pl.BlockSpec(memory_space=pltpu.MemorySpace.VMEM)
    return pl.pallas_call(
        discriminator_kernel,
        out_shape=jax.ShapeDtypeStruct((B, 1), jnp.float32),
        in_specs=[vmem] * len(args),
        out_specs=vmem,
    )(*args)


def reference_forward(inp, lab, params):
    """Pure-JAX f32 reference matching the PyTorch forward exactly."""
    def lrelu(x):
        return jnp.maximum(x, LRELU_SLOPE * x)

    def bn(x, g, b):
        mu = jnp.mean(x, axis=0, keepdims=True)
        var = jnp.mean((x - mu) ** 2, axis=0, keepdims=True)
        return (x - mu) * jax.lax.rsqrt(var + BN_EPS) * g + b

    x = lrelu(inp @ params["w11"] + params["b11"])
    y = lrelu(lab @ params["w12"] + params["b12"])
    h = jnp.concatenate([x, y], axis=1)
    h = lrelu(bn(h @ params["w2"] + params["b2"], params["g2"], params["be2"]))
    h = lrelu(bn(h @ params["w3"] + params["b3"], params["g3"], params["be3"]))
    return jax.nn.sigmoid(h @ params["w4"] + params["b4"])


if __name__ == "__main__":
    key = jax.random.PRNGKey(0)
    k_inp, k_lab, k_par = jax.random.split(key, 3)

    # Weights are fetched once per call regardless of B, so use a batch that's a
    # multiple of 16 and (in a real training loop) fold real+fake micro-batches into
    # one call where BatchNorm semantics permit.
    B = 16
    inp = jax.random.normal(k_inp, (B, 784), jnp.float32)          # flattened 28x28
    lab_idx = jax.random.randint(k_lab, (B,), 0, 10)
    lab = jax.nn.one_hot(lab_idx, 10, dtype=jnp.float32)           # one-hot class label

    params = init_params(k_par)
    prep = prepare_params(params)

    out = jax.block_until_ready(discriminator_forward(inp, lab, prep))
    ref = reference_forward(inp, lab, params)

    assert out.shape == (B, 1)
    # int8 weights + bf16 activation casts vs the f32 reference; the error passes
    # through two batch-statistics BatchNorms, so tolerance is looser than bf16-only
    # (typical observed error is a few 1e-3 on sigmoid outputs).
    assert jnp.allclose(out, ref, atol=2e-2, rtol=2e-2), "mismatch vs reference"

    print("KERNEL_OK")
</pallas_src>

<mosaic_0001>
module attributes {stable_mosaic.version = 11 : i64} {
  func.func @discriminator_kernel(%arg0: memref<16x784xf32, #tpu.memory_space<vmem>>, %arg1: memref<16x10xf32, #tpu.memory_space<vmem>>, %arg2: memref<784x1024xi8, #tpu.memory_space<vmem>>, %arg3: memref<1024x512xi8, #tpu.memory_space<vmem>>, %arg4: memref<512x256xi8, #tpu.memory_space<vmem>>, %arg5: memref<10x512xf32, #tpu.memory_space<vmem>>, %arg6: memref<1x5504xf32, #tpu.memory_space<vmem>>, %arg7: memref<16x1xf32, #tpu.memory_space<vmem>>) attributes {dimension_semantics = [], scalar_prefetch = 0 : i64, scratch_operands = 0 : i64, tpu.core_type = #tpu.core_type<tc>} {
    %c0 = arith.constant 0 : index
    %c0_0 = arith.constant 0 : index
    %0 = vector.load %arg0[%c0, %c0_0] : memref<16x784xf32, #tpu.memory_space<vmem>>, vector<16x784xf32>
    %c0_1 = arith.constant 0 : index
    %c0_2 = arith.constant 0 : index
    %1 = vector.load %arg1[%c0_1, %c0_2] : memref<16x10xf32, #tpu.memory_space<vmem>>, vector<16x10xf32>
    %2 = arith.truncf %0 : vector<16x784xf32> to vector<16x784xbf16>
    %c0_3 = arith.constant 0 : index
    %c0_4 = arith.constant 0 : index
    %3 = vector.load %arg2[%c0_3, %c0_4] : memref<784x1024xi8, #tpu.memory_space<vmem>>, vector<784x1024xi8>
    %4 = arith.sitofp %3 : vector<784x1024xi8> to vector<784x1024xf32>
    %5 = arith.truncf %4 : vector<784x1024xf32> to vector<784x1024xbf16>
    %cst = arith.constant dense<0.000000e+00> : vector<16x1024xf32>
    %6 = tpu.matmul %2, %5, %cst {dimension_numbers = #tpu.dot_dimension_numbers<[1], [0], [0], [1], [0, 0, 1, 1], [], []>} : vector<16x784xbf16>, vector<784x1024xbf16>, vector<16x1024xf32> -> vector<16x1024xf32>
    %c0_5 = arith.constant 0 : index
    %c1024 = arith.constant 1024 : index
    %7 = vector.load %arg6[%c0_5, %c1024] : memref<1x5504xf32, #tpu.memory_space<vmem>>, vector<1x1024xf32>
    %8 = vector.broadcast %7 : vector<1x1024xf32> to vector<16x1024xf32>
    %9 = arith.mulf %6, %8 : vector<16x1024xf32>
    %c0_6 = arith.constant 0 : index
    %c0_7 = arith.constant 0 : index
    %10 = vector.load %arg6[%c0_6, %c0_7] : memref<1x5504xf32, #tpu.memory_space<vmem>>, vector<1x1024xf32>
    %11 = vector.broadcast %10 : vector<1x1024xf32> to vector<16x1024xf32>
    %12 = arith.addf %9, %11 : vector<16x1024xf32>
    %cst_8 = arith.constant 2.000000e-01 : f32
    %13 = vector.broadcast %cst_8 : f32 to vector<16x1024xf32>
    %14 = arith.mulf %13, %12 : vector<16x1024xf32>
    %15 = arith.maximumf %12, %14 : vector<16x1024xf32>
    %c0_9 = arith.constant 0 : index
    %c0_10 = arith.constant 0 : index
    %16 = vector.load %arg5[%c0_9, %c0_10] : memref<10x512xf32, #tpu.memory_space<vmem>>, vector<10x512xf32>
    %cst_11 = arith.constant dense<0.000000e+00> : vector<16x512xf32>
    %17 = tpu.matmul %1, %16, %cst_11 {dimension_numbers = #tpu.dot_dimension_numbers<[1], [0], [0], [1], [0, 0, 1, 1], [], []>} : vector<16x10xf32>, vector<10x512xf32>, vector<16x512xf32> -> vector<16x512xf32>
    %18 = arith.truncf %15 : vector<16x1024xf32> to vector<16x1024xbf16>
    %c0_12 = arith.constant 0 : index
    %c0_13 = arith.constant 0 : index
    %19 = vector.load %arg3[%c0_12, %c0_13] : memref<1024x512xi8, #tpu.memory_space<vmem>>, vector<1024x512xi8>
    %20 = arith.sitofp %19 : vector<1024x512xi8> to vector<1024x512xf32>
    %21 = arith.truncf %20 : vector<1024x512xf32> to vector<1024x512xbf16>
    %cst_14 = arith.constant dense<0.000000e+00> : vector<16x512xf32>
    %22 = tpu.matmul %18, %21, %cst_14 {dimension_numbers = #tpu.dot_dimension_numbers<[1], [0], [0], [1], [0, 0, 1, 1], [], []>} : vector<16x1024xbf16>, vector<1024x512xbf16>, vector<16x512xf32> -> vector<16x512xf32>
    %c0_15 = arith.constant 0 : index
    %c2560 = arith.constant 2560 : index
    %23 = vector.load %arg6[%c0_15, %c2560] : memref<1x5504xf32, #tpu.memory_space<vmem>>, vector<1x512xf32>
    %24 = vector.broadcast %23 : vector<1x512xf32> to vector<16x512xf32>
    %25 = arith.mulf %22, %24 : vector<16x512xf32>
    %26 = arith.addf %25, %17 : vector<16x512xf32>
    %c0_16 = arith.constant 0 : index
    %c2048 = arith.constant 2048 : index
    %27 = vector.load %arg6[%c0_16, %c2048] : memref<1x5504xf32, #tpu.memory_space<vmem>>, vector<1x512xf32>
    %28 = vector.broadcast %27 : vector<1x512xf32> to vector<16x512xf32>
    %29 = arith.addf %26, %28 : vector<16x512xf32>
    %c0_17 = arith.constant 0 : index
    %c3072 = arith.constant 3072 : index
    %30 = vector.load %arg6[%c0_17, %c3072] : memref<1x5504xf32, #tpu.memory_space<vmem>>, vector<1x512xf32>
    %c0_18 = arith.constant 0 : index
    %c3584 = arith.constant 3584 : index
    %31 = vector.load %arg6[%c0_18, %c3584] : memref<1x5504xf32, #tpu.memory_space<vmem>>, vector<1x512xf32>
    %cst_19 = arith.constant dense<0.000000e+00> : vector<512xf32>
    %32 = vector.multi_reduction <add>, %29, %cst_19 [0] : vector<16x512xf32> to vector<512xf32>
    %33 = vector.shape_cast %32 : vector<512xf32> to vector<1x512xf32>
    %cst_20 = arith.constant 1.600000e+01 : f32
    %34 = vector.broadcast %cst_20 : f32 to vector<1x512xf32>
    %35 = arith.divf %33, %34 : vector<1x512xf32>
    %36 = vector.broadcast %35 : vector<1x512xf32> to vector<16x512xf32>
    %37 = arith.subf %29, %36 : vector<16x512xf32>
    %38 = vector.broadcast %35 : vector<1x512xf32> to vector<16x512xf32>
    %39 = arith.subf %29, %38 : vector<16x512xf32>
    %40 = arith.mulf %37, %39 : vector<16x512xf32>
    %cst_21 = arith.constant dense<0.000000e+00> : vector<512xf32>
    %41 = vector.multi_reduction <add>, %40, %cst_21 [0] : vector<16x512xf32> to vector<512xf32>
    %42 = vector.shape_cast %41 : vector<512xf32> to vector<1x512xf32>
    %cst_22 = arith.constant 1.600000e+01 : f32
    %43 = vector.broadcast %cst_22 : f32 to vector<1x512xf32>
    %44 = arith.divf %42, %43 : vector<1x512xf32>
    %cst_23 = arith.constant 9.99999974E-6 : f32
    %45 = vector.broadcast %cst_23 : f32 to vector<1x512xf32>
    %46 = arith.addf %44, %45 : vector<1x512xf32>
    %47 = math.rsqrt %46 : vector<1x512xf32>
    %48 = vector.broadcast %35 : vector<1x512xf32> to vector<16x512xf32>
    %49 = arith.subf %29, %48 : vector<16x512xf32>
    %50 = vector.broadcast %47 : vector<1x512xf32> to vector<16x512xf32>
    %51 = arith.mulf %49, %50 : vector<16x512xf32>
    %52 = vector.broadcast %30 : vector<1x512xf32> to vector<16x512xf32>
    %53 = arith.mulf %51, %52 : vector<16x512xf32>
    %54 = vector.broadcast %31 : vector<1x512xf32> to vector<16x512xf32>
    %55 = arith.addf %53, %54 : vector<16x512xf32>
    %cst_24 = arith.constant 2.000000e-01 : f32
    %56 = vector.broadcast %cst_24 : f32 to vector<16x512xf32>
    %57 = arith.mulf %56, %55 : vector<16x512xf32>
    %58 = arith.maximumf %55, %57 : vector<16x512xf32>
    %59 = arith.truncf %58 : vector<16x512xf32> to vector<16x512xbf16>
    %c0_25 = arith.constant 0 : index
    %c0_26 = arith.constant 0 : index
    %60 = vector.load %arg4[%c0_25, %c0_26] : memref<512x256xi8, #tpu.memory_space<vmem>>, vector<512x256xi8>
    %61 = arith.sitofp %60 : vector<512x256xi8> to vector<512x256xf32>
    %62 = arith.truncf %61 : vector<512x256xf32> to vector<512x256xbf16>
    %cst_27 = arith.constant dense<0.000000e+00> : vector<16x256xf32>
    %63 = tpu.matmul %59, %62, %cst_27 {dimension_numbers = #tpu.dot_dimension_numbers<[1], [0], [0], [1], [0, 0, 1, 1], [], []>} : vector<16x512xbf16>, vector<512x256xbf16>, vector<16x256xf32> -> vector<16x256xf32>
    %c0_28 = arith.constant 0 : index
    %c4352 = arith.constant 4352 : index
    %64 = vector.load %arg6[%c0_28, %c4352] : memref<1x5504xf32, #tpu.memory_space<vmem>>, vector<1x256xf32>
    %65 = vector.broadcast %64 : vector<1x256xf32> to vector<16x256xf32>
    %66 = arith.mulf %63, %65 : vector<16x256xf32>
    %c0_29 = arith.constant 0 : index
    %c4096 = arith.constant 4096 : index
    %67 = vector.load %arg6[%c0_29, %c4096] : memref<1x5504xf32, #tpu.memory_space<vmem>>, vector<1x256xf32>
    %68 = vector.broadcast %67 : vector<1x256xf32> to vector<16x256xf32>
    %69 = arith.addf %66, %68 : vector<16x256xf32>
    %c0_30 = arith.constant 0 : index
    %c4608 = arith.constant 4608 : index
    %70 = vector.load %arg6[%c0_30, %c4608] : memref<1x5504xf32, #tpu.memory_space<vmem>>, vector<1x256xf32>
    %c0_31 = arith.constant 0 : index
    %c4864 = arith.constant 4864 : index
    %71 = vector.load %arg6[%c0_31, %c4864] : memref<1x5504xf32, #tpu.memory_space<vmem>>, vector<1x256xf32>
    %cst_32 = arith.constant dense<0.000000e+00> : vector<256xf32>
    %72 = vector.multi_reduction <add>, %69, %cst_32 [0] : vector<16x256xf32> to vector<256xf32>
    %73 = vector.shape_cast %72 : vector<256xf32> to vector<1x256xf32>
    %cst_33 = arith.constant 1.600000e+01 : f32
    %74 = vector.broadcast %cst_33 : f32 to vector<1x256xf32>
    %75 = arith.divf %73, %74 : vector<1x256xf32>
    %76 = vector.broadcast %75 : vector<1x256xf32> to vector<16x256xf32>
    %77 = arith.subf %69, %76 : vector<16x256xf32>
    %78 = vector.broadcast %75 : vector<1x256xf32> to vector<16x256xf32>
    %79 = arith.subf %69, %78 : vector<16x256xf32>
    %80 = arith.mulf %77, %79 : vector<16x256xf32>
    %cst_34 = arith.constant dense<0.000000e+00> : vector<256xf32>
    %81 = vector.multi_reduction <add>, %80, %cst_34 [0] : vector<16x256xf32> to vector<256xf32>
    %82 = vector.shape_cast %81 : vector<256xf32> to vector<1x256xf32>
    %cst_35 = arith.constant 1.600000e+01 : f32
    %83 = vector.broadcast %cst_35 : f32 to vector<1x256xf32>
    %84 = arith.divf %82, %83 : vector<1x256xf32>
    %cst_36 = arith.constant 9.99999974E-6 : f32
    %85 = vector.broadcast %cst_36 : f32 to vector<1x256xf32>
    %86 = arith.addf %84, %85 : vector<1x256xf32>
    %87 = math.rsqrt %86 : vector<1x256xf32>
    %88 = vector.broadcast %75 : vector<1x256xf32> to vector<16x256xf32>
    %89 = arith.subf %69, %88 : vector<16x256xf32>
    %90 = vector.broadcast %87 : vector<1x256xf32> to vector<16x256xf32>
    %91 = arith.mulf %89, %90 : vector<16x256xf32>
    %92 = vector.broadcast %70 : vector<1x256xf32> to vector<16x256xf32>
    %93 = arith.mulf %91, %92 : vector<16x256xf32>
    %94 = vector.broadcast %71 : vector<1x256xf32> to vector<16x256xf32>
    %95 = arith.addf %93, %94 : vector<16x256xf32>
    %cst_37 = arith.constant 2.000000e-01 : f32
    %96 = vector.broadcast %cst_37 : f32 to vector<16x256xf32>
    %97 = arith.mulf %96, %95 : vector<16x256xf32>
    %98 = arith.maximumf %95, %97 : vector<16x256xf32>
    %c0_38 = arith.constant 0 : index
    %c5120 = arith.constant 5120 : index
    %99 = vector.load %arg6[%c0_38, %c5120] : memref<1x5504xf32, #tpu.memory_space<vmem>>, vector<1x256xf32>
    %c0_39 = arith.constant 0 : index
    %c5376 = arith.constant 5376 : index
    %100 = vector.load %arg6[%c0_39, %c5376] : memref<1x5504xf32, #tpu.memory_space<vmem>>, vector<1x128xf32>
    %101 = vector.extract_strided_slice %100 {offsets = [0, 0], sizes = [1, 1], strides = [1, 1]} : vector<1x128xf32> to vector<1x1xf32>
    %102 = vector.broadcast %99 : vector<1x256xf32> to vector<16x256xf32>
    %103 = arith.mulf %98, %102 : vector<16x256xf32>
    %cst_40 = arith.constant dense<0.000000e+00> : vector<16xf32>
    %104 = vector.multi_reduction <add>, %103, %cst_40 [1] : vector<16x256xf32> to vector<16xf32>
    %105 = vector.shape_cast %104 : vector<16xf32> to vector<16x1xf32>
    %106 = vector.broadcast %101 : vector<1x1xf32> to vector<16x1xf32>
    %107 = arith.addf %105, %106 : vector<16x1xf32>
    %108 = arith.negf %107 : vector<16x1xf32>
    %109 = math.exp %108 : vector<16x1xf32>
    %cst_41 = arith.constant 1.000000e+00 : f32
    %110 = vector.broadcast %cst_41 : f32 to vector<16x1xf32>
    %111 = arith.addf %110, %109 : vector<16x1xf32>
    %112 = arith.divf %110, %111 : vector<16x1xf32>
    %c0_42 = arith.constant 0 : index
    %c0_43 = arith.constant 0 : index
    %113 = vector.load %arg7[%c0_42, %c0_43] : memref<16x1xf32, #tpu.memory_space<vmem>>, vector<16x1xf32>
    tpu.vector_store %arg7[%c0_42, %c0_43], %112 {strides = array<i32>} : memref<16x1xf32, #tpu.memory_space<vmem>>, vector<16x1xf32>,
    return
  }
}

</mosaic_0001>

<bundles_post_ra>
// kernel: tpu_custom_call.1
= control target key start
LH: loop header
LB: loop body
LE: loop exit
PB: predicated region body
PF: predicated region fallthrough
CT: control target
= control target key end

     0   :  { %12 = vsyncpa [#allocation3], 0  ;;  %s7257_s0 = inlined_call_operand.hbm [shape: f32[16,784], index: 0, kind: input, shape index: {}]   ;;  %s7258_s1 = inlined_call_operand.hbm [shape: f32[16,10], index: 1, kind: input, shape index: {}]   ;;  %s7259_s2 = inlined_call_operand.hbm [shape: s8[784,1024], index: 2, kind: input, shape index: {}]   ;;  %s7260_s3 = inlined_call_operand.hbm [shape: s8[1024,512], index: 3, kind: input, shape index: {}]   ;;  %s7261_s4 = inlined_call_operand.hbm [shape: s8[512,256], index: 4, kind: input, shape index: {}]   ;;  %s7262_s5 = inlined_call_operand.hbm [shape: f32[10,512], index: 5, kind: input, shape index: {}]   ;;  %s7263_s6 = inlined_call_operand.hbm [shape: f32[1,5504], index: 6, kind: input, shape index: {}]   ;;  %s7264_s7 = inlined_call_operand.vmem [shape: f32[16,1], index: 7, kind: output, shape index: {}]  }
   0x1   :  { %13 = vsyncpa [#allocation5], 0 }
   0x2   :  { %14 = vsyncpa [#allocation8], 0 }
   0x3   :  { %15 = vsyncpa [#allocation11], 0  ;;  %s5747_s24 = smov [#allocation4]   ;;  %s5585_s28 = scalar_lea.hbm %s7258_s1, 256 }
   0x4   :  { %s33_s25 = sshll.u32 %s5747_s24, 4  ;;  %p5586_p0 = scmp.ne.s32.totalorder %s7258_s1, %s5585_s28  ;;  %s34_s25 = int_to_ptr.vmem [resolvable:$true] %s33_s25 }
   0x5   :  { %p5589_p1 = scmp.lt.u32.totalorder %s5585_s28, %s7258_s1 }
   0x7   :  { %p5591_p2 = pnand %p5589_p1, %p5586_p0 }
   0x9   :  { %5594 = shalt.err (!%p5591_p2)
}
   0xa   :  { %s5595_s10 = scalar_lea.vmem %s34_s25, 256  ;;  %p5600_p4 = scmp.lt.s32.totalorder %s34_s25, %s34_s25 }
   0xb   :  { %p5596_p3 = scmp.ne.s32.totalorder %s34_s25, %s5595_s10  ;;  %p5601_p5 = scmp.lt.s32.totalorder %s5595_s10, %s5595_s10 }
   0xd   :  { %p5602_p6 = por %p5601_p5, %p5600_p4 }
   0xf   :  { %p5603_p7 = pnand %p5602_p6, %p5596_p3 }
  0x11   :  { %5606 = shalt.err (!%p5603_p7)
}
  0x12   :  { %s5748_s11 = smov 128   ;;  %s5749_s12 = smov 8  }
  0x13   :  { %39 = dma.hbm_to_vmem [thread:$0]  %s7258_s1, 256, %s34_s25, [#allocation5], %s5748_s11, %s5748_s11, %s5749_s12  }
  0x14   :  { %s5750_s15 = smov [#allocation7]   ;;  %s5607_s19 = scalar_lea.hbm %s7260_s3, 16384 }
  0x15   :  { %s57_s16 = sshll.u32 %s5750_s15, 4  ;;  %p5608_p8 = scmp.ne.s32.totalorder %s7260_s3, %s5607_s19  ;;  %s58_s16 = int_to_ptr.vmem [resolvable:$true] %s57_s16 }
  0x16   :  { %p5611_p9 = scmp.lt.u32.totalorder %s5607_s19, %s7260_s3 }
  0x18   :  { %p5613_p10 = pnand %p5611_p9, %p5608_p8 }
  0x1a   :  { %5616 = shalt.err (!%p5613_p10)
}
  0x1b   :  { %s5617_s24 = scalar_lea.vmem %s58_s16, 16384  ;;  %p5622_p12 = scmp.lt.s32.totalorder %s58_s16, %s58_s16 }
  0x1c   :  { %p5618_p11 = scmp.ne.s32.totalorder %s58_s16, %s5617_s24  ;;  %p5623_p13 = scmp.lt.s32.totalorder %s5617_s24, %s5617_s24 }
  0x1e   :  { %p5624_p0 = por %p5623_p13, %p5622_p12 }
  0x20   :  { %p5625_p1 = pnand %p5624_p0, %p5618_p11 }
  0x22   :  { %5628 = shalt.err (!%p5625_p1)
}
  0x23   :  { %s5751_s1 = smov 512   ;;  %s5752_s25 = smov 32  }
  0x24   :  { %63 = dma.hbm_to_vmem [thread:$0]  %s7260_s3, 16384, %s58_s16, [#allocation8], %s5751_s1, %s5751_s1, %s5752_s25  }
  0x25   :  { %s5753_s28 = smov [#allocation10]   ;;  %s5754_s30 = smov [#allocation2]  }
  0x26   :  { %s81_s29 = sshll.u32 %s5753_s28, 4  ;;  %s21_s8 = sshll.u32 %s5754_s30, 4  ;;  %s82_s29 = int_to_ptr.vmem [resolvable:$true] %s81_s29  ;;  %s5829_s8 = int_to_ptr.vmem [resolvable:$true] %s21_s8 }
  0x27   :  { %s5629_s11 = scalar_lea.hbm %s7262_s5, 1024 }
  0x28   :  { %p5630_p2 = scmp.ne.s32.totalorder %s7262_s5, %s5629_s11  ;;  %p5633_p3 = scmp.lt.u32.totalorder %s5629_s11, %s7262_s5 }
  0x2a   :  { %p5635_p4 = pnand %p5633_p3, %p5630_p2 }
  0x2c   :  { %5638 = shalt.err (!%p5635_p4)
}
  0x2d   :  { %s5639_s3 = scalar_lea.vmem %s82_s29, 1024  ;;  %p5644_p6 = scmp.lt.s32.totalorder %s82_s29, %s82_s29 }
  0x2e   :  { %p5640_p5 = scmp.ne.s32.totalorder %s82_s29, %s5639_s3  ;;  %p5645_p7 = scmp.lt.s32.totalorder %s5639_s3, %s5639_s3 }
  0x30   :  { %p5646_p8 = por %p5645_p7, %p5644_p6 }
  0x32   :  { %p5647_p9 = pnand %p5646_p8, %p5640_p5 }
  0x34   :  { %5650 = shalt.err (!%p5647_p9)
}
  0x35   :  { %87 = dma.hbm_to_vmem [thread:$0]  %s7262_s5, 1024, %s82_s29, [#allocation11], %s5751_s1, %s5751_s1, %s5752_s25  }
  0x36   :  { %s5651_s20 = scalar_lea.hbm %s7257_s0, 1792 }
  0x37   :  { %p5652_p10 = scmp.ne.s32.totalorder %s7257_s0, %s5651_s20  ;;  %p5655_p11 = scmp.lt.u32.totalorder %s5651_s20, %s7257_s0 }
  0x39   :  { %p5657_p12 = pnand %p5655_p11, %p5652_p10 }
  0x3b   :  { %5660 = shalt.err (!%p5657_p12)
}
  0x3c   :  { %s5661_s26 = scalar_lea.vmem %s5829_s8, 1792  ;;  %p5666_p0 = scmp.lt.s32.totalorder %s5829_s8, %s5829_s8 }
  0x3d   :  { %p5662_p13 = scmp.ne.s32.totalorder %s5829_s8, %s5661_s26  ;;  %p5667_p1 = scmp.lt.s32.totalorder %s5661_s26, %s5661_s26 }
  0x3f   :  { %p5668_p2 = por %p5667_p1, %p5666_p0 }
  0x41   :  { %p5669_p3 = pnand %p5668_p2, %p5662_p13 }
  0x43   :  { %5672 = shalt.err (!%p5669_p3)
}
  0x44   :  { %s5755_s5 = smov 896   ;;  %s5756_s1 = smov 56  }
  0x45   :  { %27 = dma.hbm_to_vmem [thread:$0]  %s7257_s0, 1792, %s5829_s8, [#allocation3], %s5755_s5, %s5755_s5, %s5756_s1  }
  0x46   :  { %s5757_s28 = smov [#allocation6]   ;;  %s5673_s10 = scalar_lea.hbm %s7259_s2, 25088 }
  0x47   :  { %s45_s29 = sshll.u32 %s5757_s28, 4  ;;  %p5674_p4 = scmp.ne.s32.totalorder %s7259_s2, %s5673_s10  ;;  %s46_s29 = int_to_ptr.vmem [resolvable:$true] %s45_s29 }
  0x48   :  { %p5677_p5 = scmp.lt.u32.totalorder %s5673_s10, %s7259_s2 }
  0x4a   :  { %p5679_p6 = pnand %p5677_p5, %p5674_p4 }
  0x4c   :  { %5682 = shalt.err (!%p5679_p6)
}
  0x4d   :  { %s5683_s15 = scalar_lea.vmem %s46_s29, 25088  ;;  %p5688_p8 = scmp.lt.s32.totalorder %s46_s29, %s46_s29 }
  0x4e   :  { %p5684_p7 = scmp.ne.s32.totalorder %s46_s29, %s5683_s15  ;;  %p5689_p9 = scmp.lt.s32.totalorder %s5683_s15, %s5683_s15 }
  0x50   :  { %p5690_p10 = por %p5689_p9, %p5688_p8 }
  0x52   :  { %p5691_p11 = pnand %p5690_p10, %p5684_p7 }
  0x54   :  { %5694 = shalt.err (!%p5691_p11)
}
  0x55   :  { %s5758_s0 = smov 256   ;;  %s5759_s8 = smov 16  }
  0x56   :  { %51 = dma.hbm_to_vmem [thread:$0]  %s7259_s2, 25088, %s46_s29, [#allocation5], %s5758_s0, %s5758_s0, %s5759_s8  }
  0x57   :  { %s5760_s17 = smov [#allocation9]   ;;  %s5761_s19 = smov [#allocation12]  }
  0x58   :  { %s69_s18 = sshll.u32 %s5760_s17, 4  ;;  %s94_s20 = sshll.u32 %s5761_s19, 4  ;;  %s70_s18 = int_to_ptr.vmem [resolvable:$true] %s69_s18  ;;  %s95_s20 = int_to_ptr.vmem [resolvable:$true] %s94_s20 }
  0x59   :  { %s5695_s23 = scalar_lea.hbm %s7261_s4, 4096 }
  0x5a   :  { %p5696_p12 = scmp.ne.s32.totalorder %s7261_s4, %s5695_s23  ;;  %p5699_p13 = scmp.lt.u32.totalorder %s5695_s23, %s7261_s4 }
  0x5c   :  { %p5701_p0 = pnand %p5699_p13, %p5696_p12 }
  0x5e   :  { %5704 = shalt.err (!%p5701_p0)
}
  0x5f   :  { %s5705_s2 = scalar_lea.vmem %s70_s18, 4096  ;;  %p5710_p2 = scmp.lt.s32.totalorder %s70_s18, %s70_s18 }
  0x60   :  { %p5706_p1 = scmp.ne.s32.totalorder %s70_s18, %s5705_s2  ;;  %p5711_p3 = scmp.lt.s32.totalorder %s5705_s2, %s5705_s2 }
  0x62   :  { %p5712_p4 = por %p5711_p3, %p5710_p2 }
  0x64   :  { %p5713_p5 = pnand %p5712_p4, %p5706_p1 }
  0x66   :  { %5716 = shalt.err (!%p5713_p5)
}
  0x67   :  { %75 = dma.hbm_to_vmem [thread:$0]  %s7261_s4, 4096, %s70_s18, [#allocation8], %s5758_s0, %s5758_s0, %s5759_s8  }
  0x68   :  { %s5717_s30 = scalar_lea.hbm %s7263_s6, 688 }
  0x69   :  { %p5718_p6 = scmp.ne.s32.totalorder %s7263_s6, %s5717_s30  ;;  %p5721_p7 = scmp.lt.u32.totalorder %s5717_s30, %s7263_s6 }
  0x6b   :  { %p5723_p8 = pnand %p5721_p7, %p5718_p6 }
  0x6d   :  { %5726 = shalt.err (!%p5723_p8)
}
  0x6e   :  { %s5727_s13 = scalar_lea.vmem %s95_s20, 688  ;;  %s5731_s14 = scalar_lea.vmem %s95_s20, 704 }
  0x6f   :  { %p5728_p9 = scmp.ne.s32.totalorder %s95_s20, %s5727_s13  ;;  %p5732_p10 = scmp.lt.s32.totalorder %s95_s20, %s95_s20 }
  0x70   :  { %p5733_p11 = scmp.lt.s32.totalorder %s5731_s14, %s5727_s13 }
  0x72   :  { %p5734_p12 = por %p5733_p11, %p5732_p10 }
  0x74   :  { %p5735_p13 = pnand %p5734_p12, %p5728_p9 }
  0x76   :  { %5738 = shalt.err (!%p5735_p13)
}
  0x77   :  { %97 = dma.hbm_to_vmem [thread:$0]  %s7263_s6, 688, %s95_s20, [#allocation11]  }
  0x78   :  { %5739 = dma.done.wait [#allocation3], 1792  }
  0x79   :  { %5740 = vsyncadd [#allocation3], 4294965504 }
  0x7a   :  { %5741 = dma.done.wait [#allocation5], 25344  }
  0x7b   :  { %5742 = vsyncadd [#allocation5], 4294941952 }
  0x7c   :  { %5743 = dma.done.wait [#allocation8], 20480  }
  0x7d   :  { %5744 = vsyncadd [#allocation8], 4294946816 }
  0x7e   :  { %5745 = dma.done.wait [#allocation11], 1712  }
  0x7f   :  { %5746 = vsyncadd [#allocation11], 4294965584  ;;  %v5896_v0 = vld [vmem:[#allocation6] sm:$0xff]  ;;  %v5898_v1 = vld [vmem:[#allocation6 + $0x10] sm:$0xff]  ;;  %vm2691_vm0 = vcmask 130048   ;;  %vm3546_vm1 = vcmask 1041408  }
  0x80   :  { %v5900_v2 = vld [vmem:[#allocation6 + $0x200] sm:$0xff]  ;;  %v339_v3 = vunpack.c.l.s8.bf16 %v5896_v0  ;;  %v343_v4 = vunpack.c.l.s8.bf16 %v5898_v1  ;;  %v5904_v5 = vld [vmem:[#allocation6 + $0x210] sm:$0xff]  ;;  %vm5763_vm2 = vmmov 1   ;;  %vm3539_vm4 = vcmask 80896  }
  0x81   :  { %v5906_v6 = vld [vmem:[#allocation6 + $0x20] sm:$0xff]  ;;  %v5908_v7 = vld [vmem:[#allocation6 + $0x30] sm:$0xff]  ;;  %v467_v8 = vunpack.c.l.s8.bf16 %v5900_v2  ;;  %v7265_v9 = vunpack.c.h.s8.bf16 %v5900_v2  ;;  %v471_v10 = vunpack.c.l.s8.bf16 %v5904_v5  ;;  %v7266_v11 = vunpack.c.h.s8.bf16 %v5904_v5  ;;  %vm6954_vm3 = vmpackc.low %vm3546_vm1, %vm5763_vm2 }
  0x82   :  { %v5914_v12 = vld [vmem:[#allocation6 + $0x220] sm:$0xff]  ;;  %v5916_v13 = vld [vmem:[#allocation6 + $0x230] sm:$0xff]  ;;  %v5051_v15 = vcombine.high %v339_v3, %v343_v4  ;;  %v5050_v16 = vcombine.low %v339_v3, %v343_v4  ;;  %v347_v17 = vunpack.c.l.s8.bf16 %v5906_v6  ;;  %v351_v24 = vunpack.c.l.s8.bf16 %v5908_v7 }
  0x83   :  { %v5918_v14 = vld [vmem:[#allocation6 + $0x40] sm:$0xff]  ;;  %v5921_v18 = vld [vmem:[#allocation6 + $0x50] sm:$0xff]  ;;  %v5179_v21 = vcombine.high %v467_v8, %v471_v10  ;;  %v5931_v22 = vcombine.low %v7265_v9, %v7266_v11  ;;  %v5178_v23 = vcombine.low %v467_v8, %v471_v10  ;;  %v475_v25 = vunpack.c.l.s8.bf16 %v5914_v12 }
  0x84   :  { %v5923_v19 = vld [vmem:[#allocation6 + $0x240] sm:$0xff]  ;;  %v5925_v20 = vld [vmem:[#allocation6 + $0x250] sm:$0xff]  ;;  %2695 = vmatprep.subr.bf16.mxu1 %v5051_v15  ;;  %v479_v26 = vunpack.c.l.s8.bf16 %v5916_v13  ;;  %v355_v27 = vunpack.c.l.s8.bf16 %v5918_v14  ;;  %v359_v28 = vunpack.c.l.s8.bf16 %v5921_v18  ;;  %v5059_v31 = vcombine.high %v347_v17, %v351_v24 }
  0x85   :  { %7343 = vst [vmem:[#allocation17_spill] sm:$0xff] %v5931_v22  ;;  %v5938_v29 = vld [vmem:[#allocation6 + $0x60] sm:$0xff]  ;;  %v5940_v30 = vld [vmem:[#allocation6 + $0x70] sm:$0xff]  ;;  %2738 = vmatprep.subr.bf16.mxu0 %v5179_v21  ;;  %2696 = vmatpush1.bf16.msra.mxu1 %v5050_v16  ;;  %v5058_v32 = vcombine.low %v347_v17, %v351_v24  ;;  %v483_v33 = vunpack.c.l.s8.bf16 %v5923_v19  ;;  %v487_v34 = vunpack.c.l.s8.bf16 %v5925_v20  ;;  %vm5039_vm5 = vcmask 7168  }
  0x86   :  { %v5944_v35 = vld [vmem:[#allocation6 + $0x260] sm:$0xff]  ;;  %v5946_v36 = vld [vmem:[#allocation6 + $0x270] sm:$0xff]  ;;  %2739 = vmatpush1.bf16.msra.mxu0 %v5178_v23  ;;  %v5187_v37 = vcombine.high %v475_v25, %v479_v26  ;;  %v5186_v38 = vcombine.low %v475_v25, %v479_v26  ;;  %v5067_v39 = vcombine.high %v355_v27, %v359_v28  ;;  %2697 = vmatprep.subr.bf16.mxu1 %v5059_v31  ;;  %v363_v41 = vunpack.c.l.s8.bf16 %v5938_v29 }
  0x87   :  { %v5195_v40 = vcombine.high %v483_v33, %v487_v34  ;;  %v367_v42 = vunpack.c.l.s8.bf16 %v5940_v30  ;;  %v5950_v43 = vld [vmem:[#allocation6 + $0x80] sm:$0xff]  ;;  %v5952_v44 = vld [vmem:[#allocation6 + $0x90] sm:$0xff]  ;;  %v491_v45 = vunpack.c.l.s8.bf16 %v5944_v35  ;;  %v495_v46 = vunpack.c.l.s8.bf16 %v5946_v36 }
  0x88   :  { %2740 = vmatprep.subr.bf16.mxu0 %v5187_v37  ;;  %v5956_v47 = vld [vmem:[#allocation6 + $0x280] sm:$0xff]  ;;  %v5958_v48 = vld [vmem:[#allocation6 + $0x290] sm:$0xff]  ;;  %v5066_v49 = vcombine.low %v355_v27, %v359_v28  ;;  %v5194_v50 = vcombine.low %v483_v33, %v487_v34  ;;  %v371_v52 = vunpack.c.l.s8.bf16 %v5950_v43  ;;  %v375_v53 = vunpack.c.l.s8.bf16 %v5952_v44 }
  0x89   :  { %2698 = vmatpush1.bf16.msra.mxu1 %v5058_v32  ;;  %v5075_v51 = vcombine.high %v363_v41, %v367_v42  ;;  %v5203_v54 = vcombine.high %v491_v45, %v495_v46  ;;  %v499_v55 = vunpack.c.l.s8.bf16 %v5956_v47  ;;  %v503_v56 = vunpack.c.l.s8.bf16 %v5958_v48  ;;  %v5964_v57 = vld [vmem:[#allocation6 + $0xa0] sm:$0xff]  ;;  %v5966_v58 = vld [vmem:[#allocation6 + $0xb0] sm:$0xff] }
  0x8a   :  { %2741 = vmatpush1.bf16.msra.mxu0 %v5186_v38  ;;  %2699 = vmatprep.subr.bf16.mxu1 %v5067_v39  ;;  %v5968_v59 = vld [vmem:[#allocation6 + $0x2a0] sm:$0xff]  ;;  %v5970_v60 = vld [vmem:[#allocation6 + $0x2b0] sm:$0xff]  ;;  %v5074_v61 = vcombine.low %v363_v41, %v367_v42  ;;  %v5202_v62 = vcombine.low %v491_v45, %v495_v46  ;;  %v5083_v63 = vcombine.high %v371_v52, %v375_v53  ;;  %v379_v3 = vunpack.c.l.s8.bf16 %v5964_v57 }
  0x8b   :  { %2742 = vmatprep.subr.bf16.mxu0 %v5195_v40  ;;  %v383_v4 = vunpack.c.l.s8.bf16 %v5966_v58  ;;  %v5211_v8 = vcombine.high %v499_v55, %v503_v56  ;;  %v507_v10 = vunpack.c.l.s8.bf16 %v5968_v59  ;;  %v511_v15 = vunpack.c.l.s8.bf16 %v5970_v60  ;;  %v5976_v16 = vld [vmem:[#allocation6 + $0xc0] sm:$0xff]  ;;  %v5978_v17 = vld [vmem:[#allocation6 + $0xd0] sm:$0xff] }
  0x8c   :  { %v5980_v21 = vld [vmem:[#allocation6 + $0x2c0] sm:$0xff]  ;;  %v5982_v23 = vld [vmem:[#allocation6 + $0x2d0] sm:$0xff]  ;;  %v5082_v24 = vcombine.low %v371_v52, %v375_v53  ;;  %v5210_v25 = vcombine.low %v499_v55, %v503_v56  ;;  %v387_v27 = vunpack.c.l.s8.bf16 %v5976_v16  ;;  %v391_v28 = vunpack.c.l.s8.bf16 %v5978_v17 }
  0x8d   :  { %2700 = vmatpush1.bf16.msra.mxu1 %v5066_v49  ;;  %7344 = vst [vmem:[#allocation18_spill] sm:$0xff] %v5980_v21  ;;  %7345 = vst [vmem:[#allocation19_spill] sm:$0xff] %v5982_v23  ;;  %v5091_v26 = vcombine.high %v379_v3, %v383_v4  ;;  %v5219_v31 = vcombine.high %v507_v10, %v511_v15  ;;  %v515_v32 = vunpack.c.l.s8.bf16 %v5980_v21  ;;  %v519_v33 = vunpack.c.l.s8.bf16 %v5982_v23  ;;  %v5988_v34 = vld [vmem:[#allocation6 + $0xe0] sm:$0xff]  ;;  %v5990_v37 = vld [vmem:[#allocation6 + $0xf0] sm:$0xff] }
  0x8e   :  { %2743 = vmatpush1.bf16.msra.mxu0 %v5194_v50  ;;  %2701 = vmatprep.subr.bf16.mxu1 %v5075_v51  ;;  %v5992_v38 = vld [vmem:[#allocation6 + $0x2e0] sm:$0xff]  ;;  %v5994_v39 = vld [vmem:[#allocation6 + $0x2f0] sm:$0xff]  ;;  %v5090_v40 = vcombine.low %v379_v3, %v383_v4  ;;  %v5218_v41 = vcombine.low %v507_v10, %v511_v15  ;;  %v5099_v42 = vcombine.high %v387_v27, %v391_v28  ;;  %v395_v45 = vunpack.c.l.s8.bf16 %v5988_v34 }
  0x8f   :  { %2744 = vmatprep.subr.bf16.mxu0 %v5203_v54  ;;  %7346 = vst [vmem:[#allocation20_spill] sm:$0xff] %v5992_v38  ;;  %7347 = vst [vmem:[#allocation21_spill] sm:$0xff] %v5994_v39  ;;  %v399_v46 = vunpack.c.l.s8.bf16 %v5990_v37  ;;  %v5227_v49 = vcombine.high %v515_v32, %v519_v33  ;;  %v523_v50 = vunpack.c.l.s8.bf16 %v5992_v38  ;;  %v527_v51 = vunpack.c.l.s8.bf16 %v5994_v39  ;;  %v6000_v52 = vld [vmem:[#allocation6 + $0x100] sm:$0xff]  ;;  %v6002_v53 = vld [vmem:[#allocation6 + $0x110] sm:$0xff] }
  0x90   :  { %v6004_v54 = vld [vmem:[#allocation6 + $0x300] sm:$0xff]  ;;  %v6006_v55 = vld [vmem:[#allocation6 + $0x310] sm:$0xff]  ;;  %v5098_v56 = vcombine.low %v387_v27, %v391_v28  ;;  %v407_v3 = vunpack.c.l.s8.bf16 %v6002_v53  ;;  %v121_v28 = vld [vmem:[#allocation2 + $0x8] sm:$0xff]  ;;  %v360_v23 = vunpack.c.h.s8.bf16 %v5921_v18 }
  0x91   :  { %2702 = vmatpush1.bf16.msra.mxu1 %v5074_v61  ;;  %7348 = vst [vmem:[#allocation22_spill] sm:$0xff] %v6004_v54  ;;  %7349 = vst [vmem:[#allocation23_spill] sm:$0xff] %v6006_v55  ;;  %v5226_v61 = vcombine.low %v515_v32, %v519_v33  ;;  %v5235_v4 = vcombine.high %v523_v50, %v527_v51  ;;  %v535_v10 = vunpack.c.l.s8.bf16 %v6006_v55  ;;  %v6012_v15 = vld [vmem:[#allocation6 + $0x120] sm:$0xff] }
  0x92   :  { %2745 = vmatpush1.bf16.msra.mxu0 %v5202_v62  ;;  %2703 = vmatprep.subr.bf16.mxu1 %v5083_v63  ;;  %v5107_v62 = vcombine.high %v395_v45, %v399_v46  ;;  %v403_v63 = vunpack.c.l.s8.bf16 %v6000_v52  ;;  %v5106_v27 = vcombine.low %v395_v45, %v399_v46  ;;  %v5234_v32 = vcombine.low %v523_v50, %v527_v51  ;;  %v6026_v45 = vld [vmem:[#allocation6 + $0x150] sm:$0xff]  ;;  %v6028_v46 = vld [vmem:[#allocation6 + $0x340] sm:$0xff] }
  0x93   :  { %2746 = vmatprep.subr.bf16.mxu0 %v5211_v8  ;;  %v531_v8 = vunpack.c.l.s8.bf16 %v6004_v54  ;;  %7352 = vst [vmem:[#allocation26_spill] sm:$0xff] %v6028_v46  ;;  %v6030_v50 = vld [vmem:[#allocation6 + $0x350] sm:$0xff]  ;;  %v423_v39 = vunpack.c.l.s8.bf16 %v6026_v45 }
  0x94   :  { %v5115_v33 = vcombine.high %v403_v63, %v407_v3  ;;  %7353 = vst [vmem:[#allocation27_spill] sm:$0xff] %v6030_v50 }
  0x95   :  { %2704 = vmatpush1.bf16.msra.mxu1 %v5082_v24  ;;  %v6014_v24 = vld [vmem:[#allocation6 + $0x130] sm:$0xff]  ;;  %v5243_v9 = vcombine.high %v531_v8, %v535_v10 }
  0x96   :  { %2747 = vmatpush1.bf16.msra.mxu0 %v5210_v25  ;;  %2705 = vmatprep.subr.bf16.mxu1 %v5091_v26  ;;  %v6016_v25 = vld [vmem:[#allocation6 + $0x320] sm:$0xff]  ;;  %v6018_v26 = vld [vmem:[#allocation6 + $0x330] sm:$0xff] }
  0x97   :  { %2748 = vmatprep.subr.bf16.mxu0 %v5219_v31  ;;  %7350 = vst [vmem:[#allocation24_spill] sm:$0xff] %v6016_v25  ;;  %7351 = vst [vmem:[#allocation25_spill] sm:$0xff] %v6018_v26  ;;  %v128_v31 = vld [vmem:[#allocation2 + $0x40] sm:$0xff]  ;;  %v539_v11 = vunpack.c.l.s8.bf16 %v6016_v25  ;;  %v543_v22 = vunpack.c.l.s8.bf16 %v6018_v26  ;;  %v5242_v26 = vcombine.low %v531_v8, %v535_v10 }
  0x98   :  { %v6032_v51 = vpack.c.bf16 %v128_v31, %v121_v28  ;;  %v547_v28 = vunpack.c.l.s8.bf16 %v6028_v46  ;;  %v551_v31 = vunpack.c.l.s8.bf16 %v6030_v50  ;;  %v6061_v46 = vld [vmem:[#allocation6 + $0x180] sm:$0xff] }
  0x99   :  { %2706 = vmatpush1.bf16.msra.mxu1 %v5090_v40  ;;  %v411_v40 = vunpack.c.l.s8.bf16 %v6012_v15  ;;  %v5251_v38 = vcombine.high %v539_v11, %v543_v22 }
  0x9a   :  { %2749 = vmatpush1.bf16.msra.mxu0 %v5218_v41  ;;  %2707 = vmatprep.subr.bf16.mxu1 %v5099_v42  ;;  %v415_v41 = vunpack.c.l.s8.bf16 %v6014_v24  ;;  %v123_v42 = vld [vmem:[#allocation2 + $0x18] sm:$0xff]  ;;  %v5258_v18 = vcombine.low %v547_v28, %v551_v31 }
  0x9b   :  { %2750 = vmatprep.subr.bf16.mxu0 %v5227_v49  ;;  %v130_v49 = vld [vmem:[#allocation2 + $0x50] sm:$0xff]  ;;  %2727 = vmatprep.mubr.bf16.mxu1 %v6032_v51 }
  0x9c   :  { %v6036_v55 = vpack.c.bf16 %v130_v49, %v123_v42  ;;  %v5123_v25 = vcombine.high %v411_v40, %v415_v41  ;;  %v5122_v10 = vcombine.low %v411_v40, %v415_v41 }
  0x9d   :  { %2708 = vmatpush1.bf16.msra.mxu1 %v5098_v56  ;;  %v6024_v56 = vld [vmem:[#allocation6 + $0x140] sm:$0xff] }
  0x9e   :  { %2751 = vmatpush1.bf16.msra.mxu0 %v5226_v61  ;;  %2709 = vmatprep.subr.bf16.mxu1 %v5107_v62  ;;  %v7278_v62 = vunpack.c.h.s8.bf16 %v5898_v1  ;;  %7354 = vst [vmem:[#allocation28_spill] sm:$0xff] %v6036_v55  ;;  %v419_v54 = vunpack.c.l.s8.bf16 %v6024_v56  ;;  %v6042_v61 = vld [vmem:[#allocation6 + $0x160] sm:$0xff] }
  0x9f   :  { %2752 = vmatprep.subr.bf16.mxu0 %v5235_v4  ;;  %v5114_v4 = vcombine.low %v403_v63, %v407_v3  ;;  %v6047_v63 = vld [vmem:[#allocation6 + $0x360] sm:$0xff]  ;;  %v6049_v3 = vld [vmem:[#allocation6 + $0x370] sm:$0xff]  ;;  %2770 = vmatprep.mubr.bf16.mxu0 %v6036_v55  ;;  %v427_v49 = vunpack.c.l.s8.bf16 %v6042_v61 }
  0xa0   :  { %7355 = vst [vmem:[#allocation29_spill] sm:$0xff] %v6047_v63  ;;  %7356 = vst [vmem:[#allocation30_spill] sm:$0xff] %v6049_v3  ;;  %v5131_v42 = vcombine.high %v419_v54, %v423_v39  ;;  %v6063_v55 = vld [vmem:[#allocation6 + $0x190] sm:$0xff]  ;;  %v555_v40 = vunpack.c.l.s8.bf16 %v6047_v63 }
  0xa1   :  { %2710 = vmatpush1.bf16.msra.mxu1 %v5106_v27  ;;  %v6044_v27 = vld [vmem:[#allocation6 + $0x170] sm:$0xff]  ;;  %v439_v63 = vunpack.c.l.s8.bf16 %v6063_v55 }
  0xa2   :  { %2753 = vmatpush1.bf16.msra.mxu0 %v5234_v32  ;;  %2711 = vmatprep.subr.bf16.mxu1 %v5115_v33  ;;  %v5250_v32 = vcombine.low %v539_v11, %v543_v22  ;;  %v356_v33 = vunpack.c.h.s8.bf16 %v5918_v14  ;;  %v431_v50 = vunpack.c.l.s8.bf16 %v6044_v27  ;;  %v559_v11 = vunpack.c.l.s8.bf16 %v6049_v3 }
  0xa3   :  { %2754 = vmatprep.subr.bf16.mxu0 %v5243_v9  ;;  %v7357_v9 = vunpack.c.h.s8.bf16 %v5896_v0  ;;  %v364_v14 = vunpack.c.h.s8.bf16 %v5938_v29  ;;  %v5130_v22 = vcombine.low %v419_v54, %v423_v39  ;;  %v372_v3 = vunpack.c.h.s8.bf16 %v5950_v43  ;;  %v6081_v39 = vld [vmem:[#allocation6 + $0x1a0] sm:$0xff] }
  0xa4   :  { %v6073_v41 = vcombine.high %v356_v33, %v360_v23  ;;  %v5139_v29 = vcombine.high %v427_v49, %v431_v50  ;;  %v380_v43 = vunpack.c.h.s8.bf16 %v5964_v57 }
  0xa5   :  { %v6056_v8 = vcombine.low %v7357_v9, %v7278_v62  ;;  %2712 = vmatpush1.bf16.msra.mxu1 %v5114_v4  ;;  %v5259_v9 = vcombine.high %v547_v28, %v551_v31  ;;  %v6075_v4 = vcombine.low %v356_v33, %v360_v23  ;;  %v368_v62 = vunpack.c.h.s8.bf16 %v5940_v30  ;;  %v6093_v33 = vld [vmem:[#allocation6 + $0x3a0] sm:$0xff] }
  0xa6   :  { %2755 = vmatpush1.bf16.msra.mxu0 %v5242_v26  ;;  %2713 = vmatprep.subr.bf16.mxu1 %v5123_v25  ;;  %v6069_v25 = vld [vmem:[#allocation6 + $0x380] sm:$0xff]  ;;  %v6071_v26 = vld [vmem:[#allocation6 + $0x390] sm:$0xff]  ;;  %v376_v23 = vunpack.c.h.s8.bf16 %v5952_v44  ;;  %v5267_v30 = vcombine.high %v555_v40, %v559_v11  ;;  %v384_v44 = vunpack.c.h.s8.bf16 %v5966_v58  ;;  %v392_v58 = vunpack.c.h.s8.bf16 %v5978_v17 }
  0xa7   :  { %2756 = vmatprep.subr.bf16.mxu0 %v5251_v38  ;;  %7358 = vst [vmem:[#allocation31_spill] sm:$0xff] %v6069_v25  ;;  %7359 = vst [vmem:[#allocation32_spill] sm:$0xff] %v6071_v26  ;;  %v435_v38 = vunpack.c.l.s8.bf16 %v6061_v46  ;;  %v6083_v54 = vcombine.high %v364_v14, %v368_v62  ;;  %v6085_v21 = vcombine.low %v364_v14, %v368_v62  ;;  %v563_v28 = vunpack.c.l.s8.bf16 %v6069_v25 }
  0xa8   :  { %v567_v31 = vunpack.c.l.s8.bf16 %v6071_v26  ;;  %v6099_v62 = vcombine.low %v372_v3, %v376_v23  ;;  %v443_v26 = vunpack.c.l.s8.bf16 %v6081_v39  ;;  %v388_v25 = vunpack.c.h.s8.bf16 %v5976_v16 }
  0xa9   :  { %2714 = vmatpush1.bf16.msra.mxu1 %v5122_v10  ;;  %7360 = vst [vmem:[#allocation33_spill] sm:$0xff] %v6083_v54  ;;  %v6090_v10 = vld [vmem:[#allocation6 + $0x1b0] sm:$0xff]  ;;  %v6097_v54 = vcombine.high %v372_v3, %v376_v23  ;;  %v5147_v14 = vcombine.high %v435_v38, %v439_v63  ;;  %v6111_v3 = vcombine.low %v380_v43, %v384_v44 }
  0xaa   :  { %2757 = vmatpush1.bf16.msra.mxu0 %v5250_v32  ;;  %2715 = vmatprep.subr.bf16.mxu1 %v5131_v42  ;;  %v5138_v32 = vcombine.low %v427_v49, %v431_v50  ;;  %v6095_v42 = vld [vmem:[#allocation6 + $0x3b0] sm:$0xff]  ;;  %7363 = vst [vmem:[#allocation36_spill] sm:$0xff] %v6099_v62  ;;  %v447_v57 = vunpack.c.l.s8.bf16 %v6090_v10  ;;  %v6105_v50 = vld [vmem:[#allocation6 + $0x1c0] sm:$0xff]  ;;  %v6121_v62 = vcombine.high %v388_v25, %v392_v58 }
  0xab   :  { %2758 = vmatprep.subr.bf16.mxu0 %v5259_v9  ;;  %7361 = vst [vmem:[#allocation34_spill] sm:$0xff] %v6095_v42  ;;  %7362 = vst [vmem:[#allocation35_spill] sm:$0xff] %v6097_v54  ;;  %v5266_v9 = vcombine.low %v555_v40, %v559_v11  ;;  %v6107_v49 = vld [vmem:[#allocation6 + $0x1d0] sm:$0xff]  ;;  %v6109_v54 = vcombine.high %v380_v43, %v384_v44  ;;  %v5275_v40 = vcombine.high %v563_v28, %v567_v31 }
  0xac   :  { %v571_v11 = vunpack.c.l.s8.bf16 %v6093_v33  ;;  %v575_v16 = vunpack.c.l.s8.bf16 %v6095_v42  ;;  %v6119_v23 = vld [vmem:[#allocation6 + $0x3d0] sm:$0xff]  ;;  %7365 = vst [vmem:[#allocation38_spill] sm:$0xff] %v6121_v62  ;;  %v400_v43 = vunpack.c.h.s8.bf16 %v5990_v37  ;;  %v5274_v17 = vcombine.low %v563_v28, %v567_v31 }
  0xad   :  { %2716 = vmatpush1.bf16.msra.mxu1 %v5130_v22  ;;  %7364 = vst [vmem:[#allocation37_spill] sm:$0xff] %v6109_v54  ;;  %v396_v22 = vunpack.c.h.s8.bf16 %v5988_v34  ;;  %v6123_v54 = vcombine.low %v388_v25, %v392_v58  ;;  %v455_v44 = vunpack.c.l.s8.bf16 %v6107_v49  ;;  %v404_v42 = vunpack.c.h.s8.bf16 %v6000_v52  ;;  %v6143_v58 = vld [vmem:[#allocation6 + $0x3f0] sm:$0xff] }
  0xae   :  { %2759 = vmatpush1.bf16.msra.mxu0 %v5258_v18  ;;  %2717 = vmatprep.subr.bf16.mxu1 %v5139_v29  ;;  %v5146_v18 = vcombine.low %v435_v38, %v439_v63  ;;  %v6117_v29 = vld [vmem:[#allocation6 + $0x3c0] sm:$0xff]  ;;  %v5155_v34 = vcombine.high %v443_v26, %v447_v57  ;;  %v6131_v38 = vld [vmem:[#allocation6 + $0x1f0] sm:$0xff]  ;;  %v408_v37 = vunpack.c.h.s8.bf16 %v6002_v53  ;;  %v5283_v28 = vcombine.high %v571_v11, %v575_v16 }
  0xaf   :  { %2760 = vmatprep.subr.bf16.mxu0 %v5267_v30  ;;  %7366 = vst [vmem:[#allocation39_spill] sm:$0xff] %v6123_v54  ;;  %v451_v30 = vunpack.c.l.s8.bf16 %v6105_v50  ;;  %v6129_v63 = vld [vmem:[#allocation6 + $0x1e0] sm:$0xff]  ;;  %v6133_v62 = vcombine.high %v396_v22, %v400_v43  ;;  %v6135_v25 = vcombine.low %v396_v22, %v400_v43  ;;  %v579_v31 = vunpack.c.l.s8.bf16 %v6117_v29 }
  0xb0   :  { %v412_v52 = vunpack.c.h.s8.bf16 %v6012_v15  ;;  %v6145_v54 = vcombine.high %v404_v42, %v408_v37  ;;  %v416_v22 = vunpack.c.h.s8.bf16 %v6014_v24  ;;  %v5282_v53 = vcombine.low %v571_v11, %v575_v16  ;;  %v6160_v16 = vld [vmem:[#allocation6 + $0x400] sm:$0xff] }
  0xb1   :  { %2718 = vmatpush1.bf16.msra.mxu1 %v5138_v32  ;;  %7367 = vst [vmem:[#allocation40_spill] sm:$0xff] %v6133_v62  ;;  %7368 = vst [vmem:[#allocation41_spill] sm:$0xff] %v6135_v25  ;;  %v583_v32 = vunpack.c.l.s8.bf16 %v6119_v23  ;;  %v6147_v62 = vcombine.low %v404_v42, %v408_v37  ;;  %v463_v43 = vunpack.c.l.s8.bf16 %v6131_v38  ;;  %v420_v25 = vunpack.c.h.s8.bf16 %v6024_v56 }
  0xb2   :  { %2761 = vmatpush1.bf16.msra.mxu0 %v5266_v9  ;;  %2719 = vmatprep.subr.bf16.mxu1 %v5147_v14  ;;  %v5154_v9 = vcombine.low %v443_v26, %v447_v57  ;;  %v6141_v14 = vld [vmem:[#allocation6 + $0x3e0] sm:$0xff]  ;;  %v5163_v15 = vcombine.high %v451_v30, %v455_v44  ;;  %v6153_v26 = vcombine.high %v412_v52, %v416_v22  ;;  %v424_v42 = vunpack.c.h.s8.bf16 %v6026_v45 }
  0xb3   :  { %2762 = vmatprep.subr.bf16.mxu0 %v5275_v40  ;;  %7369 = vst [vmem:[#allocation42_spill] sm:$0xff] %v6147_v62  ;;  %v459_v40 = vunpack.c.l.s8.bf16 %v6129_v63  ;;  %v6155_v57 = vcombine.low %v412_v52, %v416_v22  ;;  %v5291_v37 = vcombine.high %v579_v31, %v583_v32  ;;  %v587_v24 = vunpack.c.l.s8.bf16 %v6141_v14 }
  0xb4   :  { %7370 = vst [vmem:[#allocation43_spill] sm:$0xff] %v6153_v26  ;;  %v591_v11 = vunpack.c.l.s8.bf16 %v6143_v58  ;;  %v5162_v56 = vcombine.low %v451_v30, %v455_v44  ;;  %v6167_v26 = vcombine.low %v420_v25, %v424_v42  ;;  %v432_v52 = vunpack.c.h.s8.bf16 %v6044_v27  ;;  %v6174_v30 = vld [vmem:[#allocation6 + $0x430] sm:$0xff] }
  0xb5   :  { %2720 = vmatpush1.bf16.msra.mxu1 %v5146_v18  ;;  %7371 = vst [vmem:[#allocation44_spill] sm:$0xff] %v6155_v57  ;;  %v428_v18 = vunpack.c.h.s8.bf16 %v6042_v61  ;;  %v5290_v45 = vcombine.low %v579_v31, %v583_v32  ;;  %v5170_v22 = vcombine.low %v459_v40, %v463_v43  ;;  %v6170_v57 = vld [vmem:[#allocation6 + $0x420] sm:$0xff]  ;;  %v436_v62 = vunpack.c.h.s8.bf16 %v6061_v46 }
  0xb6   :  { %2763 = vmatpush1.bf16.msra.mxu0 %v5274_v17  ;;  %2721 = vmatprep.subr.bf16.mxu1 %v5155_v34  ;;  %v6163_v17 = vld [vmem:[#allocation6 + $0x410] sm:$0xff]  ;;  %v6165_v34 = vcombine.high %v420_v25, %v424_v42  ;;  %7372 = vst [vmem:[#allocation45_spill] sm:$0xff] %v6167_v26  ;;  %v595_v61 = vunpack.c.l.s8.bf16 %v6160_v16  ;;  %v440_v27 = vunpack.c.h.s8.bf16 %v6063_v55  ;;  %v5299_v31 = vcombine.high %v587_v24, %v591_v11 }
  0xb7   :  { %2764 = vmatprep.subr.bf16.mxu0 %v5283_v28  ;;  %v5171_v28 = vcombine.high %v459_v40, %v463_v43  ;;  %v6176_v44 = vcombine.high %v428_v18, %v432_v52  ;;  %v6178_v25 = vcombine.low %v428_v18, %v432_v52  ;;  %v5298_v32 = vcombine.low %v587_v24, %v591_v11  ;;  %v122_v43 = vld [vmem:[#allocation2 + $0x10] sm:$0xff] }
  0xb8   :  { %v599_v40 = vunpack.c.l.s8.bf16 %v6163_v17  ;;  %v444_v46 = vunpack.c.h.s8.bf16 %v6081_v39  ;;  %v603_v42 = vunpack.c.l.s8.bf16 %v6170_v57  ;;  %v6184_v26 = vcombine.high %v436_v62, %v440_v27 }
  0xb9   :  { %2722 = vmatpush1.bf16.msra.mxu1 %v5154_v9  ;;  %7373 = vst [vmem:[#allocation46_spill] sm:$0xff] %v6176_v44  ;;  %v120_v9 = vld [vmem:[#allocation2] sm:$0xff]  ;;  %v6186_v44 = vcombine.low %v436_v62, %v440_v27  ;;  %v448_v18 = vunpack.c.h.s8.bf16 %v6090_v10  ;;  %v607_v55 = vunpack.c.l.s8.bf16 %v6174_v30  ;;  %v352_v24 = vunpack.c.h.s8.bf16 %v5908_v7 }
  0xba   :  { %2765 = vmatpush1.bf16.msra.mxu0 %v5282_v53  ;;  %2723 = vmatprep.subr.bf16.mxu1 %v5163_v15  ;;  %v127_v53 = vld [vmem:[#allocation2 + $0x38] sm:$0xff]  ;;  %v129_v15 = vld [vmem:[#allocation2 + $0x48] sm:$0xff]  ;;  %7374 = vst [vmem:[#allocation47_spill] sm:$0xff] %v6184_v26  ;;  %v452_v39 = vunpack.c.h.s8.bf16 %v6105_v50  ;;  %v7375_v11 = vunpack.c.h.s8.bf16 %v5898_v1  ;;  %v7376_v52 = vunpack.c.h.s8.bf16 %v5896_v0  ;;  %v6197_v62 = vld [vmem:[#allocation6 + $0x440] sm:$0xff]  ;;  %v5307_v7 = vcombine.high %v595_v61, %v599_v40 }
  0xbb   :  { %2766 = vmatprep.subr.bf16.mxu0 %v5291_v37  ;;  %v348_v37 = vunpack.c.h.s8.bf16 %v5906_v6  ;;  %v6199_v27 = vcombine.high %v444_v46, %v448_v18  ;;  %v6201_v10 = vcombine.low %v444_v46, %v448_v18  ;;  %v6204_v6 = vpack.c.bf16 %v127_v53, %v120_v9  ;;  %v125_v18 = vld [vmem:[#allocation2 + $0x28] sm:$0xff] }
  0xbc   :  { %v5053_v26 = vcombine.high %v7376_v52, %v7375_v11  ;;  %v6206_v50 = vpack.c.bf16 %v129_v15, %v122_v43  ;;  %v5306_v1 = vcombine.low %v595_v61, %v599_v40  ;;  %v464_v46 = vunpack.c.h.s8.bf16 %v6131_v38  ;;  %v132_v52 = vld [vmem:[#allocation2 + $0x60] sm:$0xff] }
  0xbd   :  { %2724 = vmatpush1.bf16.msra.mxu1 %v5162_v56  ;;  %v456_v56 = vunpack.c.h.s8.bf16 %v6107_v49  ;;  %v5315_v49 = vcombine.high %v603_v42, %v607_v55  ;;  %v611_v9 = vunpack.c.l.s8.bf16 %v6197_v62  ;;  %v7378_v53 = vunpack.c.h.s8.bf16 %v5904_v5 }
  0xbe   :  { %2767 = vmatpush1.bf16.msra.mxu0 %v5290_v45  ;;  %2725 = vmatprep.subr.bf16.mxu1 %v5171_v28  ;;  %7377 = vst [vmem:[#allocation48_spill] sm:$0xff] %v6206_v50  ;;  %v460_v45 = vunpack.c.h.s8.bf16 %v6129_v63  ;;  %v6209_v28 = vld [vmem:[#allocation6 + $0x450] sm:$0xff]  ;;  %v7379_v63 = vunpack.c.h.s8.bf16 %v5900_v2  ;;  %v476_v38 = vunpack.c.h.s8.bf16 %v5914_v12  ;;  %v484_v5 = vunpack.c.h.s8.bf16 %v5923_v19 }
  0xbf   :  { %2768 = vmatprep.subr.bf16.mxu0 %v5299_v31  ;;  %v6211_v0 = vcombine.high %v452_v39, %v456_v56  ;;  %v6213_v11 = vcombine.low %v452_v39, %v456_v56  ;;  %v5061_v31 = vcombine.high %v348_v37, %v352_v24  ;;  %v615_v15 = vunpack.c.l.s8.bf16 %v6209_v28 }
  0xc0   :  { %v6221_v61 = vcombine.high %v7379_v63, %v7378_v53  ;;  %v6223_v40 = vcombine.high %v460_v45, %v464_v46  ;;  %v6225_v43 = vcombine.low %v460_v45, %v464_v46  ;;  %v6230_v39 = vpack.c.bf16 %v132_v52, %v125_v18 }
  0xc1   :  { %2726 = vmatpush1.bf16.msra.mxu1 %v5170_v22  ;;  %v480_v22 = vunpack.c.h.s8.bf16 %v5916_v13  ;;  %v488_v2 = vunpack.c.h.s8.bf16 %v5925_v20  ;;  %v5060_v13 = vcombine.low %v348_v37, %v352_v24  ;;  %v5314_v19 = vcombine.low %v603_v42, %v607_v55  ;;  %v6254_v37 = vld [vmem:[#allocation6 + $0x480] sm:$0xff]  ;;  %v6256_v24 = vld [vmem:[#allocation6 + $0x490] sm:$0xff] }
  0xc2   :  { %2769 = vmatpush1.bf16.msra.mxu0 %v5298_v32  ;;  %2867 = vmatprep.subr.bf16.mxu1 %v5053_v26  ;;  %7380 = vst [vmem:[#allocation49_spill] sm:$0xff] %v6230_v39  ;;  %v6235_v26 = vld [vmem:[#allocation6 + $0x460] sm:$0xff]  ;;  %v6237_v32 = vld [vmem:[#allocation6 + $0x470] sm:$0xff]  ;;  %v492_v45 = vunpack.c.h.s8.bf16 %v5944_v35  ;;  %v5323_v46 = vcombine.high %v611_v9, %v615_v15  ;;  %v500_v42 = vunpack.c.h.s8.bf16 %v5956_v47  ;;  %v504_v35 = vunpack.c.h.s8.bf16 %v5958_v48 }
  0xc3   :  { %2781 = vmatprep.subr.bf16.mxu0 %v5307_v7  ;;  %v6239_v56 = vcombine.high %v476_v38, %v480_v22  ;;  %v6241_v12 = vcombine.low %v476_v38, %v480_v22  ;;  %v6245_v7 = vcombine.high %v484_v5, %v488_v2  ;;  %v6247_v20 = vcombine.low %v484_v5, %v488_v2  ;;  %v6272_v38 = vld [vmem:[#allocation6 + $0x4a0] sm:$0xff]  ;;  %v6276_v5 = vld [vmem:[#allocation6 + $0x4b0] sm:$0xff] }
  0xc4   :  { %2728 = vmatmul.mubr.bf16.vlgmr.msra.gmra.mrb[0].mxu1 %v6204_v6  ;;  %v619_v18 = vunpack.c.l.s8.bf16 %v6235_v26  ;;  %v623_v52 = vunpack.c.l.s8.bf16 %v6237_v32  ;;  %v512_v53 = vunpack.c.h.s8.bf16 %v5970_v60  ;;  %v627_v47 = vunpack.c.l.s8.bf16 %v6254_v37  ;;  %v7385_v60 = vld [vmem:[#allocation19_spill] sm:$0xff] }
  0xc5   :  { %2771 = vmatmul.mubr.bf16.vlgmr.msra.gmra.mrb[0].mxu0 %v6206_v50  ;;  %2868 = vmatpush1.bf16.msra.mxu1 %v6056_v8  ;;  %v496_v8 = vunpack.c.h.s8.bf16 %v5946_v36  ;;  %v5322_v36 = vcombine.low %v611_v9, %v615_v15  ;;  %v631_v48 = vunpack.c.l.s8.bf16 %v6256_v24  ;;  %v6274_v22 = vcombine.low %v500_v42, %v504_v35  ;;  %v7384_v9 = vld [vmem:[#allocation18_spill] sm:$0xff] }
  0xc6   :  { %2782 = vmatpush1.bf16.msra.mxu0 %v5306_v1  ;;  %2869 = vmatprep.subr.bf16.mxu1 %v5061_v31  ;;  %v6267_v31 = vcombine.high %v500_v42, %v504_v35  ;;  %v5331_v63 = vcombine.high %v619_v18, %v623_v52  ;;  %v516_v15 = vunpack.c.h.s8.bf16 %v7384_v9  ;;  %v520_v2 = vunpack.c.h.s8.bf16 %v7385_v60  ;;  %v7388_v42 = vld [vmem:[#allocation21_spill] sm:$0xff] }
  0xc7   :  { %2783 = vmatprep.subr.bf16.mxu0 %v5315_v49  ;;  %2813 = vmatprep.mubr.bf16.mxu0 %v6230_v39  ;;  %v6261_v55 = vcombine.high %v492_v45, %v496_v8  ;;  %v6263_v1 = vcombine.low %v492_v45, %v496_v8  ;;  %v508_v49 = vunpack.c.h.s8.bf16 %v5968_v59  ;;  %7381 = vst [vmem:[#allocation50_spill] sm:$0xff] %v6274_v22  ;;  %v7387_v45 = vld [vmem:[#allocation33_spill] sm:$0xff]  ;;  %v635_v8 = vunpack.c.l.s8.bf16 %v6272_v38 }
  0xc8   :  { %2899 = vmatprep.mubr.bf16.mxu1 %v6032_v51  ;;  %v528_v35 = vunpack.c.h.s8.bf16 %v7388_v42  ;;  %v5339_v39 = vcombine.high %v627_v47, %v631_v48  ;;  %v6292_v9 = vcombine.high %v516_v15, %v520_v2  ;;  %v6296_v60 = vld [vmem:[#allocation6 + $0x4d0] sm:$0xff]  ;;  %v7395_v42 = vld [vmem:[#allocation24_spill] sm:$0xff] }
  0xc9   :  { %2870 = vmatpush1.bf16.msra.mxu1 %v5060_v13  ;;  %v6278_v59 = vcombine.high %v508_v49, %v512_v53  ;;  %v7386_v13 = vld [vmem:[#allocation20_spill] sm:$0xff]  ;;  %v540_v50 = vunpack.c.h.s8.bf16 %v7395_v42  ;;  %v7406_v22 = vld [vmem:[#allocation37_spill] sm:$0xff] }
  0xca   :  { %2784 = vmatpush1.bf16.msra.mxu0 %v5314_v19  ;;  %2871 = vmatprep.subr.bf16.mxu1 %v6073_v41  ;;  %v6280_v41 = vcombine.low %v508_v49, %v512_v53  ;;  %v524_v19 = vunpack.c.h.s8.bf16 %v7386_v13  ;;  %v639_v49 = vunpack.c.l.s8.bf16 %v6276_v5  ;;  %v6290_v53 = vld [vmem:[#allocation6 + $0x4c0] sm:$0xff]  ;;  %7389 = vst [vmem:[#allocation18_spill] sm:$0xff] %v6292_v9  ;;  %v5338_v9 = vcombine.low %v627_v47, %v631_v48  ;;  %v7402_v47 = vld [vmem:[#allocation26_spill] sm:$0xff] }
  0xcb   :  { %2785 = vmatprep.subr.bf16.mxu0 %v5323_v46  ;;  %7382 = vst [vmem:[#allocation51_spill] sm:$0xff] %v6278_v59  ;;  %v5330_v46 = vcombine.low %v619_v18, %v623_v52  ;;  %v7393_v18 = vld [vmem:[#allocation22_spill] sm:$0xff]  ;;  %v548_v48 = vunpack.c.h.s8.bf16 %v7402_v47  ;;  %v7403_v42 = vld [vmem:[#allocation36_spill] sm:$0xff] }
  0xcc   :  { %7383 = vst [vmem:[#allocation52_spill] sm:$0xff] %v6280_v41  ;;  %v6300_v13 = vcombine.low %v524_v19, %v528_v35  ;;  %v532_v52 = vunpack.c.h.s8.bf16 %v7393_v18  ;;  %v7396_v41 = vld [vmem:[#allocation35_spill] sm:$0xff] }
  0xcd   :  { %2872 = vmatpush1.bf16.msra.mxu1 %v6075_v4  ;;  %v6294_v4 = vcombine.low %v516_v15, %v520_v2  ;;  %v643_v15 = vunpack.c.l.s8.bf16 %v6290_v53  ;;  %v7397_v2 = vld [vmem:[#allocation25_spill] sm:$0xff] }
  0xce   :  { %2786 = vmatpush1.bf16.msra.mxu0 %v5322_v36  ;;  %2873 = vmatprep.subr.bf16.mxu1 %v7387_v45  ;;  %v6298_v36 = vcombine.high %v524_v19, %v528_v35  ;;  %7392 = vst [vmem:[#allocation33_spill] sm:$0xff] %v6300_v13  ;;  %v647_v19 = vunpack.c.l.s8.bf16 %v6296_v60  ;;  %v6310_v35 = vld [vmem:[#allocation6 + $0x4e0] sm:$0xff]  ;;  %v7405_v13 = vld [vmem:[#allocation29_spill] sm:$0xff] }
  0xcf   :  { %2787 = vmatprep.subr.bf16.mxu0 %v5331_v63  ;;  %7390 = vst [vmem:[#allocation19_spill] sm:$0xff] %v6294_v4  ;;  %v7394_v63 = vld [vmem:[#allocation23_spill] sm:$0xff]  ;;  %v544_v4 = vunpack.c.h.s8.bf16 %v7397_v2  ;;  %v556_v59 = vunpack.c.h.s8.bf16 %v7405_v13 }
  0xd0   :  { %7391 = vst [vmem:[#allocation20_spill] sm:$0xff] %v6298_v36  ;;  %v536_v45 = vunpack.c.h.s8.bf16 %v7394_v63  ;;  %v5347_v36 = vcombine.high %v635_v8, %v639_v49  ;;  %v6316_v63 = vld [vmem:[#allocation6 + $0x4f0] sm:$0xff] }
  0xd1   :  { %2874 = vmatpush1.bf16.msra.mxu1 %v6085_v21 }
  0xd2   :  { %2788 = vmatpush1.bf16.msra.mxu0 %v5330_v46  ;;  %2875 = vmatprep.subr.bf16.mxu1 %v7396_v41  ;;  %v6312_v18 = vcombine.high %v532_v52, %v536_v45  ;;  %v6314_v21 = vcombine.low %v532_v52, %v536_v45  ;;  %v6318_v46 = vcombine.high %v540_v50, %v544_v4  ;;  %v651_v52 = vunpack.c.l.s8.bf16 %v6310_v35  ;;  %v7407_v45 = vld [vmem:[#allocation30_spill] sm:$0xff] }
  0xd3   :  { %2789 = vmatprep.subr.bf16.mxu0 %v5339_v39  ;;  %v6320_v41 = vcombine.low %v540_v50, %v544_v4  ;;  %v7404_v39 = vld [vmem:[#allocation27_spill] sm:$0xff]  ;;  %v655_v50 = vunpack.c.l.s8.bf16 %v6316_v63 }
  0xd4   :  { %7398 = vst [vmem:[#allocation21_spill] sm:$0xff] %v6312_v18  ;;  %7399 = vst [vmem:[#allocation22_spill] sm:$0xff] %v6314_v21  ;;  %v552_v2 = vunpack.c.h.s8.bf16 %v7404_v39  ;;  %v5346_v18 = vcombine.low %v635_v8, %v639_v49  ;;  %v560_v21 = vunpack.c.h.s8.bf16 %v7407_v45  ;;  %v6330_v4 = vld [vmem:[#allocation6 + $0x500] sm:$0xff]  ;;  %v6336_v39 = vld [vmem:[#allocation6 + $0x510] sm:$0xff]  ;;  %v572_v45 = vunpack.c.h.s8.bf16 %v6093_v33 }
  0xd5   :  { %7400 = vst [vmem:[#allocation23_spill] sm:$0xff] %v6318_v46  ;;  %7401 = vst [vmem:[#allocation24_spill] sm:$0xff] %v6320_v41  ;;  %2876 = vmatpush1.bf16.msra.mxu1 %v7403_v42  ;;  %v5355_v46 = vcombine.high %v643_v15, %v647_v19  ;;  %v7411_v8 = vld [vmem:[#allocation31_spill] sm:$0xff]  ;;  %v7413_v41 = vld [vmem:[#allocation38_spill] sm:$0xff] }
  0xd6   :  { %2790 = vmatpush1.bf16.msra.mxu0 %v5338_v9  ;;  %2877 = vmatprep.subr.bf16.mxu1 %v7406_v22  ;;  %v6332_v47 = vcombine.high %v548_v48, %v552_v2  ;;  %v6334_v42 = vcombine.low %v548_v48, %v552_v2  ;;  %v6338_v9 = vcombine.high %v556_v59, %v560_v21  ;;  %v564_v49 = vunpack.c.h.s8.bf16 %v7411_v8  ;;  %v7414_v2 = vld [vmem:[#allocation34_spill] sm:$0xff] }
  0xd7   :  { %2791 = vmatprep.subr.bf16.mxu0 %v5347_v36  ;;  %v6340_v22 = vcombine.low %v556_v59, %v560_v21  ;;  %v7412_v36 = vld [vmem:[#allocation32_spill] sm:$0xff]  ;;  %v659_v48 = vunpack.c.l.s8.bf16 %v6330_v4  ;;  %v663_v59 = vunpack.c.l.s8.bf16 %v6336_v39 }
  0xd8   :  { %7408 = vst [vmem:[#allocation35_spill] sm:$0xff] %v6332_v47  ;;  %7409 = vst [vmem:[#allocation25_spill] sm:$0xff] %v6334_v42  ;;  %v568_v13 = vunpack.c.h.s8.bf16 %v7412_v36  ;;  %v5354_v47 = vcombine.low %v643_v15, %v647_v19  ;;  %v576_v42 = vunpack.c.h.s8.bf16 %v7414_v2  ;;  %v6350_v21 = vld [vmem:[#allocation6 + $0x520] sm:$0xff]  ;;  %v6356_v36 = vld [vmem:[#allocation6 + $0x530] sm:$0xff]  ;;  %v580_v15 = vunpack.c.h.s8.bf16 %v6117_v29 }
  0xd9   :  { %7410 = vst [vmem:[#allocation26_spill] sm:$0xff] %v6338_v9  ;;  %2878 = vmatpush1.bf16.msra.mxu1 %v6111_v3  ;;  %v5363_v9 = vcombine.high %v651_v52, %v655_v50  ;;  %v7417_v19 = vld [vmem:[#allocation39_spill] sm:$0xff]  ;;  %v7418_v2 = vld [vmem:[#allocation40_spill] sm:$0xff] }
  0xda   :  { %2792 = vmatpush1.bf16.msra.mxu0 %v5346_v18  ;;  %2879 = vmatprep.subr.bf16.mxu1 %v7413_v41  ;;  %v6352_v8 = vcombine.high %v564_v49, %v568_v13  ;;  %v6354_v3 = vcombine.low %v564_v49, %v568_v13  ;;  %v6358_v33 = vcombine.high %v572_v45, %v576_v42  ;;  %v588_v41 = vunpack.c.h.s8.bf16 %v6141_v14 }
  0xdb   :  { %2793 = vmatprep.subr.bf16.mxu0 %v5355_v46  ;;  %v6360_v18 = vcombine.low %v572_v45, %v576_v42  ;;  %v584_v46 = vunpack.c.h.s8.bf16 %v6119_v23  ;;  %v667_v49 = vunpack.c.l.s8.bf16 %v6350_v21  ;;  %v592_v13 = vunpack.c.h.s8.bf16 %v6143_v58  ;;  %v6370_v45 = vld [vmem:[#allocation6 + $0x540] sm:$0xff]  ;;  %v6376_v23 = vld [vmem:[#allocation6 + $0x550] sm:$0xff] }
  0xdc   :  { %7415 = vst [vmem:[#allocation36_spill] sm:$0xff] %v6352_v8  ;;  %7416 = vst [vmem:[#allocation27_spill] sm:$0xff] %v6358_v33  ;;  %v5362_v8 = vcombine.low %v651_v52, %v655_v50  ;;  %v5371_v33 = vcombine.high %v659_v48, %v663_v59  ;;  %v671_v42 = vunpack.c.l.s8.bf16 %v6356_v36  ;;  %v596_v52 = vunpack.c.h.s8.bf16 %v6160_v16  ;;  %v7420_v50 = vld [vmem:[#allocation41_spill] sm:$0xff] }
  0xdd   :  { %2880 = vmatpush1.bf16.msra.mxu1 %v7417_v19  ;;  %v6372_v29 = vcombine.high %v580_v15, %v584_v46  ;;  %v6374_v19 = vcombine.low %v580_v15, %v584_v46  ;;  %v6378_v14 = vcombine.high %v588_v41, %v592_v13  ;;  %v600_v58 = vunpack.c.h.s8.bf16 %v6163_v17  ;;  %v6396_v17 = vld [vmem:[#allocation6 + $0x570] sm:$0xff] }
  0xde   :  { %2794 = vmatpush1.bf16.msra.mxu0 %v5354_v47  ;;  %2881 = vmatprep.subr.bf16.mxu1 %v7418_v2  ;;  %v6380_v47 = vcombine.low %v588_v41, %v592_v13  ;;  %v5370_v2 = vcombine.low %v659_v48, %v663_v59  ;;  %v675_v15 = vunpack.c.l.s8.bf16 %v6370_v45  ;;  %v608_v46 = vunpack.c.h.s8.bf16 %v6174_v30  ;;  %v6390_v13 = vld [vmem:[#allocation6 + $0x560] sm:$0xff]  ;;  %v7423_v59 = vld [vmem:[#allocation42_spill] sm:$0xff] }
  0xdf   :  { %2795 = vmatprep.subr.bf16.mxu0 %v5363_v9  ;;  %7419 = vst [vmem:[#allocation29_spill] sm:$0xff] %v6378_v14  ;;  %v604_v9 = vunpack.c.h.s8.bf16 %v6170_v57  ;;  %v5379_v14 = vcombine.high %v667_v49, %v671_v42  ;;  %v679_v41 = vunpack.c.l.s8.bf16 %v6376_v23  ;;  %v6392_v16 = vcombine.high %v596_v52, %v600_v58 }
  0xe0   :  { %v612_v48 = vunpack.c.h.s8.bf16 %v6197_v62  ;;  %v616_v30 = vunpack.c.h.s8.bf16 %v6209_v28  ;;  %v6416_v28 = vld [vmem:[#allocation6 + $0x590] sm:$0xff] }
  0xe1   :  { %2882 = vmatpush1.bf16.msra.mxu1 %v7420_v50  ;;  %7421 = vst [vmem:[#allocation37_spill] sm:$0xff] %v6392_v16  ;;  %v6394_v50 = vcombine.low %v596_v52, %v600_v58  ;;  %v6398_v57 = vcombine.high %v604_v9, %v608_v46  ;;  %v5378_v16 = vcombine.low %v667_v49, %v671_v42  ;;  %v683_v52 = vunpack.c.l.s8.bf16 %v6390_v13  ;;  %v7426_v42 = vld [vmem:[#allocation44_spill] sm:$0xff] }
  0xe2   :  { %2796 = vmatpush1.bf16.msra.mxu0 %v5362_v8  ;;  %2883 = vmatprep.subr.bf16.mxu1 %v6145_v54  ;;  %v6400_v54 = vcombine.low %v604_v9, %v608_v46  ;;  %v620_v8 = vunpack.c.h.s8.bf16 %v6235_v26  ;;  %v624_v58 = vunpack.c.h.s8.bf16 %v6237_v32  ;;  %v687_v9 = vunpack.c.l.s8.bf16 %v6396_v17  ;;  %v6410_v46 = vld [vmem:[#allocation6 + $0x580] sm:$0xff] }
  0xe3   :  { %2797 = vmatprep.subr.bf16.mxu0 %v5371_v33  ;;  %7422 = vst [vmem:[#allocation30_spill] sm:$0xff] %v6398_v57  ;;  %v7424_v33 = vld [vmem:[#allocation43_spill] sm:$0xff]  ;;  %v5387_v57 = vcombine.high %v675_v15, %v679_v41  ;;  %v6412_v62 = vcombine.high %v612_v48, %v616_v30  ;;  %v628_v49 = vunpack.c.h.s8.bf16 %v6254_v37  ;;  %v632_v32 = vunpack.c.h.s8.bf16 %v6256_v24  ;;  %v6436_v24 = vld [vmem:[#allocation6 + $0x5b0] sm:$0xff] }
  0xe4   :  { %v6418_v26 = vcombine.high %v620_v8, %v624_v58 }
  0xe5   :  { %2884 = vmatpush1.bf16.msra.mxu1 %v7423_v59  ;;  %v6414_v59 = vcombine.low %v612_v48, %v616_v30  ;;  %v691_v48 = vunpack.c.l.s8.bf16 %v6410_v46  ;;  %v640_v30 = vunpack.c.h.s8.bf16 %v6276_v5  ;;  %v6432_v37 = vcombine.high %v628_v49, %v632_v32 }
  0xe6   :  { %2798 = vmatpush1.bf16.msra.mxu0 %v5370_v2  ;;  %2885 = vmatprep.subr.bf16.mxu1 %v7424_v33  ;;  %7425 = vst [vmem:[#allocation31_spill] sm:$0xff] %v6418_v26  ;;  %v6420_v2 = vcombine.low %v620_v8, %v624_v58  ;;  %v5386_v33 = vcombine.low %v675_v15, %v679_v41  ;;  %v695_v8 = vunpack.c.l.s8.bf16 %v6416_v28  ;;  %v6430_v58 = vld [vmem:[#allocation6 + $0x5a0] sm:$0xff]  ;;  %v644_v15 = vunpack.c.h.s8.bf16 %v6290_v53  ;;  %v7429_v41 = vld [vmem:[#allocation45_spill] sm:$0xff] }
  0xe7   :  { %2799 = vmatprep.subr.bf16.mxu0 %v5379_v14  ;;  %v636_v14 = vunpack.c.h.s8.bf16 %v6272_v38  ;;  %v5395_v26 = vcombine.high %v683_v52, %v687_v9  ;;  %7427 = vst [vmem:[#allocation32_spill] sm:$0xff] %v6432_v37  ;;  %v648_v5 = vunpack.c.h.s8.bf16 %v6296_v60  ;;  %v5394_v37 = vcombine.low %v683_v52, %v687_v9  ;;  %v6456_v60 = vld [vmem:[#allocation6 + $0x5d0] sm:$0xff] }
  0xe8   :  { %v660_v52 = vunpack.c.h.s8.bf16 %v6330_v4  ;;  %v668_v9 = vunpack.c.h.s8.bf16 %v6350_v21  ;;  %v333_v4 = vld [vmem:[#allocation6 + $0x5f0] sm:$0xff] }
  0xe9   :  { %2886 = vmatpush1.bf16.msra.mxu1 %v7426_v42  ;;  %v6434_v42 = vcombine.low %v628_v49, %v632_v32  ;;  %v6438_v38 = vcombine.high %v636_v14, %v640_v30  ;;  %v699_v49 = vunpack.c.l.s8.bf16 %v6430_v58  ;;  %v656_v32 = vunpack.c.h.s8.bf16 %v6316_v63 }
  0xea   :  { %2800 = vmatpush1.bf16.msra.mxu0 %v5378_v16  ;;  %2887 = vmatprep.subr.bf16.mxu1 %v6165_v34  ;;  %v6440_v34 = vcombine.low %v636_v14, %v640_v30  ;;  %v652_v16 = vunpack.c.h.s8.bf16 %v6310_v35  ;;  %v703_v14 = vunpack.c.l.s8.bf16 %v6436_v24  ;;  %v6450_v30 = vld [vmem:[#allocation6 + $0x5c0] sm:$0xff]  ;;  %v6452_v53 = vcombine.high %v644_v15, %v648_v5 }
  0xeb   :  { %2801 = vmatprep.subr.bf16.mxu0 %v5387_v57  ;;  %7428 = vst [vmem:[#allocation38_spill] sm:$0xff] %v6438_v38  ;;  %v7430_v57 = vld [vmem:[#allocation46_spill] sm:$0xff]  ;;  %v5403_v38 = vcombine.high %v691_v48, %v695_v8  ;;  %v664_v63 = vunpack.c.h.s8.bf16 %v6336_v39 }
  0xec   :  { %v6458_v35 = vcombine.high %v652_v16, %v656_v32 }
  0xed   :  { %2888 = vmatpush1.bf16.msra.mxu1 %v7429_v41  ;;  %v6454_v41 = vcombine.low %v644_v15, %v648_v5  ;;  %v707_v15 = vunpack.c.l.s8.bf16 %v6450_v30  ;;  %v672_v5 = vunpack.c.h.s8.bf16 %v6356_v36  ;;  %v680_v36 = vunpack.c.h.s8.bf16 %v6376_v23 }
  0xee   :  { %2802 = vmatpush1.bf16.msra.mxu0 %v5386_v33  ;;  %2889 = vmatprep.subr.bf16.mxu1 %v7430_v57  ;;  %7431 = vst [vmem:[#allocation34_spill] sm:$0xff] %v6458_v35  ;;  %v6460_v33 = vcombine.low %v652_v16, %v656_v32  ;;  %v5402_v57 = vcombine.low %v691_v48, %v695_v8  ;;  %v711_v16 = vunpack.c.l.s8.bf16 %v6456_v60  ;;  %v331_v32 = vld [vmem:[#allocation6 + $0x5e0] sm:$0xff]  ;;  %v676_v48 = vunpack.c.h.s8.bf16 %v6370_v45 }
  0xef   :  { %2803 = vmatprep.subr.bf16.mxu0 %v5395_v26  ;;  %v7433_v26 = vld [vmem:[#allocation47_spill] sm:$0xff]  ;;  %v5411_v35 = vcombine.high %v699_v49, %v703_v14  ;;  %v6474_v39 = vcombine.high %v668_v9, %v672_v5  ;;  %v6476_v21 = vcombine.low %v668_v9, %v672_v5  ;;  %v684_v8 = vunpack.c.h.s8.bf16 %v6390_v13 }
  0xf0   :  { %7432 = vst [vmem:[#allocation39_spill] sm:$0xff] %v6460_v33  ;;  %v6470_v33 = vcombine.high %v660_v52, %v664_v63  ;;  %v6484_v9 = vcombine.high %v676_v48, %v680_v36  ;;  %v6486_v5 = vcombine.low %v676_v48, %v680_v36  ;;  %v6488_v45 = vld [vmem:[#allocation6 + $0x600] sm:$0xff] }
  0xf1   :  { %2890 = vmatpush1.bf16.msra.mxu1 %v6178_v25  ;;  %v6472_v25 = vcombine.low %v660_v52, %v664_v63  ;;  %v688_v52 = vunpack.c.h.s8.bf16 %v6396_v17  ;;  %v5419_v63 = vcombine.high %v707_v15, %v711_v16  ;;  %v696_v17 = vunpack.c.h.s8.bf16 %v6416_v28  ;;  %v6510_v28 = vld [vmem:[#allocation6 + $0x18] sm:$0xff] }
  0xf2   :  { %2804 = vmatpush1.bf16.msra.mxu0 %v5394_v37  ;;  %2891 = vmatprep.subr.bf16.mxu1 %v7433_v26  ;;  %v5410_v37 = vcombine.low %v699_v49, %v703_v14  ;;  %v719_v26 = vunpack.c.l.s8.bf16 %v333_v4  ;;  %v700_v49 = vunpack.c.h.s8.bf16 %v6430_v58  ;;  %v5418_v14 = vcombine.low %v707_v15, %v711_v16 }
  0xf3   :  { %2805 = vmatprep.subr.bf16.mxu0 %v5403_v38  ;;  %v715_v38 = vunpack.c.l.s8.bf16 %v331_v32  ;;  %v6492_v23 = vcombine.high %v684_v8, %v688_v52  ;;  %v6494_v13 = vcombine.low %v684_v8, %v688_v52  ;;  %v723_v48 = vunpack.c.l.s8.bf16 %v6488_v45  ;;  %v6504_v8 = vld [vmem:[#allocation6 + $0x8] sm:$0xff]  ;;  %v131_v52 = vld [vmem:[#allocation2 + $0x58] sm:$0xff] }
  0xf4   :  { %v708_v15 = vunpack.c.h.s8.bf16 %v6450_v30 }
  0xf5   :  { %2892 = vmatpush1.bf16.msra.mxu1 %v6186_v44  ;;  %v6490_v44 = vld [vmem:[#allocation6 + $0x610] sm:$0xff]  ;;  %v5426_v16 = vcombine.low %v715_v38, %v719_v26 }
  0xf6   :  { %2806 = vmatpush1.bf16.msra.mxu0 %v5402_v57  ;;  %2893 = vmatprep.subr.bf16.mxu1 %v6199_v27  ;;  %7434 = vst [vmem:[#allocation40_spill] sm:$0xff] %v6490_v44  ;;  %v692_v27 = vunpack.c.h.s8.bf16 %v6410_v46  ;;  %v704_v57 = vunpack.c.h.s8.bf16 %v6436_v24  ;;  %v727_v36 = vunpack.c.l.s8.bf16 %v6490_v44  ;;  %v712_v24 = vunpack.c.h.s8.bf16 %v6456_v60 }
  0xf7   :  { %2807 = vmatprep.subr.bf16.mxu0 %v5411_v35  ;;  %v5427_v35 = vcombine.high %v715_v38, %v719_v26  ;;  %v7435_v38 = vld [vmem:[#allocation17_spill] sm:$0xff] }
  0xf8   :  { %v6506_v46 = vcombine.high %v692_v27, %v696_v17  ;;  %v6512_v58 = vcombine.high %v700_v49, %v704_v57  ;;  %v5435_v44 = vcombine.high %v723_v48, %v727_v36  ;;  %v6524_v30 = vcombine.low %v708_v15, %v712_v24  ;;  %v6539_v26 = vld [vmem:[#allocation6 + $0x28] sm:$0xff] }
  0xf9   :  { %2894 = vmatpush1.bf16.msra.mxu1 %v6201_v10  ;;  %v6508_v10 = vcombine.low %v692_v27, %v696_v17  ;;  %v716_v27 = vunpack.c.h.s8.bf16 %v331_v32  ;;  %v720_v17 = vunpack.c.h.s8.bf16 %v333_v4  ;;  %v5434_v32 = vcombine.low %v723_v48, %v727_v36  ;;  %v6548_v36 = vld [vmem:[#allocation6 + $0x48] sm:$0xff] }
  0xfa   :  { %2808 = vmatpush1.bf16.msra.mxu0 %v5410_v37  ;;  %2895 = vmatprep.subr.bf16.mxu1 %v6211_v0  ;;  %v6514_v0 = vcombine.low %v700_v49, %v704_v57  ;;  %v124_v37 = vld [vmem:[#allocation2 + $0x20] sm:$0xff]  ;;  %v345_v49 = vunpack.c.l.s8.bf16 %v6510_v28  ;;  %v6522_v57 = vcombine.high %v708_v15, %v712_v24  ;;  %v349_v48 = vunpack.c.l.s8.bf16 %v6539_v26  ;;  %v6550_v15 = vld [vmem:[#allocation6 + $0x58] sm:$0xff] }
  0xfb   :  { %2809 = vmatprep.subr.bf16.mxu0 %v5419_v63  ;;  %v341_v63 = vunpack.c.l.s8.bf16 %v6504_v8  ;;  %v6531_v60 = vcombine.low %v716_v27, %v720_v17 }
  0xfd   :  { %2896 = vmatpush1.bf16.msra.mxu1 %v6213_v11  ;;  %v6526_v11 = vcombine.high %v716_v27, %v720_v17  ;;  %v5055_v4 = vcombine.high %v341_v63, %v345_v49  ;;  %v6560_v27 = vld [vmem:[#allocation6 + $0x78] sm:$0xff] }
  0xfe   :  { %2810 = vmatpush1.bf16.msra.mxu0 %v5418_v14  ;;  %2897 = vmatprep.subr.bf16.mxu1 %v6223_v40  ;;  %v6529_v40 = vpack.c.bf16 %v131_v52, %v124_v37  ;;  %v6541_v14 = vld [vmem:[#allocation6 + $0x38] sm:$0xff]  ;;  %v361_v37 = vunpack.c.l.s8.bf16 %v6550_v15  ;;  %v6558_v52 = vld [vmem:[#allocation6 + $0x68] sm:$0xff]  ;;  %v369_v17 = vunpack.c.l.s8.bf16 %v6560_v27 }
  0xff   :  { %2811 = vmatprep.subr.bf16.mxu0 %v5427_v35  ;;  %v133_v35 = vld [vmem:[#allocation2 + $0x68] sm:$0xff] }
 0x101   :  { %2898 = vmatpush1.bf16.msra.mxu1 %v6225_v43  ;;  %v7290_v43 = vmov 0  }
 0x102   :  { %2812 = vmatpush1.bf16.msra.mxu0 %v5426_v16  ;;  %2910 = vmatprep.subr.bf16.mxu1 %v6221_v61  ;;  %v7436_v61 = vld [vmem:[#allocation28_spill] sm:$0xff] }
 0x103   :  { %2824 = vmatprep.subr.bf16.mxu0 %v5435_v44  ;;  %v126_v44 = vld [vmem:[#allocation2 + $0x30] sm:$0xff] }
 0x104   :  { %2900 = vmatmul.mubr.bf16.vlgmr.msra.gmra.mrb[4].mxu1 %v6204_v6  ;;  %v6553_v24 = vpack.c.bf16 %v133_v35, %v126_v44 }
 0x105   :  { %2814 = vmatmul.mubr.bf16.vlgmr.msra.gmra.mrb[0].mxu0 %v6529_v40  ;;  %2911 = vmatpush1.bf16.msra.mxu1 %v7435_v38 }
 0x106   :  { %2912 = vmatprep.subr.bf16.mxu1 %v6239_v56  ;;  %2825 = vmatpush1.bf16.msra.mxu0 %v5434_v32  ;;  %v353_v56 = vunpack.c.l.s8.bf16 %v6541_v14  ;;  %v6571_v32 = vld [vmem:[#allocation6 + $0x98] sm:$0xff] }
 0x107   :  { %2856 = vmatprep.mubr.bf16.mxu0 %v7290_v43  ;;  %3039 = vmatprep.subr.bf16.mxu0 %v5055_v4  ;;  %7437 = vst [vmem:[#allocation41_spill] sm:$0xff] %v6571_v32  ;;  %v7438_v4 = vld [vmem:[#allocation50_spill] sm:$0xff]  ;;  %v377_v35 = vunpack.c.l.s8.bf16 %v6571_v32  ;;  %v7446_v43 = vld [vmem:[#allocation19_spill] sm:$0xff]  ;;  %v7447_v32 = vld [vmem:[#allocation20_spill] sm:$0xff] }
 0x108   :  { %2942 = vmatprep.mubr.bf16.mxu1 %v7436_v61  ;;  %v5063_v16 = vcombine.high %v349_v48, %v353_v56 }
 0x109   :  { %2913 = vmatpush1.bf16.msra.mxu1 %v6241_v12  ;;  %v5054_v12 = vcombine.low %v341_v63, %v345_v49  ;;  %v365_v63 = vunpack.c.l.s8.bf16 %v6558_v52  ;;  %v6569_v49 = vld [vmem:[#allocation6 + $0x88] sm:$0xff] }
 0x10a   :  { %2914 = vmatprep.subr.bf16.mxu1 %v6245_v7  ;;  %v357_v7 = vunpack.c.l.s8.bf16 %v6548_v36  ;;  %v373_v44 = vunpack.c.l.s8.bf16 %v6569_v49 }
 0x10c   :  { %v5070_v38 = vcombine.low %v357_v7, %v361_v37 }
 0x10d   :  { %2915 = vmatpush1.bf16.msra.mxu1 %v6247_v20  ;;  %v5062_v20 = vcombine.low %v349_v48, %v353_v56  ;;  %v6577_v48 = vld [vmem:[#allocation6 + $0xa8] sm:$0xff]  ;;  %v6579_v56 = vld [vmem:[#allocation6 + $0xb8] sm:$0xff] }
 0x10e   :  { %2916 = vmatprep.subr.bf16.mxu1 %v6261_v55  ;;  %v5071_v55 = vcombine.high %v357_v7, %v361_v37  ;;  %7440 = vst [vmem:[#allocation42_spill] sm:$0xff] %v6577_v48  ;;  %7441 = vst [vmem:[#allocation43_spill] sm:$0xff] %v6579_v56  ;;  %v381_v7 = vunpack.c.l.s8.bf16 %v6577_v48  ;;  %v385_v37 = vunpack.c.l.s8.bf16 %v6579_v56  ;;  %v7450_v56 = vld [vmem:[#allocation33_spill] sm:$0xff] }
 0x10f   :  { %v7451_v48 = vld [vmem:[#allocation21_spill] sm:$0xff] }
 0x111   :  { %5442 = vmatmul.mubr.msk.bf16.vlgmr.msra.gmra.mrb[0].mxu0 %vm2691_vm0, %v6553_v24  ;;  %2917 = vmatpush1.bf16.msra.mxu1 %v6263_v1  ;;  %v7439_v1 = vld [vmem:[#allocation51_spill] sm:$0xff] }
 0x112   :  { %3040 = vmatpush1.bf16.msra.mxu0 %v5054_v12  ;;  %2918 = vmatprep.subr.bf16.mxu1 %v6267_v31  ;;  %v5079_v31 = vcombine.high %v365_v63, %v369_v17  ;;  %v7442_v12 = vld [vmem:[#allocation52_spill] sm:$0xff] }
 0x113   :  { %3041 = vmatprep.subr.bf16.mxu0 %v5063_v16  ;;  %3071 = vmatprep.mubr.bf16.mxu0 %v6032_v51  ;;  %v7443_v16 = vld [vmem:[#allocation18_spill] sm:$0xff] }
 0x115   :  { %2919 = vmatpush1.bf16.msra.mxu1 %v7438_v4  ;;  %v5078_v4 = vcombine.low %v365_v63, %v369_v17 }
 0x116   :  { %3042 = vmatpush1.bf16.msra.mxu0 %v5062_v20  ;;  %2920 = vmatprep.subr.bf16.mxu1 %v7439_v1  ;;  %v5087_v20 = vcombine.high %v373_v44, %v377_v35  ;;  %v6587_v1 = vld [vmem:[#allocation6 + $0xd8] sm:$0xff] }
 0x117   :  { %3043 = vmatprep.subr.bf16.mxu0 %v5071_v55  ;;  %v6585_v55 = vld [vmem:[#allocation6 + $0xc8] sm:$0xff]  ;;  %7445 = vst [vmem:[#allocation45_spill] sm:$0xff] %v6587_v1  ;;  %v393_v17 = vunpack.c.l.s8.bf16 %v6587_v1  ;;  %v7454_v1 = vld [vmem:[#allocation22_spill] sm:$0xff] }
 0x118   :  { %7444 = vst [vmem:[#allocation44_spill] sm:$0xff] %v6585_v55  ;;  %v389_v63 = vunpack.c.l.s8.bf16 %v6585_v55  ;;  %v7455_v55 = vld [vmem:[#allocation23_spill] sm:$0xff] }
 0x119   :  { %2921 = vmatpush1.bf16.msra.mxu1 %v7442_v12  ;;  %v5086_v12 = vcombine.low %v373_v44, %v377_v35  ;;  %v6601_v35 = vld [vmem:[#allocation6 + $0x108] sm:$0xff] }
 0x11a   :  { %3044 = vmatpush1.bf16.msra.mxu0 %v5070_v38  ;;  %2922 = vmatprep.subr.bf16.mxu1 %v7443_v16  ;;  %v5095_v38 = vcombine.high %v381_v7, %v385_v37  ;;  %v6595_v16 = vld [vmem:[#allocation6 + $0xf8] sm:$0xff]  ;;  %7452 = vst [vmem:[#allocation17_spill] sm:$0xff] %v6601_v35 }
 0x11b   :  { %3045 = vmatprep.subr.bf16.mxu0 %v5079_v31  ;;  %v6593_v31 = vld [vmem:[#allocation6 + $0xe8] sm:$0xff]  ;;  %7449 = vst [vmem:[#allocation47_spill] sm:$0xff] %v6595_v16  ;;  %v401_v44 = vunpack.c.l.s8.bf16 %v6595_v16 }
 0x11c   :  { %7448 = vst [vmem:[#allocation46_spill] sm:$0xff] %v6593_v31  ;;  %v7457_v16 = vld [vmem:[#allocation24_spill] sm:$0xff] }
 0x11d   :  { %2923 = vmatpush1.bf16.msra.mxu1 %v7446_v43  ;;  %v5094_v43 = vcombine.low %v381_v7, %v385_v37  ;;  %v6609_v37 = vld [vmem:[#allocation6 + $0x128] sm:$0xff] }
 0x11e   :  { %3046 = vmatpush1.bf16.msra.mxu0 %v5078_v4  ;;  %2924 = vmatprep.subr.bf16.mxu1 %v7447_v32  ;;  %v5103_v4 = vcombine.high %v389_v63, %v393_v17  ;;  %v397_v32 = vunpack.c.l.s8.bf16 %v6593_v31  ;;  %v7458_v31 = vld [vmem:[#allocation35_spill] sm:$0xff] }
 0x11f   :  { %3047 = vmatprep.subr.bf16.mxu0 %v5087_v20  ;;  %v6603_v20 = vld [vmem:[#allocation6 + $0x118] sm:$0xff] }
 0x120   :  { %7453 = vst [vmem:[#allocation28_spill] sm:$0xff] %v6603_v20  ;;  %v409_v7 = vunpack.c.l.s8.bf16 %v6603_v20  ;;  %v7460_v20 = vld [vmem:[#allocation25_spill] sm:$0xff] }
 0x121   :  { %2925 = vmatpush1.bf16.msra.mxu1 %v7450_v56  ;;  %v5102_v56 = vcombine.low %v389_v63, %v393_v17  ;;  %v6617_v17 = vld [vmem:[#allocation6 + $0x148] sm:$0xff] }
 0x122   :  { %3048 = vmatpush1.bf16.msra.mxu0 %v5086_v12  ;;  %2926 = vmatprep.subr.bf16.mxu1 %v7451_v48  ;;  %v5111_v12 = vcombine.high %v397_v32, %v401_v44  ;;  %v405_v48 = vunpack.c.l.s8.bf16 %v6601_v35  ;;  %v7461_v35 = vld [vmem:[#allocation26_spill] sm:$0xff] }
 0x123   :  { %3049 = vmatprep.subr.bf16.mxu0 %v5095_v38  ;;  %v6611_v38 = vld [vmem:[#allocation6 + $0x138] sm:$0xff] }
 0x124   :  { %7456 = vst [vmem:[#allocation50_spill] sm:$0xff] %v6611_v38  ;;  %v417_v63 = vunpack.c.l.s8.bf16 %v6611_v38  ;;  %v7462_v38 = vld [vmem:[#allocation36_spill] sm:$0xff] }
 0x125   :  { %2927 = vmatpush1.bf16.msra.mxu1 %v7454_v1  ;;  %v5110_v1 = vcombine.low %v397_v32, %v401_v44  ;;  %v6625_v44 = vld [vmem:[#allocation6 + $0x168] sm:$0xff] }
 0x126   :  { %3050 = vmatpush1.bf16.msra.mxu0 %v5094_v43  ;;  %2928 = vmatprep.subr.bf16.mxu1 %v7455_v55  ;;  %v5119_v43 = vcombine.high %v405_v48, %v409_v7  ;;  %v413_v55 = vunpack.c.l.s8.bf16 %v6609_v37 }
 0x127   :  { %3051 = vmatprep.subr.bf16.mxu0 %v5103_v4  ;;  %v6619_v4 = vld [vmem:[#allocation6 + $0x158] sm:$0xff] }
 0x128   :  { %7459 = vst [vmem:[#allocation51_spill] sm:$0xff] %v6619_v4  ;;  %v425_v32 = vunpack.c.l.s8.bf16 %v6619_v4  ;;  %v7464_v4 = vld [vmem:[#allocation27_spill] sm:$0xff] }
 0x129   :  { %2929 = vmatpush1.bf16.msra.mxu1 %v7457_v16  ;;  %v5118_v16 = vcombine.low %v405_v48, %v409_v7  ;;  %v6633_v7 = vld [vmem:[#allocation6 + $0x188] sm:$0xff] }
 0x12a   :  { %3052 = vmatpush1.bf16.msra.mxu0 %v5102_v56  ;;  %2930 = vmatprep.subr.bf16.mxu1 %v7458_v31  ;;  %v5127_v56 = vcombine.high %v413_v55, %v417_v63  ;;  %v421_v31 = vunpack.c.l.s8.bf16 %v6617_v17 }
 0x12b   :  { %3053 = vmatprep.subr.bf16.mxu0 %v5111_v12  ;;  %v6627_v12 = vld [vmem:[#allocation6 + $0x178] sm:$0xff] }
 0x12c   :  { %v433_v48 = vunpack.c.l.s8.bf16 %v6627_v12 }
 0x12d   :  { %2931 = vmatpush1.bf16.msra.mxu1 %v7460_v20  ;;  %v5126_v20 = vcombine.low %v413_v55, %v417_v63  ;;  %v6641_v63 = vld [vmem:[#allocation6 + $0x1a8] sm:$0xff] }
 0x12e   :  { %3054 = vmatpush1.bf16.msra.mxu0 %v5110_v1  ;;  %2932 = vmatprep.subr.bf16.mxu1 %v7461_v35  ;;  %v5135_v1 = vcombine.high %v421_v31, %v425_v32  ;;  %v429_v35 = vunpack.c.l.s8.bf16 %v6625_v44 }
 0x12f   :  { %3055 = vmatprep.subr.bf16.mxu0 %v5119_v43  ;;  %v6635_v43 = vld [vmem:[#allocation6 + $0x198] sm:$0xff] }
 0x130   :  { %7463 = vst [vmem:[#allocation52_spill] sm:$0xff] %v6635_v43  ;;  %v441_v55 = vunpack.c.l.s8.bf16 %v6635_v43  ;;  %v7468_v43 = vld [vmem:[#allocation29_spill] sm:$0xff] }
 0x131   :  { %2933 = vmatpush1.bf16.msra.mxu1 %v6340_v22  ;;  %v5134_v22 = vcombine.low %v421_v31, %v425_v32  ;;  %v6649_v32 = vld [vmem:[#allocation6 + $0x1c8] sm:$0xff] }
 0x132   :  { %3056 = vmatpush1.bf16.msra.mxu0 %v5118_v16  ;;  %2934 = vmatprep.subr.bf16.mxu1 %v7462_v38  ;;  %v5143_v16 = vcombine.high %v429_v35, %v433_v48  ;;  %v437_v38 = vunpack.c.l.s8.bf16 %v6633_v7  ;;  %7466 = vst [vmem:[#allocation19_spill] sm:$0xff] %v6649_v32 }
 0x133   :  { %3057 = vmatprep.subr.bf16.mxu0 %v5127_v56  ;;  %v6643_v56 = vld [vmem:[#allocation6 + $0x1b8] sm:$0xff] }
 0x134   :  { %7465 = vst [vmem:[#allocation18_spill] sm:$0xff] %v6643_v56  ;;  %v449_v31 = vunpack.c.l.s8.bf16 %v6643_v56  ;;  %v7470_v56 = vld [vmem:[#allocation37_spill] sm:$0xff] }
 0x135   :  { %2935 = vmatpush1.bf16.msra.mxu1 %v6354_v3  ;;  %v5142_v3 = vcombine.low %v429_v35, %v433_v48  ;;  %v6657_v48 = vld [vmem:[#allocation6 + $0x1e8] sm:$0xff] }
 0x136   :  { %3058 = vmatpush1.bf16.msra.mxu0 %v5126_v20  ;;  %2936 = vmatprep.subr.bf16.mxu1 %v7464_v4  ;;  %v5151_v20 = vcombine.high %v437_v38, %v441_v55  ;;  %v445_v4 = vunpack.c.l.s8.bf16 %v6641_v63 }
 0x137   :  { %3059 = vmatprep.subr.bf16.mxu0 %v5135_v1  ;;  %v6651_v1 = vld [vmem:[#allocation6 + $0x1d8] sm:$0xff] }
 0x138   :  { %7467 = vst [vmem:[#allocation20_spill] sm:$0xff] %v6651_v1  ;;  %v457_v35 = vunpack.c.l.s8.bf16 %v6651_v1  ;;  %v6668_v1 = vld [vmem:[#allocation6 + $0x218] sm:$0xff] }
 0x139   :  { %2937 = vmatpush1.bf16.msra.mxu1 %v6360_v18  ;;  %v5150_v18 = vcombine.low %v437_v38, %v441_v55  ;;  %v7471_v55 = vld [vmem:[#allocation48_spill] sm:$0xff]  ;;  %7472 = vst [vmem:[#allocation21_spill] sm:$0xff] %v6668_v1 }
 0x13a   :  { %3060 = vmatpush1.bf16.msra.mxu0 %v5134_v22  ;;  %2938 = vmatprep.subr.bf16.mxu1 %v6372_v29  ;;  %v5159_v22 = vcombine.high %v445_v4, %v449_v31  ;;  %v453_v29 = vunpack.c.l.s8.bf16 %v6649_v32  ;;  %v7473_v32 = vld [vmem:[#allocation49_spill] sm:$0xff] }
 0x13b   :  { %3061 = vmatprep.subr.bf16.mxu0 %v5143_v16  ;;  %v6659_v16 = vld [vmem:[#allocation6 + $0x1f8] sm:$0xff] }
 0x13c   :  { %7469 = vst [vmem:[#allocation33_spill] sm:$0xff] %v6659_v16  ;;  %v465_v38 = vunpack.c.l.s8.bf16 %v6659_v16  ;;  %v6677_v16 = vld [vmem:[#allocation6 + $0x238] sm:$0xff] }
 0x13d   :  { %2939 = vmatpush1.bf16.msra.mxu1 %v6374_v19  ;;  %v5158_v19 = vcombine.low %v445_v4, %v449_v31 }
 0x13e   :  { %3062 = vmatpush1.bf16.msra.mxu0 %v5142_v3  ;;  %2940 = vmatprep.subr.bf16.mxu1 %v7468_v43  ;;  %v5167_v3 = vcombine.high %v453_v29, %v457_v35  ;;  %v461_v43 = vunpack.c.l.s8.bf16 %v6657_v48 }
 0x13f   :  { %3063 = vmatprep.subr.bf16.mxu0 %v5151_v20  ;;  %v6666_v20 = vld [vmem:[#allocation6 + $0x208] sm:$0xff] }
 0x140   :  { %v5175_v4 = vcombine.high %v461_v43, %v465_v38  ;;  %v469_v31 = vunpack.c.l.s8.bf16 %v6666_v20 }
 0x141   :  { %2941 = vmatpush1.bf16.msra.mxu1 %v6380_v47  ;;  %v7474_v47 = vld [vmem:[#allocation30_spill] sm:$0xff] }
 0x142   :  { %3064 = vmatpush1.bf16.msra.mxu0 %v5150_v18  ;;  %2953 = vmatprep.subr.bf16.mxu1 %v7470_v56  ;;  %v5166_v56 = vcombine.low %v453_v29, %v457_v35  ;;  %v473_v18 = vunpack.c.l.s8.bf16 %v6668_v1  ;;  %v481_v35 = vunpack.c.l.s8.bf16 %v6677_v16  ;;  %v7476_v1 = vld [vmem:[#allocation31_spill] sm:$0xff] }
 0x143   :  { %3065 = vmatprep.subr.bf16.mxu0 %v5159_v22  ;;  %v6675_v22 = vld [vmem:[#allocation6 + $0x228] sm:$0xff] }
 0x144   :  { %2943 = vmatmul.mubr.bf16.vlgmr.msra.gmra.mrb[4].mxu1 %v7471_v55  ;;  %v477_v29 = vunpack.c.l.s8.bf16 %v6675_v22 }
 0x145   :  { %2954 = vmatpush1.bf16.msra.mxu1 %v6394_v50  ;;  %2985 = vmatprep.mubr.bf16.mxu1 %v7473_v32  ;;  %v5174_v50 = vcombine.low %v461_v43, %v465_v38  ;;  %v6691_v38 = vld [vmem:[#allocation6 + $0x268] sm:$0xff] }
 0x146   :  { %3066 = vmatpush1.bf16.msra.mxu0 %v5158_v19  ;;  %2955 = vmatprep.subr.bf16.mxu1 %v7474_v47  ;;  %v5183_v19 = vcombine.high %v469_v31, %v473_v18  ;;  %v6685_v47 = vld [vmem:[#allocation6 + $0x258] sm:$0xff] }
 0x147   :  { %3067 = vmatprep.subr.bf16.mxu0 %v5167_v3  ;;  %v6683_v3 = vld [vmem:[#allocation6 + $0x248] sm:$0xff]  ;;  %7475 = vst [vmem:[#allocation22_spill] sm:$0xff] %v6685_v47  ;;  %v489_v43 = vunpack.c.l.s8.bf16 %v6685_v47  ;;  %v6703_v47 = vld [vmem:[#allocation6 + $0x298] sm:$0xff] }
 0x148   :  { %7479 = vst [vmem:[#allocation24_spill] sm:$0xff] %v6703_v47 }
 0x149   :  { %2956 = vmatpush1.bf16.msra.mxu1 %v6400_v54  ;;  %v5182_v54 = vcombine.low %v469_v31, %v473_v18  ;;  %v493_v31 = vunpack.c.l.s8.bf16 %v6691_v38 }
 0x14a   :  { %3068 = vmatpush1.bf16.msra.mxu0 %v5166_v56  ;;  %2957 = vmatprep.subr.bf16.mxu1 %v6412_v62  ;;  %v5191_v56 = vcombine.high %v477_v29, %v481_v35  ;;  %v485_v62 = vunpack.c.l.s8.bf16 %v6683_v3 }
 0x14b   :  { %3069 = vmatprep.subr.bf16.mxu0 %v5175_v4  ;;  %v6693_v4 = vld [vmem:[#allocation6 + $0x278] sm:$0xff] }
 0x14c   :  { %7477 = vst [vmem:[#allocation23_spill] sm:$0xff] %v6693_v4  ;;  %v497_v18 = vunpack.c.l.s8.bf16 %v6693_v4  ;;  %v6711_v4 = vld [vmem:[#allocation6 + $0x2b8] sm:$0xff] }
 0x14d   :  { %2958 = vmatpush1.bf16.msra.mxu1 %v6414_v59  ;;  %v7478_v59 = vld [vmem:[#allocation32_spill] sm:$0xff]  ;;  %7481 = vst [vmem:[#allocation35_spill] sm:$0xff] %v6711_v4 }
 0x14e   :  { %3070 = vmatpush1.bf16.msra.mxu0 %v5174_v50  ;;  %2959 = vmatprep.subr.bf16.mxu1 %v7476_v1  ;;  %v5190_v50 = vcombine.low %v477_v29, %v481_v35  ;;  %v5199_v1 = vcombine.high %v485_v62, %v489_v43  ;;  %v5207_v29 = vcombine.high %v493_v31, %v497_v18 }
 0x14f   :  { %3082 = vmatprep.subr.bf16.mxu0 %v5183_v19  ;;  %v6701_v19 = vld [vmem:[#allocation6 + $0x288] sm:$0xff] }
 0x150   :  { %v501_v35 = vunpack.c.l.s8.bf16 %v6701_v19 }
 0x151   :  { %3072 = vmatmul.mubr.bf16.vlgmr.msra.gmra.mrb[4].mxu0 %v6204_v6  ;;  %2960 = vmatpush1.bf16.msra.mxu1 %v6420_v2  ;;  %v7480_v2 = vld [vmem:[#allocation38_spill] sm:$0xff] }
 0x152   :  { %3083 = vmatpush1.bf16.msra.mxu0 %v5182_v54  ;;  %2961 = vmatprep.subr.bf16.mxu1 %v7478_v59  ;;  %v5198_v54 = vcombine.low %v485_v62, %v489_v43  ;;  %v6709_v59 = vld [vmem:[#allocation6 + $0x2a8] sm:$0xff]  ;;  %v513_v43 = vunpack.c.l.s8.bf16 %v6711_v4  ;;  %v7483_v4 = vld [vmem:[#allocation39_spill] sm:$0xff] }
 0x153   :  { %3084 = vmatprep.subr.bf16.mxu0 %v5191_v56  ;;  %3114 = vmatprep.mubr.bf16.mxu0 %v7436_v61  ;;  %v505_v56 = vunpack.c.l.s8.bf16 %v6703_v47  ;;  %v509_v62 = vunpack.c.l.s8.bf16 %v6709_v59  ;;  %v7482_v47 = vld [vmem:[#allocation34_spill] sm:$0xff] }
 0x155   :  { %2962 = vmatpush1.bf16.msra.mxu1 %v6434_v42  ;;  %v5206_v42 = vcombine.low %v493_v31, %v497_v18  ;;  %v6725_v18 = vld [vmem:[#allocation6 + $0x2e8] sm:$0xff] }
 0x156   :  { %3085 = vmatpush1.bf16.msra.mxu0 %v5190_v50  ;;  %2963 = vmatprep.subr.bf16.mxu1 %v7480_v2  ;;  %v5215_v50 = vcombine.high %v501_v35, %v505_v56  ;;  %v6719_v2 = vld [vmem:[#allocation6 + $0x2d8] sm:$0xff] }
 0x157   :  { %3086 = vmatprep.subr.bf16.mxu0 %v5199_v1  ;;  %v6717_v1 = vld [vmem:[#allocation6 + $0x2c8] sm:$0xff]  ;;  %v521_v31 = vunpack.c.l.s8.bf16 %v6719_v2 }
 0x159   :  { %2964 = vmatpush1.bf16.msra.mxu1 %v6440_v34  ;;  %v5214_v34 = vcombine.low %v501_v35, %v505_v56  ;;  %v6733_v56 = vld [vmem:[#allocation6 + $0x308] sm:$0xff] }
 0x15a   :  { %3087 = vmatpush1.bf16.msra.mxu0 %v5198_v54  ;;  %2965 = vmatprep.subr.bf16.mxu1 %v6452_v53  ;;  %v5223_v54 = vcombine.high %v509_v62, %v513_v43  ;;  %v517_v53 = vunpack.c.l.s8.bf16 %v6717_v1 }
 0x15b   :  { %3088 = vmatprep.subr.bf16.mxu0 %v5207_v29  ;;  %v6727_v29 = vld [vmem:[#allocation6 + $0x2f8] sm:$0xff] }
 0x15c   :  { %v529_v35 = vunpack.c.l.s8.bf16 %v6727_v29 }
 0x15d   :  { %2966 = vmatpush1.bf16.msra.mxu1 %v6454_v41  ;;  %v5222_v41 = vcombine.low %v509_v62, %v513_v43  ;;  %v6741_v43 = vld [vmem:[#allocation6 + $0x328] sm:$0xff] }
 0x15e   :  { %3089 = vmatpush1.bf16.msra.mxu0 %v5206_v42  ;;  %2967 = vmatprep.subr.bf16.mxu1 %v7482_v47  ;;  %v5231_v42 = vcombine.high %v517_v53, %v521_v31  ;;  %v525_v47 = vunpack.c.l.s8.bf16 %v6725_v18 }
 0x15f   :  { %3090 = vmatprep.subr.bf16.mxu0 %v5215_v50  ;;  %v6735_v50 = vld [vmem:[#allocation6 + $0x318] sm:$0xff] }
 0x160   :  { %v537_v62 = vunpack.c.l.s8.bf16 %v6735_v50 }
 0x161   :  { %2968 = vmatpush1.bf16.msra.mxu1 %v7483_v4  ;;  %v5230_v4 = vcombine.low %v517_v53, %v521_v31  ;;  %v6749_v31 = vld [vmem:[#allocation6 + $0x348] sm:$0xff] }
 0x162   :  { %3091 = vmatpush1.bf16.msra.mxu0 %v5214_v34  ;;  %2969 = vmatprep.subr.bf16.mxu1 %v6470_v33  ;;  %v5239_v34 = vcombine.high %v525_v47, %v529_v35  ;;  %v533_v33 = vunpack.c.l.s8.bf16 %v6733_v56 }
 0x163   :  { %3092 = vmatprep.subr.bf16.mxu0 %v5223_v54  ;;  %v6743_v54 = vld [vmem:[#allocation6 + $0x338] sm:$0xff] }
 0x164   :  { %v545_v53 = vunpack.c.l.s8.bf16 %v6743_v54 }
 0x165   :  { %2970 = vmatpush1.bf16.msra.mxu1 %v6472_v25  ;;  %v5238_v25 = vcombine.low %v525_v47, %v529_v35  ;;  %v6757_v35 = vld [vmem:[#allocation6 + $0x368] sm:$0xff] }
 0x166   :  { %3093 = vmatpush1.bf16.msra.mxu0 %v5222_v41  ;;  %2971 = vmatprep.subr.bf16.mxu1 %v6474_v39  ;;  %v5247_v41 = vcombine.high %v533_v33, %v537_v62  ;;  %v541_v39 = vunpack.c.l.s8.bf16 %v6741_v43 }
 0x167   :  { %3094 = vmatprep.subr.bf16.mxu0 %v5231_v42  ;;  %v6751_v42 = vld [vmem:[#allocation6 + $0x358] sm:$0xff] }
 0x168   :  { %v553_v47 = vunpack.c.l.s8.bf16 %v6751_v42 }
 0x169   :  { %2972 = vmatpush1.bf16.msra.mxu1 %v6476_v21  ;;  %v5246_v21 = vcombine.low %v533_v33, %v537_v62  ;;  %v6765_v62 = vld [vmem:[#allocation6 + $0x388] sm:$0xff] }
 0x16a   :  { %3095 = vmatpush1.bf16.msra.mxu0 %v5230_v4  ;;  %2973 = vmatprep.subr.bf16.mxu1 %v6484_v9  ;;  %v5255_v4 = vcombine.high %v541_v39, %v545_v53  ;;  %v549_v9 = vunpack.c.l.s8.bf16 %v6749_v31  ;;  %7485 = vst [vmem:[#allocation26_spill] sm:$0xff] %v6765_v62 }
 0x16b   :  { %3096 = vmatprep.subr.bf16.mxu0 %v5239_v34  ;;  %v6759_v34 = vld [vmem:[#allocation6 + $0x378] sm:$0xff] }
 0x16c   :  { %7484 = vst [vmem:[#allocation25_spill] sm:$0xff] %v6759_v34  ;;  %v561_v33 = vunpack.c.l.s8.bf16 %v6759_v34  ;;  %v6785_v34 = vld [vmem:[#allocation6 + $0x3d8] sm:$0xff] }
 0x16d   :  { %2974 = vmatpush1.bf16.msra.mxu1 %v6486_v5  ;;  %v5254_v5 = vcombine.low %v541_v39, %v545_v53  ;;  %v6773_v53 = vld [vmem:[#allocation6 + $0x3a8] sm:$0xff]  ;;  %7489 = vst [vmem:[#allocation29_spill] sm:$0xff] %v6785_v34 }
 0x16e   :  { %3097 = vmatpush1.bf16.msra.mxu0 %v5238_v25  ;;  %2975 = vmatprep.subr.bf16.mxu1 %v6492_v23  ;;  %v5263_v25 = vcombine.high %v549_v9, %v553_v47  ;;  %v557_v23 = vunpack.c.l.s8.bf16 %v6757_v35 }
 0x16f   :  { %3098 = vmatprep.subr.bf16.mxu0 %v5247_v41  ;;  %v6767_v41 = vld [vmem:[#allocation6 + $0x398] sm:$0xff] }
 0x170   :  { %7486 = vst [vmem:[#allocation36_spill] sm:$0xff] %v6767_v41  ;;  %v569_v39 = vunpack.c.l.s8.bf16 %v6767_v41 }
 0x171   :  { %2976 = vmatpush1.bf16.msra.mxu1 %v6494_v13  ;;  %v5262_v13 = vcombine.low %v549_v9, %v553_v47 }
 0x172   :  { %3099 = vmatpush1.bf16.msra.mxu0 %v5246_v21  ;;  %2977 = vmatprep.subr.bf16.mxu1 %v6506_v46  ;;  %v5271_v21 = vcombine.high %v557_v23, %v561_v33  ;;  %v565_v46 = vunpack.c.l.s8.bf16 %v6765_v62  ;;  %v6783_v62 = vld [vmem:[#allocation6 + $0x3c8] sm:$0xff] }
 0x173   :  { %3100 = vmatprep.subr.bf16.mxu0 %v5255_v4  ;;  %v6775_v4 = vld [vmem:[#allocation6 + $0x3b8] sm:$0xff] }
 0x174   :  { %7487 = vst [vmem:[#allocation27_spill] sm:$0xff] %v6775_v4  ;;  %v5279_v47 = vcombine.high %v565_v46, %v569_v39  ;;  %v577_v41 = vunpack.c.l.s8.bf16 %v6775_v4  ;;  %v6795_v4 = vld [vmem:[#allocation6 + $0x3f8] sm:$0xff] }
 0x175   :  { %2978 = vmatpush1.bf16.msra.mxu1 %v6508_v10  ;;  %v5270_v10 = vcombine.low %v557_v23, %v561_v33  ;;  %v346_v23 = vunpack.c.h.s8.bf16 %v6510_v28  ;;  %7490 = vst [vmem:[#allocation37_spill] sm:$0xff] %v6795_v4 }
 0x176   :  { %3101 = vmatpush1.bf16.msra.mxu0 %v5254_v5  ;;  %2979 = vmatprep.subr.bf16.mxu1 %v6512_v58  ;;  %v724_v5 = vunpack.c.h.s8.bf16 %v6488_v45  ;;  %v7488_v58 = vld [vmem:[#allocation40_spill] sm:$0xff]  ;;  %v342_v45 = vunpack.c.h.s8.bf16 %v6504_v8 }
 0x177   :  { %3102 = vmatprep.subr.bf16.mxu0 %v5263_v25  ;;  %v728_v9 = vunpack.c.h.s8.bf16 %v7488_v58  ;;  %v573_v25 = vunpack.c.l.s8.bf16 %v6773_v53  ;;  %v6793_v58 = vld [vmem:[#allocation6 + $0x3e8] sm:$0xff] }
 0x178   :  { %v589_v28 = vunpack.c.l.s8.bf16 %v6793_v58 }
 0x179   :  { %2980 = vmatpush1.bf16.msra.mxu1 %v6514_v0  ;;  %v5278_v0 = vcombine.low %v565_v46, %v569_v39  ;;  %v5287_v33 = vcombine.high %v573_v25, %v577_v41  ;;  %v5057_v46 = vcombine.high %v342_v45, %v346_v23  ;;  %v593_v39 = vunpack.c.l.s8.bf16 %v6795_v4 }
 0x17a   :  { %3103 = vmatpush1.bf16.msra.mxu0 %v5262_v13  ;;  %2981 = vmatprep.subr.bf16.mxu1 %v6522_v57  ;;  %v5437_v57 = vcombine.high %v724_v5, %v728_v9  ;;  %v581_v13 = vunpack.c.l.s8.bf16 %v6783_v62 }
 0x17b   :  { %3104 = vmatprep.subr.bf16.mxu0 %v5271_v21  ;;  %v585_v21 = vunpack.c.l.s8.bf16 %v6785_v34  ;;  %v7493_v34 = vmov 0  }
 0x17d   :  { %2982 = vmatpush1.bf16.msra.mxu1 %v6524_v30  ;;  %v5436_v30 = vcombine.low %v724_v5, %v728_v9  ;;  %v5295_v8 = vcombine.high %v581_v13, %v585_v21 }
 0x17e   :  { %3105 = vmatpush1.bf16.msra.mxu0 %v5270_v10  ;;  %2983 = vmatprep.subr.bf16.mxu1 %v6526_v11  ;;  %v5286_v11 = vcombine.low %v573_v25, %v577_v41  ;;  %v6801_v10 = vld [vmem:[#allocation6 + $0x408] sm:$0xff]  ;;  %v5303_v41 = vcombine.high %v589_v28, %v593_v39 }
 0x17f   :  { %3106 = vmatprep.subr.bf16.mxu0 %v5279_v47  ;;  %7491 = vst [vmem:[#allocation30_spill] sm:$0xff] %v6801_v10  ;;  %v6803_v47 = vld [vmem:[#allocation6 + $0x418] sm:$0xff]  ;;  %v597_v5 = vunpack.c.l.s8.bf16 %v6801_v10  ;;  %v6808_v25 = vld [vmem:[#allocation6 + $0x428] sm:$0xff] }
 0x180   :  { %7492 = vst [vmem:[#allocation31_spill] sm:$0xff] %v6803_v47  ;;  %v601_v9 = vunpack.c.l.s8.bf16 %v6803_v47  ;;  %v5056_v47 = vcombine.low %v342_v45, %v346_v23  ;;  %v366_v23 = vunpack.c.h.s8.bf16 %v6558_v52 }
 0x181   :  { %2984 = vmatpush1.bf16.msra.mxu1 %v6531_v60  ;;  %v5294_v60 = vcombine.low %v581_v13, %v585_v21  ;;  %v605_v13 = vunpack.c.l.s8.bf16 %v6808_v25 }
 0x182   :  { %3107 = vmatpush1.bf16.msra.mxu0 %v5278_v0  ;;  %2996 = vmatprep.subr.bf16.mxu1 %v5437_v57  ;;  %v6810_v0 = vld [vmem:[#allocation6 + $0x438] sm:$0xff]  ;;  %v5302_v57 = vcombine.low %v589_v28, %v593_v39  ;;  %v5310_v10 = vcombine.low %v597_v5, %v601_v9  ;;  %v358_v28 = vunpack.c.h.s8.bf16 %v6548_v36 }
 0x183   :  { %3108 = vmatprep.subr.bf16.mxu0 %v5287_v33  ;;  %7494 = vst [vmem:[#allocation32_spill] sm:$0xff] %v6810_v0  ;;  %v350_v33 = vunpack.c.h.s8.bf16 %v6539_v26  ;;  %v609_v21 = vunpack.c.l.s8.bf16 %v6810_v0  ;;  %v362_v26 = vunpack.c.h.s8.bf16 %v6550_v15  ;;  %v6828_v0 = vld [vmem:[#allocation6 + $0x478] sm:$0xff] }
 0x184   :  { %2986 = vmatmul.mubr.bf16.vlgmr.msra.gmra.mrb[4].mxu1 %v6529_v40  ;;  %7498 = vst [vmem:[#allocation40_spill] sm:$0xff] %v6828_v0 }
 0x185   :  { %2997 = vmatpush1.bf16.msra.mxu1 %v5436_v30  ;;  %3028 = vmatprep.mubr.bf16.mxu1 %v7493_v34  ;;  %v354_v30 = vunpack.c.h.s8.bf16 %v6541_v14  ;;  %v5319_v14 = vcombine.high %v605_v13, %v609_v21  ;;  %v5318_v36 = vcombine.low %v605_v13, %v609_v21  ;;  %v5073_v15 = vcombine.high %v358_v28, %v362_v26 }
 0x186   :  { %3109 = vmatpush1.bf16.msra.mxu0 %v5286_v11  ;;  %3211 = vmatprep.subr.bf16.mxu1 %v5057_v46  ;;  %v5311_v11 = vcombine.high %v597_v5, %v601_v9  ;;  %v6816_v46 = vld [vmem:[#allocation6 + $0x448] sm:$0xff]  ;;  %v370_v5 = vunpack.c.h.s8.bf16 %v6560_v27 }
 0x187   :  { %3110 = vmatprep.subr.bf16.mxu0 %v5295_v8  ;;  %7495 = vst [vmem:[#allocation38_spill] sm:$0xff] %v6816_v46  ;;  %v6818_v8 = vld [vmem:[#allocation6 + $0x458] sm:$0xff]  ;;  %v5065_v4 = vcombine.high %v350_v33, %v354_v30  ;;  %v613_v39 = vunpack.c.l.s8.bf16 %v6816_v46  ;;  %v5064_v45 = vcombine.low %v350_v33, %v354_v30  ;;  %v7501_v33 = vld [vmem:[#allocation41_spill] sm:$0xff] }
 0x188   :  { %7496 = vst [vmem:[#allocation34_spill] sm:$0xff] %v6818_v8  ;;  %v5081_v27 = vcombine.high %v366_v23, %v370_v5  ;;  %v378_v30 = vunpack.c.h.s8.bf16 %v7501_v33  ;;  %v6871_v46 = vld [vmem:[#allocation6 + $0x4f8] sm:$0xff] }
 0x18a   :  { %3111 = vmatpush1.bf16.msra.mxu0 %v5294_v60  ;;  %v617_v60 = vunpack.c.l.s8.bf16 %v6818_v8  ;;  %v6836_v8 = vld [vmem:[#allocation6 + $0x488] sm:$0xff] }
 0x18b   :  { %3112 = vmatprep.subr.bf16.mxu0 %v5303_v41  ;;  %v6826_v41 = vld [vmem:[#allocation6 + $0x468] sm:$0xff]  ;;  %7499 = vst [vmem:[#allocation53_spill] sm:$0xff] %v6836_v8 }
 0x18c   :  { %7497 = vst [vmem:[#allocation39_spill] sm:$0xff] %v6826_v41  ;;  %v5327_v9 = vcombine.high %v613_v39, %v617_v60  ;;  %v5326_v52 = vcombine.low %v613_v39, %v617_v60 }
 0x18e   :  { %3113 = vmatpush1.bf16.msra.mxu0 %v5302_v57  ;;  %v621_v57 = vunpack.c.l.s8.bf16 %v6826_v41 }
 0x18f   :  { %3125 = vmatprep.subr.bf16.mxu0 %v5311_v11  ;;  %v625_v11 = vunpack.c.l.s8.bf16 %v6828_v0 }
 0x190   :  { %5443 = vmatmul.mubr.msk.bf16.vlgmr.msra.gmra.mrb[4].mxu1 %vm2691_vm0, %v6553_v24 }
 0x191   :  { %3115 = vmatmul.mubr.bf16.vlgmr.msra.gmra.mrb[4].mxu0 %v7471_v55  ;;  %3212 = vmatpush1.bf16.msra.mxu1 %v5056_v47  ;;  %v6838_v47 = vld [vmem:[#allocation6 + $0x498] sm:$0xff]  ;;  %v5335_v21 = vcombine.high %v621_v57, %v625_v11  ;;  %v5334_v60 = vcombine.low %v621_v57, %v625_v11  ;;  %v7508_v11 = vld [vmem:[#allocation44_spill] sm:$0xff] }
 0x192   :  { %3126 = vmatpush1.bf16.msra.mxu0 %v5310_v10  ;;  %3213 = vmatprep.subr.bf16.mxu1 %v5065_v4  ;;  %7500 = vst [vmem:[#allocation54_spill] sm:$0xff] %v6838_v47  ;;  %v5072_v4 = vcombine.low %v358_v28, %v362_v26  ;;  %v374_v10 = vunpack.c.h.s8.bf16 %v6569_v49  ;;  %v633_v0 = vunpack.c.l.s8.bf16 %v6838_v47  ;;  %v6851_v28 = vld [vmem:[#allocation6 + $0x4b8] sm:$0xff]  ;;  %v5080_v49 = vcombine.low %v366_v23, %v370_v5 }
 0x193   :  { %3127 = vmatprep.subr.bf16.mxu0 %v5319_v14  ;;  %3157 = vmatprep.mubr.bf16.mxu0 %v7473_v32  ;;  %v629_v14 = vunpack.c.l.s8.bf16 %v6836_v8  ;;  %7503 = vst [vmem:[#allocation55_spill] sm:$0xff] %v6851_v28  ;;  %v641_v32 = vunpack.c.l.s8.bf16 %v6851_v28  ;;  %v6863_v55 = vld [vmem:[#allocation6 + $0x4d8] sm:$0xff] }
 0x194   :  { %3243 = vmatprep.mubr.bf16.mxu1 %v6032_v51  ;;  %v6849_v51 = vld [vmem:[#allocation6 + $0x4a8] sm:$0xff]  ;;  %v5088_v23 = vcombine.low %v374_v10, %v378_v30  ;;  %v649_v28 = vunpack.c.l.s8.bf16 %v6863_v55 }
 0x195   :  { %3214 = vmatpush1.bf16.msra.mxu1 %v5064_v45  ;;  %7502 = vst [vmem:[#allocation41_spill] sm:$0xff] %v6849_v51  ;;  %v5089_v45 = vcombine.high %v374_v10, %v378_v30  ;;  %v5343_v47 = vcombine.high %v629_v14, %v633_v0  ;;  %v637_v8 = vunpack.c.l.s8.bf16 %v6849_v51  ;;  %v5342_v5 = vcombine.low %v629_v14, %v633_v0  ;;  %v6869_v51 = vld [vmem:[#allocation6 + $0x4e8] sm:$0xff]  ;;  %v7512_v14 = vld [vmem:[#allocation46_spill] sm:$0xff] }
 0x196   :  { %3128 = vmatpush1.bf16.msra.mxu0 %v5318_v36  ;;  %3215 = vmatprep.subr.bf16.mxu1 %v5073_v15  ;;  %v7504_v36 = vld [vmem:[#allocation42_spill] sm:$0xff]  ;;  %7510 = vst [vmem:[#allocation44_spill] sm:$0xff] %v6869_v51 }
 0x197   :  { %v6843_v13 = vpop.f32.mrb[0].mxu1  ;;  %3129 = vmatprep.subr.bf16.mxu0 %v5327_v9  ;;  %v382_v15 = vunpack.c.h.s8.bf16 %v7504_v36  ;;  %v7505_v9 = vld [vmem:[#allocation43_spill] sm:$0xff]  ;;  %v5350_v0 = vcombine.low %v637_v8, %v641_v32 }
 0x198   :  { %v6847_v41 = vpop.f32.mrb[1].mxu1  ;;  %v386_v33 = vunpack.c.h.s8.bf16 %v7505_v9  ;;  %7507 = vst [vmem:[#allocation43_spill] sm:$0xff] %v6863_v55  ;;  %v6877_v55 = vld [vmem:[#allocation6 + $0x508] sm:$0xff] }
 0x199   :  { %3216 = vmatpush1.bf16.msra.mxu1 %v5072_v4  ;;  %v6853_v26 = vpop.f32.mrb[2].mxu1  ;;  %v6861_v4 = vld [vmem:[#allocation6 + $0x4c8] sm:$0xff] }
 0x19a   :  { %3130 = vmatpush1.bf16.msra.mxu0 %v5326_v52  ;;  %v6855_v39 = vpop.f32.mrb[3].mxu1  ;;  %3217 = vmatprep.subr.bf16.mxu1 %v5081_v27  ;;  %7506 = vst [vmem:[#allocation42_spill] sm:$0xff] %v6861_v4  ;;  %v5097_v57 = vcombine.high %v382_v15, %v386_v33  ;;  %v390_v52 = vunpack.c.h.s8.bf16 %v7508_v11  ;;  %v7509_v27 = vld [vmem:[#allocation45_spill] sm:$0xff]  ;;  %v645_v9 = vunpack.c.l.s8.bf16 %v6861_v4  ;;  %v5096_v10 = vcombine.low %v382_v15, %v386_v33  ;;  %v6879_v4 = vld [vmem:[#allocation6 + $0x518] sm:$0xff] }
 0x19b   :  { %3131 = vmatprep.subr.bf16.mxu0 %v5335_v21  ;;  %v394_v36 = vunpack.c.h.s8.bf16 %v7509_v27  ;;  %v5351_v21 = vcombine.high %v637_v8, %v641_v32  ;;  %7511 = vst [vmem:[#allocation45_spill] sm:$0xff] %v6871_v46  ;;  %v653_v11 = vunpack.c.l.s8.bf16 %v6869_v51  ;;  %v657_v27 = vunpack.c.l.s8.bf16 %v6871_v46  ;;  %7514 = vst [vmem:[#allocation46_spill] sm:$0xff] %v6879_v4  ;;  %v7515_v33 = vld [vmem:[#allocation17_spill] sm:$0xff]  ;;  %v6887_v51 = vld [vmem:[#allocation6 + $0x538] sm:$0xff] }
 0x19c   :  { %v5358_v32 = vcombine.low %v645_v9, %v649_v28  ;;  %v6885_v46 = vld [vmem:[#allocation6 + $0x528] sm:$0xff] }
 0x19d   :  { %3218 = vmatpush1.bf16.msra.mxu1 %v5080_v49  ;;  %v5105_v30 = vcombine.high %v390_v52, %v394_v36  ;;  %v398_v49 = vunpack.c.h.s8.bf16 %v7512_v14  ;;  %v5104_v15 = vcombine.low %v390_v52, %v394_v36  ;;  %v661_v14 = vunpack.c.l.s8.bf16 %v6877_v55 }
 0x19e   :  { %3132 = vmatpush1.bf16.msra.mxu0 %v5334_v60  ;;  %3219 = vmatprep.subr.bf16.mxu1 %v5089_v45  ;;  %v7513_v60 = vld [vmem:[#allocation47_spill] sm:$0xff] }
 0x19f   :  { %3133 = vmatprep.subr.bf16.mxu0 %v5343_v47  ;;  %v402_v45 = vunpack.c.h.s8.bf16 %v7513_v60  ;;  %v5359_v47 = vcombine.high %v645_v9, %v649_v28  ;;  %v665_v60 = vunpack.c.l.s8.bf16 %v6879_v4  ;;  %7517 = vst [vmem:[#allocation47_spill] sm:$0xff] %v6887_v51  ;;  %v5366_v28 = vcombine.low %v653_v11, %v657_v27  ;;  %v6895_v4 = vld [vmem:[#allocation6 + $0x558] sm:$0xff] }
 0x1a0   :  { %v414_v9 = vunpack.c.h.s8.bf16 %v6609_v37  ;;  %v422_v37 = vunpack.c.h.s8.bf16 %v6617_v17  ;;  %v430_v17 = vunpack.c.h.s8.bf16 %v6625_v44  ;;  %v438_v44 = vunpack.c.h.s8.bf16 %v6633_v7 }
 0x1a1   :  { %3220 = vmatpush1.bf16.msra.mxu1 %v5088_v23  ;;  %v5113_v8 = vcombine.high %v398_v49, %v402_v45  ;;  %v406_v23 = vunpack.c.h.s8.bf16 %v7515_v33  ;;  %v5112_v52 = vcombine.low %v398_v49, %v402_v45  ;;  %v673_v33 = vunpack.c.l.s8.bf16 %v6887_v51  ;;  %v6903_v51 = vld [vmem:[#allocation6 + $0x578] sm:$0xff] }
 0x1a2   :  { %3134 = vmatpush1.bf16.msra.mxu0 %v5342_v5  ;;  %3221 = vmatprep.subr.bf16.mxu1 %v5097_v57  ;;  %v7516_v5 = vld [vmem:[#allocation28_spill] sm:$0xff]  ;;  %v5374_v45 = vcombine.low %v661_v14, %v665_v60  ;;  %7520 = vst [vmem:[#allocation17_spill] sm:$0xff] %v6903_v51  ;;  %v446_v7 = vunpack.c.h.s8.bf16 %v6641_v63 }
 0x1a3   :  { %3135 = vmatprep.subr.bf16.mxu0 %v5351_v21  ;;  %v410_v57 = vunpack.c.h.s8.bf16 %v7516_v5  ;;  %v5367_v21 = vcombine.high %v653_v11, %v657_v27  ;;  %v6893_v5 = vld [vmem:[#allocation6 + $0x548] sm:$0xff]  ;;  %v7519_v27 = vld [vmem:[#allocation51_spill] sm:$0xff] }
 0x1a5   :  { %3222 = vmatpush1.bf16.msra.mxu1 %v5096_v10  ;;  %v5121_v36 = vcombine.high %v406_v23, %v410_v57  ;;  %v7518_v10 = vld [vmem:[#allocation50_spill] sm:$0xff]  ;;  %v5120_v49 = vcombine.low %v406_v23, %v410_v57 }
 0x1a6   :  { %3136 = vmatpush1.bf16.msra.mxu0 %v5350_v0  ;;  %3223 = vmatprep.subr.bf16.mxu1 %v5105_v30  ;;  %v418_v0 = vunpack.c.h.s8.bf16 %v7518_v10  ;;  %v5375_v30 = vcombine.high %v661_v14, %v665_v60  ;;  %v6901_v10 = vld [vmem:[#allocation6 + $0x568] sm:$0xff]  ;;  %v434_v60 = vunpack.c.h.s8.bf16 %v6627_v12 }
 0x1a7   :  { %3137 = vmatprep.subr.bf16.mxu0 %v5359_v47  ;;  %v669_v47 = vunpack.c.l.s8.bf16 %v6885_v46 }
 0x1a8   :  { %v5129_v11 = vcombine.high %v414_v9, %v418_v0  ;;  %v5128_v23 = vcombine.low %v414_v9, %v418_v0 }
 0x1a9   :  { %3224 = vmatpush1.bf16.msra.mxu1 %v5104_v15  ;;  %v426_v15 = vunpack.c.h.s8.bf16 %v7519_v27  ;;  %v5382_v57 = vcombine.low %v669_v47, %v673_v33  ;;  %v6911_v27 = vld [vmem:[#allocation6 + $0x598] sm:$0xff] }
 0x1aa   :  { %3138 = vmatpush1.bf16.msra.mxu0 %v5358_v32  ;;  %3225 = vmatprep.subr.bf16.mxu1 %v5113_v8  ;;  %v5383_v32 = vcombine.high %v669_v47, %v673_v33  ;;  %v677_v8 = vunpack.c.l.s8.bf16 %v6893_v5  ;;  %7521 = vst [vmem:[#allocation28_spill] sm:$0xff] %v6911_v27  ;;  %v5145_v47 = vcombine.high %v430_v17, %v434_v60  ;;  %v7522_v33 = vld [vmem:[#allocation52_spill] sm:$0xff] }
 0x1ab   :  { %3139 = vmatprep.subr.bf16.mxu0 %v5367_v21  ;;  %v681_v21 = vunpack.c.l.s8.bf16 %v6895_v4  ;;  %v5137_v14 = vcombine.high %v422_v37, %v426_v15  ;;  %v5136_v9 = vcombine.low %v422_v37, %v426_v15  ;;  %v442_v12 = vunpack.c.h.s8.bf16 %v7522_v33  ;;  %v6925_v33 = vld [vmem:[#allocation6 + $0x5c8] sm:$0xff] }
 0x1ac   :  { %v5144_v37 = vcombine.low %v430_v17, %v434_v60 }
 0x1ad   :  { %3226 = vmatpush1.bf16.msra.mxu1 %v5112_v52  ;;  %v5391_v52 = vcombine.high %v677_v8, %v681_v21  ;;  %v5390_v0 = vcombine.low %v677_v8, %v681_v21  ;;  %v5153_v8 = vcombine.high %v438_v44, %v442_v12  ;;  %v7525_v21 = vld [vmem:[#allocation18_spill] sm:$0xff]  ;;  %v5152_v17 = vcombine.low %v438_v44, %v442_v12 }
 0x1ae   :  { %3140 = vmatpush1.bf16.msra.mxu0 %v5366_v28  ;;  %3227 = vmatprep.subr.bf16.mxu1 %v5121_v36  ;;  %v685_v28 = vunpack.c.l.s8.bf16 %v6901_v10  ;;  %v689_v36 = vunpack.c.l.s8.bf16 %v6903_v51  ;;  %v6919_v51 = vld [vmem:[#allocation6 + $0x5b8] sm:$0xff] }
 0x1af   :  { %3141 = vmatprep.subr.bf16.mxu0 %v5375_v30  ;;  %v6909_v30 = vld [vmem:[#allocation6 + $0x588] sm:$0xff]  ;;  %7524 = vst [vmem:[#allocation51_spill] sm:$0xff] %v6919_v51 }
 0x1b0   :  { %v5398_v15 = vcombine.low %v685_v28, %v689_v36 }
 0x1b1   :  { %3228 = vmatpush1.bf16.msra.mxu1 %v5120_v49  ;;  %v5399_v49 = vcombine.high %v685_v28, %v689_v36  ;;  %v7527_v36 = vld [vmem:[#allocation19_spill] sm:$0xff] }
 0x1b2   :  { %3142 = vmatpush1.bf16.msra.mxu0 %v5374_v45  ;;  %3229 = vmatprep.subr.bf16.mxu1 %v5129_v11  ;;  %v693_v45 = vunpack.c.l.s8.bf16 %v6909_v30  ;;  %v697_v11 = vunpack.c.l.s8.bf16 %v6911_v27  ;;  %v6927_v27 = vld [vmem:[#allocation6 + $0x5d8] sm:$0xff]  ;;  %v454_v63 = vunpack.c.h.s8.bf16 %v7527_v36 }
 0x1b3   :  { %3143 = vmatprep.subr.bf16.mxu0 %v5383_v32  ;;  %v6917_v32 = vld [vmem:[#allocation6 + $0x5a8] sm:$0xff]  ;;  %7526 = vst [vmem:[#allocation52_spill] sm:$0xff] %v6927_v27 }
 0x1b4   :  { %7523 = vst [vmem:[#allocation50_spill] sm:$0xff] %v6917_v32  ;;  %v5406_v60 = vcombine.low %v693_v45, %v697_v11 }
 0x1b5   :  { %3230 = vmatpush1.bf16.msra.mxu1 %v5128_v23  ;;  %v450_v23 = vunpack.c.h.s8.bf16 %v7525_v21  ;;  %v713_v21 = vunpack.c.l.s8.bf16 %v6927_v27  ;;  %v6943_v27 = vld [vmem:[#allocation6 + $0x618] sm:$0xff] }
 0x1b6   :  { %3144 = vmatpush1.bf16.msra.mxu0 %v5382_v57  ;;  %3231 = vmatprep.subr.bf16.mxu1 %v5137_v14  ;;  %v5407_v57 = vcombine.high %v693_v45, %v697_v11  ;;  %v701_v14 = vunpack.c.l.s8.bf16 %v6917_v32  ;;  %v6935_v32 = vld [vmem:[#allocation6 + $0x5f8] sm:$0xff]  ;;  %v462_v11 = vunpack.c.h.s8.bf16 %v6657_v48  ;;  %v470_v48 = vunpack.c.h.s8.bf16 %v6666_v20 }
 0x1b7   :  { %3145 = vmatprep.subr.bf16.mxu0 %v5391_v52  ;;  %v705_v52 = vunpack.c.l.s8.bf16 %v6919_v51  ;;  %v5161_v28 = vcombine.high %v446_v7, %v450_v23  ;;  %v6933_v51 = vld [vmem:[#allocation6 + $0x5e8] sm:$0xff]  ;;  %v5160_v44 = vcombine.low %v446_v7, %v450_v23  ;;  %v721_v36 = vunpack.c.l.s8.bf16 %v6935_v32 }
 0x1b9   :  { %3232 = vmatpush1.bf16.msra.mxu1 %v5136_v9  ;;  %v7528_v9 = vld [vmem:[#allocation20_spill] sm:$0xff]  ;;  %v5414_v12 = vcombine.low %v701_v14, %v705_v52 }
 0x1ba   :  { %3146 = vmatpush1.bf16.msra.mxu0 %v5390_v0  ;;  %3233 = vmatprep.subr.bf16.mxu1 %v5145_v47  ;;  %v458_v0 = vunpack.c.h.s8.bf16 %v7528_v9  ;;  %v5415_v47 = vcombine.high %v701_v14, %v705_v52  ;;  %v6941_v9 = vld [vmem:[#allocation6 + $0x608] sm:$0xff] }
 0x1bb   :  { %3147 = vmatprep.subr.bf16.mxu0 %v5399_v49  ;;  %v709_v49 = vunpack.c.l.s8.bf16 %v6925_v33  ;;  %v7530_v52 = vld [vmem:[#allocation21_spill] sm:$0xff] }
 0x1bc   :  { %v5169_v45 = vcombine.high %v454_v63, %v458_v0  ;;  %v5168_v7 = vcombine.low %v454_v63, %v458_v0  ;;  %v478_v0 = vunpack.c.h.s8.bf16 %v6675_v22 }
 0x1bd   :  { %3234 = vmatpush1.bf16.msra.mxu1 %v5144_v37  ;;  %v7529_v37 = vld [vmem:[#allocation33_spill] sm:$0xff]  ;;  %v5422_v23 = vcombine.low %v709_v49, %v713_v21 }
 0x1be   :  { %3148 = vmatpush1.bf16.msra.mxu0 %v5398_v15  ;;  %3235 = vmatprep.subr.bf16.mxu1 %v5153_v8  ;;  %v466_v15 = vunpack.c.h.s8.bf16 %v7529_v37  ;;  %v5423_v8 = vcombine.high %v709_v49, %v713_v21  ;;  %v482_v49 = vunpack.c.h.s8.bf16 %v6677_v16  ;;  %v3532_v21 = vld [vmem:[#allocation10 + $0x8] sm:$0xff] }
 0x1bf   :  { %3149 = vmatprep.subr.bf16.mxu0 %v5407_v57  ;;  %v717_v57 = vunpack.c.l.s8.bf16 %v6933_v51 }
 0x1c0   :  { %v5177_v14 = vcombine.high %v462_v11, %v466_v15  ;;  %v5176_v37 = vcombine.low %v462_v11, %v466_v15  ;;  %v486_v11 = vunpack.c.h.s8.bf16 %v6683_v3  ;;  %v7531_v15 = vld [vmem:[#allocation22_spill] sm:$0xff]  ;;  %v5192_v22 = vcombine.low %v478_v0, %v482_v49 }
 0x1c1   :  { %3236 = vmatpush1.bf16.msra.mxu1 %v5152_v17  ;;  %v474_v17 = vunpack.c.h.s8.bf16 %v7530_v52  ;;  %v494_v3 = vunpack.c.h.s8.bf16 %v6691_v38  ;;  %v3385_v38 = vlaneseq }
 0x1c2   :  { %3150 = vmatpush1.bf16.msra.mxu0 %v5406_v60  ;;  %3237 = vmatprep.subr.bf16.mxu1 %v5161_v28  ;;  %v5431_v60 = vcombine.high %v717_v57, %v721_v36  ;;  %v725_v28 = vunpack.c.l.s8.bf16 %v6941_v9 }
 0x1c3   :  { %3151 = vmatprep.subr.bf16.mxu0 %v5415_v47  ;;  %v729_v47 = vunpack.c.l.s8.bf16 %v6943_v27  ;;  %v5185_v63 = vcombine.high %v470_v48, %v474_v17 }
 0x1c5   :  { %3238 = vmatpush1.bf16.msra.mxu1 %v5160_v44  ;;  %v5430_v44 = vcombine.low %v717_v57, %v721_v36  ;;  %v5439_v20 = vcombine.high %v725_v28, %v729_v47  ;;  %v5438_v57 = vcombine.low %v725_v28, %v729_v47  ;;  %v3531_v47 = vld [vmem:[#allocation10] sm:$0xff] }
 0x1c6   :  { %3152 = vmatpush1.bf16.msra.mxu0 %v5414_v12  ;;  %3239 = vmatprep.subr.bf16.mxu1 %v5169_v45  ;;  %v3536_v12 = vld [vmem:[#allocation10 + $0x28] sm:$0x3]  ;;  %v5184_v45 = vcombine.low %v470_v48, %v474_v17  ;;  %v502_v17 = vunpack.c.h.s8.bf16 %v6701_v19 }
 0x1c7   :  { %3153 = vmatprep.subr.bf16.mxu0 %v5423_v8  ;;  %v5193_v8 = vcombine.high %v478_v0, %v482_v49  ;;  %v5457_v36 = vpack.c.bf16 %v3536_v12, %v3532_v21 }
 0x1c9   :  { %3240 = vmatpush1.bf16.msra.mxu1 %v5168_v7  ;;  %v490_v7 = vunpack.c.h.s8.bf16 %v7531_v15  ;;  %v518_v15 = vunpack.c.h.s8.bf16 %v6717_v1  ;;  %v6988_v1 = vld [vmem:[#allocation4] sm:$0xff] }
 0x1ca   :  { %3154 = vmatpush1.bf16.msra.mxu0 %v5422_v23  ;;  %3241 = vmatprep.subr.bf16.mxu1 %v5177_v14  ;;  %v7534_v14 = vld [vmem:[#allocation23_spill] sm:$0xff] }
 0x1cb   :  { %3155 = vmatprep.subr.bf16.mxu0 %v5431_v60  ;;  %v5201_v23 = vcombine.high %v486_v11, %v490_v7  ;;  %v498_v48 = vunpack.c.h.s8.bf16 %v7534_v14  ;;  %v7535_v60 = vld [vmem:[#allocation24_spill] sm:$0xff] }
 0x1cc   :  { %v506_v28 = vunpack.c.h.s8.bf16 %v7535_v60 }
 0x1cd   :  { %3242 = vmatpush1.bf16.msra.mxu1 %v5176_v37  ;;  %v5209_v52 = vcombine.high %v494_v3, %v498_v48  ;;  %v3535_v37 = vld [vmem:[#allocation10 + $0x20] sm:$0x3] }
 0x1ce   :  { %3156 = vmatpush1.bf16.msra.mxu0 %v5430_v44  ;;  %3254 = vmatprep.subr.bf16.mxu1 %v5185_v63  ;;  %v3722_v44 = vld [vmem:[#allocation7 + $0x8] sm:$0xff]  ;;  %v5208_v63 = vcombine.low %v494_v3, %v498_v48  ;;  %v5217_v0 = vcombine.high %v502_v17, %v506_v28  ;;  %v5460_v49 = vpack.c.bf16 %v3535_v37, %v3531_v47  ;;  %v526_v48 = vunpack.c.h.s8.bf16 %v6725_v18 }
 0x1cf   :  { %3168 = vmatprep.subr.bf16.mxu0 %v5439_v20  ;;  %v510_v20 = vunpack.c.h.s8.bf16 %v6709_v59  ;;  %v3850_v12 = vunpack.c.l.s8.bf16 %v3722_v44  ;;  %v5216_v19 = vcombine.low %v502_v17, %v506_v28  ;;  %v522_v59 = vunpack.c.h.s8.bf16 %v6719_v2  ;;  %v3726_v37 = vld [vmem:[#allocation7 + $0x28] sm:$0xff] }
 0x1d0   :  { %3244 = vmatmul.mubr.bf16.vlgmr.msra.gmra.mrb[8].mxu1 %v6204_v6  ;;  %v5200_v6 = vcombine.low %v486_v11, %v490_v7  ;;  %v3721_v11 = vld [vmem:[#allocation7] sm:$0xff]  ;;  %v5764_v7 = vmov 0.0   ;;  %v3854_v17 = vunpack.c.h.s8.bf16 %v3722_v44  ;;  %v538_v44 = vunpack.c.h.s8.bf16 %v6735_v50 }
 0x1d1   :  { %3158 = vmatmul.mubr.bf16.vlgmr.msra.gmra.mrb[4].mxu0 %v6529_v40  ;;  %3255 = vmatpush1.bf16.msra.mxu1 %v5184_v45  ;;  %v6969_v45 = vshrl.u32 %v3385_v38, 7  ;;  %v3849_v3 = vunpack.c.l.s8.bf16 %v3721_v11  ;;  %v5233_v2 = vcombine.high %v518_v15, %v522_v59 }
 0x1d2   :  { %3256 = vmatprep.subr.bf16.mxu1 %v5193_v8  ;;  %3169 = vmatpush1.bf16.msra.mxu0 %v5438_v57 }
 0x1d3   :  { %3200 = vmatprep.mubr.bf16.mxu0 %v7493_v34  ;;  %5459 = vmatprep.subr.msk.bf16.mxu0 %vm6954_vm3, %v5457_v36  ;;  %v6979_v57 = vsub.s32 0, %v6969_v45  ;;  %v6981_v36 = vld [vmem:[#allocation12 + $0x8] sm:$0xff] }
 0x1d4   :  { %3286 = vmatprep.mubr.bf16.mxu1 %v7436_v61  ;;  %v7536_v61 = vld [vmem:[#allocation35_spill] sm:$0xff] }
 0x1d5   :  { %3257 = vmatpush1.bf16.msra.mxu1 %v5192_v22  ;;  %v514_v21 = vunpack.c.h.s8.bf16 %v7536_v61  ;;  %v6984_v22 = vsub.s32 1, %v6969_v45  ;;  %v3853_v61 = vunpack.c.h.s8.bf16 %v3721_v11 }
 0x1d6   :  { %3258 = vmatprep.subr.bf16.mxu1 %v5201_v23  ;;  %v6986_v23 = vld [vmem:[#allocation12] sm:$0xff] }
 0x1d7   :  { %v5225_v8 = vcombine.high %v510_v20, %v514_v21  ;;  %v5224_v14 = vcombine.low %v510_v20, %v514_v21  ;;  %v3446_v28 = vrot.slane %v6986_v23, %v6979_v57  ;;  %v3392_v47 = vrot.slane %v6981_v36, %v6984_v22  ;;  %v3725_v21 = vld [vmem:[#allocation7 + $0x20] sm:$0xff] }
 0x1d8   :  { %v3857_v11 = vunpack.c.l.s8.bf16 %v3725_v21 }
 0x1d9   :  { %3259 = vmatpush1.bf16.msra.mxu1 %v5200_v6  ;;  %v530_v6 = vunpack.c.h.s8.bf16 %v6727_v29  ;;  %v5232_v29 = vcombine.low %v518_v15, %v522_v59 }
 0x1da   :  { %3260 = vmatprep.subr.bf16.mxu1 %v5209_v52  ;;  %v3388_v52 = vrot.slane %v6981_v36, %v6979_v57 }
 0x1db   :  { %v5240_v59 = vcombine.low %v526_v48, %v530_v6 }
 0x1dd   :  { %5444 = vmatmul.mubr.msk.bf16.vlgmr.msra.gmra.mrb[4].mxu0 %vm2691_vm0, %v6553_v24  ;;  %3261 = vmatpush1.bf16.msra.mxu1 %v5208_v63  ;;  %v534_v63 = vunpack.c.h.s8.bf16 %v6733_v56  ;;  %v3858_v56 = vunpack.c.l.s8.bf16 %v3726_v37 }
 0x1de   :  { %3262 = vmatprep.subr.bf16.mxu1 %v5217_v0  ;;  %5462 = vmatpush1.bf16.msk.msra.mxu0 %vm6954_vm3, %v5460_v49  ;;  %v3450_v49 = vrot.slane %v6986_v23, %v6984_v22 }
 0x1df   :  { %3623 = vmatprep.mubr.f32.mxu0 %v5764_v7  ;;  %4105 = vmatprep.subr.bf16.mxu0 %v3850_v12  ;;  %v7006_v12 = vld [vmem:[#allocation4 + $0x8] sm:$0xff] }
 0x1e1   :  { %3263 = vmatpush1.bf16.msra.mxu1 %v5216_v19 }
 0x1e2   :  { %3264 = vmatprep.subr.bf16.mxu1 %v5225_v8 }
 0x1e4   :  { %v2858_v60 = vpop.f32.mrb[0].mxu0 }
 0x1e5   :  { %v5469_v38 = vadd.f32 %v2858_v60, %v6843_v13  ;;  %5448 = vmatmul.mubr.msk.f32.vlgmr.msra.gmra.mrb[8].mxu0 %vm3539_vm4, %v6988_v1  ;;  %v2860_v18 = vpop.f32.mrb[1].mxu0  ;;  %3265 = vmatpush1.bf16.msra.mxu1 %v5224_v14  ;;  %v5241_v13 = vcombine.high %v526_v48, %v530_v6 }
 0x1e6   :  { %4106 = vmatpush1.bf16.msra.mxu0 %v3849_v3  ;;  %v5470_v0 = vadd.f32 %v2860_v18, %v6847_v41  ;;  %v2862_v20 = vpop.f32.mrb[2].mxu0  ;;  %3266 = vmatprep.subr.bf16.mxu1 %v5233_v2  ;;  %v5249_v2 = vcombine.high %v534_v63, %v538_v44 }
 0x1e7   :  { %v3425_v19 = vmul.f32 %v5469_v38, %v3388_v52  ;;  %v5471_v8 = vadd.f32 %v2862_v20, %v6853_v26  ;;  %v2864_v15 = vpop.f32.mrb[3].mxu0  ;;  %4107 = vmatprep.subr.bf16.mxu0 %v3854_v17  ;;  %3629 = vmatprep.mubr.f32.mxu0 %v5764_v7  ;;  %v542_v26 = vunpack.c.h.s8.bf16 %v6741_v43  ;;  %v546_v17 = vunpack.c.h.s8.bf16 %v6743_v54 }
 0x1e8   :  { %v3426_v50 = vmul.f32 %v5470_v0, %v3392_v47  ;;  %v5472_v41 = vadd.f32 %v2864_v15, %v6855_v39  ;;  %v3862_v39 = vunpack.c.h.s8.bf16 %v3726_v37  ;;  %v3861_v20 = vunpack.c.h.s8.bf16 %v3725_v21 }
 0x1e9   :  { %v3483_v3 = vadd.f32 %v3446_v28, %v3425_v19  ;;  %v3433_v14 = vmul.f32 %v5471_v8, %v3388_v52  ;;  %3267 = vmatpush1.bf16.msra.mxu1 %v5232_v29  ;;  %5449 = vmatmul.mubr.msk.f32.gmra.mrb[10].mxu0 %vm3539_vm4, %v7006_v12  ;;  %v3730_v52 = vld [vmem:[#allocation7 + $0x48] sm:$0xff]  ;;  %v5248_v19 = vcombine.low %v534_v63, %v538_v44  ;;  %v550_v43 = vunpack.c.h.s8.bf16 %v6749_v31 }
 0x1ea   :  { %v3484_v60 = vadd.f32 %v3450_v49, %v3426_v50  ;;  %v3434_v38 = vmul.f32 %v5472_v41, %v3392_v47  ;;  %4108 = vmatpush1.bf16.msra.mxu0 %v3853_v61  ;;  %3268 = vmatprep.subr.bf16.mxu1 %v5241_v13  ;;  %v5257_v47 = vcombine.high %v542_v26, %v546_v17  ;;  %v3729_v61 = vld [vmem:[#allocation7 + $0x40] sm:$0xff]  ;;  %v554_v54 = vunpack.c.h.s8.bf16 %v6751_v42  ;;  %v7537_v41 = vld [vmem:[#allocation25_spill] sm:$0xff] }
 0x1eb   :  { %v3499_v18 = vmul.f32 0.2, %v3483_v3  ;;  %v3491_v0 = vadd.f32 %v3446_v28, %v3433_v14  ;;  %4109 = vmatprep.subr.bf16.mxu0 %v3858_v56  ;;  %v3866_v37 = vunpack.c.l.s8.bf16 %v3730_v52  ;;  %v3865_v21 = vunpack.c.l.s8.bf16 %v3729_v61 }
 0x1ec   :  { %v3500_v48 = vmul.f32 0.2, %v3484_v60  ;;  %v3492_v6 = vadd.f32 %v3450_v49, %v3434_v38  ;;  %v5256_v63 = vcombine.low %v542_v26, %v546_v17  ;;  %v5265_v50 = vcombine.high %v550_v43, %v554_v54  ;;  %v7539_v26 = vld [vmem:[#allocation36_spill] sm:$0xff] }
 0x1ed   :  { %v3507_v29 = vmul.f32 0.2, %v3491_v0  ;;  %3269 = vmatpush1.bf16.msra.mxu1 %v5240_v59  ;;  %v3515_v13 = vmax.f32 %v3483_v3, %v3499_v18  ;;  %v558_v31 = vunpack.c.h.s8.bf16 %v6757_v35  ;;  %v562_v42 = vunpack.c.h.s8.bf16 %v7537_v41  ;;  %v3734_v3 = vld [vmem:[#allocation7 + $0x68] sm:$0xff]  ;;  %v3733_v35 = vld [vmem:[#allocation7 + $0x60] sm:$0xff] }
 0x1ee   :  { %v3508_v8 = vmul.f32 0.2, %v3492_v6  ;;  %4110 = vmatpush1.bf16.msra.mxu0 %v3857_v11  ;;  %3270 = vmatprep.subr.bf16.mxu1 %v5249_v2  ;;  %v3516_v15 = vmax.f32 %v3484_v60, %v3500_v48  ;;  %v3870_v59 = vunpack.c.h.s8.bf16 %v3730_v52  ;;  %v5264_v14 = vcombine.low %v550_v43, %v554_v54  ;;  %v7538_v60 = vld [vmem:[#allocation26_spill] sm:$0xff]  ;;  %v7540_v52 = vld [vmem:[#allocation27_spill] sm:$0xff]  ;;  %v7541_v54 = vld [vmem:[#allocation29_spill] sm:$0xff] }
 0x1ef   :  { %v3523_v28 = vmax.f32 %v3491_v0, %v3507_v29  ;;  %4111 = vmatprep.subr.bf16.mxu0 %v3862_v39  ;;  %v3869_v11 = vunpack.c.h.s8.bf16 %v3729_v61  ;;  %v5273_v2 = vcombine.high %v558_v31, %v562_v42  ;;  %v566_v38 = vunpack.c.h.s8.bf16 %v7538_v60  ;;  %v3742_v41 = vld [vmem:[#allocation7 + $0xa8] sm:$0xff] }
 0x1f0   :  { %v3524_v49 = vmax.f32 %v3492_v6, %v3508_v8  ;;  %v570_v17 = vunpack.c.h.s8.bf16 %v7539_v26  ;;  %v3874_v18 = vunpack.c.l.s8.bf16 %v3734_v3  ;;  %v5272_v0 = vcombine.low %v558_v31, %v562_v42 }
 0x1f1   :  { %v7017_v56 = vpack.c.bf16 %v3523_v28, %v3515_v13  ;;  %3271 = vmatpush1.bf16.msra.mxu1 %v5248_v19  ;;  %v3873_v39 = vunpack.c.l.s8.bf16 %v3733_v35  ;;  %v574_v6 = vunpack.c.h.s8.bf16 %v6773_v53  ;;  %v578_v29 = vunpack.c.h.s8.bf16 %v7540_v52  ;;  %v3738_v19 = vld [vmem:[#allocation7 + $0x88] sm:$0xff] }
 0x1f2   :  { %4112 = vmatpush1.bf16.msra.mxu0 %v3861_v20  ;;  %3272 = vmatprep.subr.bf16.mxu1 %v5257_v47  ;;  %v7019_v44 = vpack.c.bf16 %v3524_v49, %v3516_v15  ;;  %v5281_v48 = vcombine.high %v566_v38, %v570_v17  ;;  %v3878_v20 = vunpack.c.h.s8.bf16 %v3734_v3  ;;  %v5280_v8 = vcombine.low %v566_v38, %v570_v17  ;;  %v7543_v3 = vld [vmem:[#allocation30_spill] sm:$0xff]  ;;  %v3741_v38 = vld [vmem:[#allocation7 + $0xa0] sm:$0xff] }
 0x1f3   :  { %4113 = vmatprep.subr.bf16.mxu0 %v3866_v37  ;;  %v3877_v47 = vunpack.c.h.s8.bf16 %v3733_v35  ;;  %v5289_v61 = vcombine.high %v574_v6, %v578_v29  ;;  %v582_v43 = vunpack.c.h.s8.bf16 %v6783_v62  ;;  %v586_v13 = vunpack.c.h.s8.bf16 %v7541_v54  ;;  %v3737_v37 = vld [vmem:[#allocation7 + $0x80] sm:$0xff] }
 0x1f4   :  { %4137 = vmatprep.mubr.bf16.mxu0 %v7019_v44  ;;  %v3882_v28 = vunpack.c.l.s8.bf16 %v3738_v19  ;;  %v5288_v53 = vcombine.low %v574_v6, %v578_v29  ;;  %v3881_v15 = vunpack.c.l.s8.bf16 %v3737_v37  ;;  %v3886_v31 = vunpack.c.h.s8.bf16 %v3738_v19  ;;  %v7545_v35 = vld [vmem:[#allocation32_spill] sm:$0xff] }
 0x1f5   :  { %3273 = vmatpush1.bf16.msra.mxu1 %v5256_v63  ;;  %v5297_v49 = vcombine.high %v582_v43, %v586_v13  ;;  %v7542_v63 = vld [vmem:[#allocation37_spill] sm:$0xff]  ;;  %v5296_v62 = vcombine.low %v582_v43, %v586_v13  ;;  %v3885_v42 = vunpack.c.h.s8.bf16 %v3737_v37  ;;  %v3890_v60 = vunpack.c.l.s8.bf16 %v3742_v41  ;;  %v3745_v43 = vld [vmem:[#allocation7 + $0xc0] sm:$0xff] }
 0x1f6   :  { %4114 = vmatpush1.bf16.msra.mxu0 %v3865_v21  ;;  %3274 = vmatprep.subr.bf16.mxu1 %v5265_v50  ;;  %v590_v21 = vunpack.c.h.s8.bf16 %v6793_v58  ;;  %v594_v50 = vunpack.c.h.s8.bf16 %v7542_v63  ;;  %v3889_v26 = vunpack.c.l.s8.bf16 %v3741_v38  ;;  %v3893_v52 = vunpack.c.h.s8.bf16 %v3741_v38  ;;  %v7548_v54 = vld [vmem:[#allocation48_spill] sm:$0xff]  ;;  %v7549_v13 = vld [vmem:[#allocation49_spill] sm:$0xff] }
 0x1f7   :  { %4115 = vmatprep.subr.bf16.mxu0 %v3870_v59 }
 0x1f8   :  { %v5305_v59 = vcombine.high %v590_v21, %v594_v50  ;;  %v5304_v58 = vcombine.low %v590_v21, %v594_v50  ;;  %v3750_v50 = vld [vmem:[#allocation7 + $0xe8] sm:$0xff] }
 0x1f9   :  { %3275 = vmatpush1.bf16.msra.mxu1 %v5264_v14  ;;  %v598_v14 = vunpack.c.h.s8.bf16 %v7543_v3  ;;  %v7553_v3 = vld [vmem:[#allocation54_spill] sm:$0xff] }
 0x1fa   :  { %4116 = vmatpush1.bf16.msra.mxu0 %v3869_v11  ;;  %3276 = vmatprep.subr.bf16.mxu1 %v5273_v2  ;;  %v7544_v11 = vld [vmem:[#allocation31_spill] sm:$0xff] }
 0x1fb   :  { %4117 = vmatprep.subr.bf16.mxu0 %v3874_v18  ;;  %v602_v2 = vunpack.c.h.s8.bf16 %v7544_v11  ;;  %v606_v18 = vunpack.c.h.s8.bf16 %v6808_v25  ;;  %v3906_v11 = vunpack.c.l.s8.bf16 %v3750_v50 }
 0x1fd   :  { %3277 = vmatpush1.bf16.msra.mxu1 %v5272_v0  ;;  %v5313_v17 = vcombine.high %v598_v14, %v602_v2  ;;  %v610_v0 = vunpack.c.h.s8.bf16 %v7545_v35  ;;  %v5312_v6 = vcombine.low %v598_v14, %v602_v2  ;;  %v634_v14 = vunpack.c.h.s8.bf16 %v7553_v3  ;;  %v3749_v2 = vld [vmem:[#allocation7 + $0xe0] sm:$0xff] }
 0x1fe   :  { %4118 = vmatpush1.bf16.msra.mxu0 %v3873_v39  ;;  %3278 = vmatprep.subr.bf16.mxu1 %v5281_v48  ;;  %v3894_v39 = vunpack.c.h.s8.bf16 %v3742_v41  ;;  %v3746_v48 = vld [vmem:[#allocation7 + $0xc8] sm:$0xff]  ;;  %v3901_v41 = vunpack.c.h.s8.bf16 %v3745_v43  ;;  %v3905_v38 = vunpack.c.l.s8.bf16 %v3749_v2 }
 0x1ff   :  { %4119 = vmatprep.subr.bf16.mxu0 %v3878_v20  ;;  %v5321_v29 = vcombine.high %v606_v18, %v610_v0  ;;  %v7546_v20 = vld [vmem:[#allocation38_spill] sm:$0xff]  ;;  %v5320_v25 = vcombine.low %v606_v18, %v610_v0  ;;  %v3902_v63 = vunpack.c.h.s8.bf16 %v3746_v48  ;;  %v7555_v18 = vld [vmem:[#allocation55_spill] sm:$0xff]  ;;  %v3910_v0 = vunpack.c.h.s8.bf16 %v3750_v50 }
 0x200   :  { %v614_v19 = vunpack.c.h.s8.bf16 %v7546_v20  ;;  %v642_v35 = vunpack.c.h.s8.bf16 %v7555_v18  ;;  %v662_v50 = vunpack.c.h.s8.bf16 %v6877_v55  ;;  %v3762_v55 = vld [vmem:[#allocation7 + $0x148] sm:$0xff]  ;;  %v678_v18 = vunpack.c.h.s8.bf16 %v6893_v5 }
 0x201   :  { %3279 = vmatpush1.bf16.msra.mxu1 %v5280_v8  ;;  %v7547_v8 = vld [vmem:[#allocation34_spill] sm:$0xff]  ;;  %v3766_v5 = vld [vmem:[#allocation7 + $0x168] sm:$0xff] }
 0x202   :  { %4120 = vmatpush1.bf16.msra.mxu0 %v3877_v47  ;;  %3280 = vmatprep.subr.bf16.mxu1 %v5289_v61  ;;  %v618_v47 = vunpack.c.h.s8.bf16 %v7547_v8  ;;  %v3898_v61 = vunpack.c.l.s8.bf16 %v3746_v48 }
 0x203   :  { %4121 = vmatprep.subr.bf16.mxu0 %v3882_v28  ;;  %v3897_v28 = vunpack.c.l.s8.bf16 %v3745_v43 }
 0x204   :  { %v5329_v37 = vcombine.high %v614_v19, %v618_v47 }
 0x205   :  { %3281 = vmatpush1.bf16.msra.mxu1 %v5288_v53  ;;  %v7550_v53 = vld [vmem:[#allocation39_spill] sm:$0xff] }
 0x206   :  { %4122 = vmatpush1.bf16.msra.mxu0 %v3881_v15  ;;  %3282 = vmatprep.subr.bf16.mxu1 %v5297_v49  ;;  %v622_v15 = vunpack.c.h.s8.bf16 %v7550_v53  ;;  %v7551_v49 = vld [vmem:[#allocation40_spill] sm:$0xff] }
 0x207   :  { %4123 = vmatprep.subr.bf16.mxu0 %v3886_v31  ;;  %v626_v21 = vunpack.c.h.s8.bf16 %v7551_v49  ;;  %v5328_v31 = vcombine.low %v614_v19, %v618_v47  ;;  %v7557_v19 = vld [vmem:[#allocation43_spill] sm:$0xff]  ;;  %v3758_v49 = vld [vmem:[#allocation7 + $0x128] sm:$0xff] }
 0x208   :  { %v650_v8 = vunpack.c.h.s8.bf16 %v7557_v19 }
 0x209   :  { %3283 = vmatpush1.bf16.msra.mxu1 %v5296_v62  ;;  %v5337_v62 = vcombine.high %v622_v15, %v626_v21 }
 0x20a   :  { %4124 = vmatpush1.bf16.msra.mxu0 %v3885_v42  ;;  %3284 = vmatprep.subr.bf16.mxu1 %v5305_v59  ;;  %v7552_v42 = vld [vmem:[#allocation53_spill] sm:$0xff] }
 0x20b   :  { %4125 = vmatprep.subr.bf16.mxu0 %v3890_v60  ;;  %v630_v59 = vunpack.c.h.s8.bf16 %v7552_v42  ;;  %v5336_v60 = vcombine.low %v622_v15, %v626_v21  ;;  %v3922_v42 = vunpack.c.l.s8.bf16 %v3758_v49 }
 0x20d   :  { %3285 = vmatpush1.bf16.msra.mxu1 %v5304_v58  ;;  %v5345_v58 = vcombine.high %v630_v59, %v634_v14  ;;  %v5344_v48 = vcombine.low %v630_v59, %v634_v14  ;;  %v3757_v59 = vld [vmem:[#allocation7 + $0x120] sm:$0xff] }
 0x20e   :  { %4126 = vmatpush1.bf16.msra.mxu0 %v3889_v26  ;;  %3297 = vmatprep.subr.bf16.mxu1 %v5313_v17  ;;  %v7554_v26 = vld [vmem:[#allocation41_spill] sm:$0xff] }
 0x20f   :  { %4127 = vmatprep.subr.bf16.mxu0 %v3894_v39  ;;  %v638_v17 = vunpack.c.h.s8.bf16 %v7554_v26  ;;  %v3754_v39 = vld [vmem:[#allocation7 + $0x108] sm:$0xff] }
 0x210   :  { %3287 = vmatmul.mubr.bf16.vlgmr.msra.gmra.mrb[8].mxu1 %v7548_v54  ;;  %v3914_v47 = vunpack.c.l.s8.bf16 %v3754_v39  ;;  %v3918_v15 = vunpack.c.h.s8.bf16 %v3754_v39  ;;  %v3930_v39 = vunpack.c.l.s8.bf16 %v3762_v55 }
 0x211   :  { %3298 = vmatpush1.bf16.msra.mxu1 %v5312_v6  ;;  %3329 = vmatprep.mubr.bf16.mxu1 %v7549_v13  ;;  %v3909_v6 = vunpack.c.h.s8.bf16 %v3749_v2  ;;  %v5352_v43 = vcombine.low %v638_v17, %v642_v35  ;;  %v7561_v2 = vld [vmem:[#allocation47_spill] sm:$0xff] }
 0x212   :  { %4128 = vmatpush1.bf16.msra.mxu0 %v3893_v52  ;;  %3299 = vmatprep.subr.bf16.mxu1 %v5321_v29  ;;  %v5353_v52 = vcombine.high %v638_v17, %v642_v35  ;;  %v7556_v29 = vld [vmem:[#allocation42_spill] sm:$0xff]  ;;  %v682_v35 = vunpack.c.h.s8.bf16 %v6895_v4 }
 0x213   :  { %4129 = vmatprep.subr.bf16.mxu0 %v3898_v61  ;;  %v646_v20 = vunpack.c.h.s8.bf16 %v7556_v29  ;;  %v3753_v61 = vld [vmem:[#allocation7 + $0x100] sm:$0xff]  ;;  %v7562_v29 = vld [vmem:[#allocation17_spill] sm:$0xff] }
 0x214   :  { %v3913_v53 = vunpack.c.l.s8.bf16 %v3753_v61  ;;  %v5392_v4 = vcombine.low %v678_v18, %v682_v35 }
 0x215   :  { %3300 = vmatpush1.bf16.msra.mxu1 %v5320_v25  ;;  %v5361_v54 = vcombine.high %v646_v20, %v650_v8  ;;  %v7558_v25 = vld [vmem:[#allocation44_spill] sm:$0xff]  ;;  %v5360_v21 = vcombine.low %v646_v20, %v650_v8  ;;  %v690_v20 = vunpack.c.h.s8.bf16 %v7562_v29  ;;  %v3934_v8 = vunpack.c.h.s8.bf16 %v3762_v55  ;;  %v3538_v29 = vld [vmem:[#allocation10 + $0x38] sm:$0x3] }
 0x216   :  { %4130 = vmatpush1.bf16.msra.mxu0 %v3897_v28  ;;  %3301 = vmatprep.subr.bf16.mxu1 %v5329_v37  ;;  %v654_v13 = vunpack.c.h.s8.bf16 %v7558_v25  ;;  %v7559_v28 = vld [vmem:[#allocation45_spill] sm:$0xff] }
 0x217   :  { %4131 = vmatprep.subr.bf16.mxu0 %v3902_v63  ;;  %v658_v37 = vunpack.c.h.s8.bf16 %v7559_v28 }
 0x219   :  { %3302 = vmatpush1.bf16.msra.mxu1 %v5328_v31  ;;  %v5369_v63 = vcombine.high %v654_v13, %v658_v37  ;;  %v7560_v31 = vld [vmem:[#allocation46_spill] sm:$0xff]  ;;  %v5368_v3 = vcombine.low %v654_v13, %v658_v37  ;;  %v3938_v13 = vunpack.c.l.s8.bf16 %v3766_v5 }
 0x21a   :  { %4132 = vmatpush1.bf16.msra.mxu0 %v3901_v41  ;;  %3303 = vmatprep.subr.bf16.mxu1 %v5337_v62  ;;  %v666_v41 = vunpack.c.h.s8.bf16 %v7560_v31  ;;  %v3917_v62 = vunpack.c.h.s8.bf16 %v3753_v61  ;;  %v694_v61 = vunpack.c.h.s8.bf16 %v6909_v30  ;;  %v3770_v30 = vld [vmem:[#allocation7 + $0x188] sm:$0xff] }
 0x21b   :  { %4133 = vmatprep.subr.bf16.mxu0 %v3906_v11  ;;  %v670_v11 = vunpack.c.h.s8.bf16 %v6885_v46  ;;  %v3761_v46 = vld [vmem:[#allocation7 + $0x140] sm:$0xff] }
 0x21c   :  { %v5377_v14 = vcombine.high %v662_v50, %v666_v41  ;;  %v5376_v26 = vcombine.low %v662_v50, %v666_v41  ;;  %v3929_v19 = vunpack.c.l.s8.bf16 %v3761_v46  ;;  %v3933_v25 = vunpack.c.h.s8.bf16 %v3761_v46 }
 0x21d   :  { %3304 = vmatpush1.bf16.msra.mxu1 %v5336_v60  ;;  %v674_v60 = vunpack.c.h.s8.bf16 %v7561_v2  ;;  %v3942_v50 = vunpack.c.h.s8.bf16 %v3766_v5 }
 0x21e   :  { %4134 = vmatpush1.bf16.msra.mxu0 %v3905_v38  ;;  %3305 = vmatprep.subr.bf16.mxu1 %v5345_v58  ;;  %v3921_v38 = vunpack.c.l.s8.bf16 %v3757_v59  ;;  %v3926_v58 = vunpack.c.h.s8.bf16 %v3758_v49  ;;  %v7565_v49 = vld [vmem:[#allocation51_spill] sm:$0xff] }
 0x21f   :  { %4135 = vmatprep.subr.bf16.mxu0 %v3910_v0  ;;  %v5385_v17 = vcombine.high %v670_v11, %v674_v60  ;;  %v3925_v0 = vunpack.c.h.s8.bf16 %v3757_v59 }
 0x221   :  { %3306 = vmatpush1.bf16.msra.mxu1 %v5344_v48  ;;  %v5384_v48 = vcombine.low %v670_v11, %v674_v60  ;;  %v3769_v11 = vld [vmem:[#allocation7 + $0x180] sm:$0xff] }
 0x222   :  { %4136 = vmatpush1.bf16.msra.mxu0 %v3909_v6  ;;  %3307 = vmatprep.subr.bf16.mxu1 %v5353_v52  ;;  %v5393_v6 = vcombine.high %v678_v18, %v682_v35  ;;  %v686_v52 = vunpack.c.h.s8.bf16 %v6901_v10  ;;  %v3765_v10 = vld [vmem:[#allocation7 + $0x160] sm:$0xff]  ;;  %v3945_v55 = vunpack.c.l.s8.bf16 %v3769_v11  ;;  %v726_v35 = vunpack.c.h.s8.bf16 %v6941_v9 }
 0x223   :  { %4148 = vmatprep.subr.bf16.mxu0 %v3914_v47 }
 0x224   :  { %v5401_v47 = vcombine.high %v686_v52, %v690_v20  ;;  %v5400_v28 = vcombine.low %v686_v52, %v690_v20  ;;  %v3534_v52 = vld [vmem:[#allocation10 + $0x18] sm:$0xff] }
 0x225   :  { %4138 = vmatmul.mubr.bf16.vlgmr.msra.gmra.mrb[12].mxu0 %v7017_v56  ;;  %3308 = vmatpush1.bf16.msra.mxu1 %v5352_v43  ;;  %v7563_v43 = vld [vmem:[#allocation28_spill] sm:$0xff] }
 0x226   :  { %3309 = vmatprep.subr.bf16.mxu1 %v5361_v54  ;;  %4149 = vmatpush1.bf16.msra.mxu0 %v3913_v53  ;;  %v698_v54 = vunpack.c.h.s8.bf16 %v7563_v43  ;;  %v7564_v53 = vld [vmem:[#allocation50_spill] sm:$0xff]  ;;  %v3782_v43 = vld [vmem:[#allocation7 + $0x1e8] sm:$0xff] }
 0x227   :  { %4150 = vmatprep.subr.bf16.mxu0 %v3918_v15  ;;  %v702_v15 = vunpack.c.h.s8.bf16 %v7564_v53 }
 0x228   :  { %v5409_v37 = vcombine.high %v694_v61, %v698_v54  ;;  %v5408_v31 = vcombine.low %v694_v61, %v698_v54  ;;  %v3533_v54 = vld [vmem:[#allocation10 + $0x10] sm:$0xff] }
 0x229   :  { %3310 = vmatpush1.bf16.msra.mxu1 %v5360_v21  ;;  %v706_v21 = vunpack.c.h.s8.bf16 %v7565_v49  ;;  %v7076_v49 = vsub.s32 2, %v6969_v45 }
 0x22a   :  { %3311 = vmatprep.subr.bf16.mxu1 %v5369_v63  ;;  %4151 = vmatpush1.bf16.msra.mxu0 %v3917_v62  ;;  %v3937_v63 = vunpack.c.l.s8.bf16 %v3765_v10  ;;  %v710_v62 = vunpack.c.h.s8.bf16 %v6925_v33  ;;  %v3774_v33 = vld [vmem:[#allocation7 + $0x1a8] sm:$0xff] }
 0x22b   :  { %4152 = vmatprep.subr.bf16.mxu0 %v3922_v42  ;;  %v5417_v41 = vcombine.high %v702_v15, %v706_v21  ;;  %v7566_v42 = vld [vmem:[#allocation52_spill] sm:$0xff]  ;;  %v5416_v2 = vcombine.low %v702_v15, %v706_v21  ;;  %v3954_v46 = vunpack.c.l.s8.bf16 %v3774_v33  ;;  %v3958_v20 = vunpack.c.h.s8.bf16 %v3774_v33 }
 0x22c   :  { %v714_v59 = vunpack.c.h.s8.bf16 %v7566_v42  ;;  %v3974_v15 = vunpack.c.h.s8.bf16 %v3782_v43  ;;  %v7078_v21 = vld [vmem:[#allocation7 + $0x208] sm:$0xff] }
 0x22d   :  { %3312 = vmatpush1.bf16.msra.mxu1 %v5368_v3  ;;  %v3941_v3 = vunpack.c.h.s8.bf16 %v3765_v10  ;;  %v3724_v10 = vld [vmem:[#allocation7 + $0x18] sm:$0xff] }
 0x22e   :  { %3313 = vmatprep.subr.bf16.mxu1 %v5377_v14  ;;  %4153 = vmatpush1.bf16.msra.mxu0 %v3921_v38  ;;  %v3946_v14 = vunpack.c.l.s8.bf16 %v3770_v30  ;;  %v5425_v60 = vcombine.high %v710_v62, %v714_v59  ;;  %v718_v38 = vunpack.c.h.s8.bf16 %v6933_v51  ;;  %v3773_v51 = vld [vmem:[#allocation7 + $0x1a0] sm:$0xff]  ;;  %v3852_v53 = vunpack.c.l.s8.bf16 %v3724_v10 }
 0x22f   :  { %4154 = vmatprep.subr.bf16.mxu0 %v3926_v58  ;;  %v722_v58 = vunpack.c.h.s8.bf16 %v6935_v32  ;;  %v3856_v42 = vunpack.c.h.s8.bf16 %v3724_v10  ;;  %v3789_v10 = vld [vmem:[#allocation7 + $0x220] sm:$0xff] }
 0x231   :  { %3314 = vmatpush1.bf16.msra.mxu1 %v5376_v26  ;;  %v3950_v26 = vunpack.c.h.s8.bf16 %v3770_v30  ;;  %v5433_v18 = vcombine.high %v718_v38, %v722_v58  ;;  %v5432_v32 = vcombine.low %v718_v38, %v722_v58 }
 0x232   :  { %3315 = vmatprep.subr.bf16.mxu1 %v5385_v17  ;;  %4155 = vmatpush1.bf16.msra.mxu0 %v3925_v0  ;;  %v5424_v17 = vcombine.low %v710_v62, %v714_v59  ;;  %v730_v0 = vunpack.c.h.s8.bf16 %v6943_v27  ;;  %v5463_v27 = vpack.c.bf16 %v3538_v29, %v3534_v52  ;;  %v3454_v62 = vrot.slane %v6986_v23, %v7076_v49  ;;  %v3785_v29 = vld [vmem:[#allocation7 + $0x200] sm:$0xff] }
 0x233   :  { %4156 = vmatprep.subr.bf16.mxu0 %v3930_v39  ;;  %v3949_v39 = vunpack.c.h.s8.bf16 %v3769_v11 }
 0x234   :  { %v5440_v9 = vcombine.low %v726_v35, %v730_v0 }
 0x235   :  { %3316 = vmatpush1.bf16.msra.mxu1 %v5384_v48  ;;  %v5441_v48 = vcombine.high %v726_v35, %v730_v0 }
 0x236   :  { %3317 = vmatprep.subr.bf16.mxu1 %v5393_v6  ;;  %4157 = vmatpush1.bf16.msra.mxu0 %v3929_v19  ;;  %v3953_v6 = vunpack.c.l.s8.bf16 %v3773_v51  ;;  %v3778_v19 = vld [vmem:[#allocation7 + $0x1c8] sm:$0xff] }
 0x237   :  { %4158 = vmatprep.subr.bf16.mxu0 %v3934_v8  ;;  %v3957_v8 = vunpack.c.h.s8.bf16 %v3773_v51  ;;  %v3962_v5 = vunpack.c.l.s8.bf16 %v3778_v19  ;;  %v3966_v61 = vunpack.c.h.s8.bf16 %v3778_v19 }
 0x239   :  { %3318 = vmatpush1.bf16.msra.mxu1 %v5392_v4  ;;  %v3777_v4 = vld [vmem:[#allocation7 + $0x1c0] sm:$0xff] }
 0x23a   :  { %3319 = vmatprep.subr.bf16.mxu1 %v5401_v47  ;;  %4159 = vmatpush1.bf16.msra.mxu0 %v3933_v25  ;;  %v3961_v47 = vunpack.c.l.s8.bf16 %v3777_v4  ;;  %v3537_v25 = vld [vmem:[#allocation10 + $0x30] sm:$0x3] }
 0x23b   :  { %4160 = vmatprep.subr.bf16.mxu0 %v3938_v13  ;;  %v3965_v13 = vunpack.c.h.s8.bf16 %v3777_v4  ;;  %v3982_v4 = vunpack.c.h.s8.bf16 %v7078_v21 }
 0x23d   :  { %3320 = vmatpush1.bf16.msra.mxu1 %v5400_v28  ;;  %v3970_v28 = vunpack.c.l.s8.bf16 %v3782_v43 }
 0x23e   :  { %3321 = vmatprep.subr.bf16.mxu1 %v5409_v37  ;;  %4161 = vmatpush1.bf16.msra.mxu0 %v3937_v63  ;;  %v3781_v37 = vld [vmem:[#allocation7 + $0x1e0] sm:$0xff]  ;;  %v7084_v63 = vsub.s32 3, %v6969_v45 }
 0x23f   :  { %4162 = vmatprep.subr.bf16.mxu0 %v3942_v50  ;;  %v3723_v50 = vld [vmem:[#allocation7 + $0x10] sm:$0xff]  ;;  %v3973_v30 = vunpack.c.h.s8.bf16 %v3781_v37 }
 0x240   :  { %v3400_v16 = vrot.slane %v6981_v36, %v7084_v63 }
 0x241   :  { %3322 = vmatpush1.bf16.msra.mxu1 %v5408_v31  ;;  %v3396_v31 = vrot.slane %v6981_v36, %v7076_v49  ;;  %v3855_v36 = vunpack.c.h.s8.bf16 %v3723_v50 }
 0x242   :  { %3323 = vmatprep.subr.bf16.mxu1 %v5417_v41  ;;  %4163 = vmatpush1.bf16.msra.mxu0 %v3941_v3  ;;  %v3851_v41 = vunpack.c.l.s8.bf16 %v3723_v50  ;;  %v3458_v3 = vrot.slane %v6986_v23, %v7084_v63 }
 0x243   :  { %4164 = vmatprep.subr.bf16.mxu0 %v3946_v14  ;;  %v3728_v14 = vld [vmem:[#allocation7 + $0x38] sm:$0xff] }
 0x244   :  { %v3860_v33 = vunpack.c.l.s8.bf16 %v3728_v14  ;;  %v3864_v51 = vunpack.c.h.s8.bf16 %v3728_v14 }
 0x245   :  { %3324 = vmatpush1.bf16.msra.mxu1 %v5416_v2 }
 0x246   :  { %3325 = vmatprep.subr.bf16.mxu1 %v5425_v60  ;;  %4165 = vmatpush1.bf16.msra.mxu0 %v3945_v55 }
 0x247   :  { %4166 = vmatprep.subr.bf16.mxu0 %v3950_v26 }
 0x249   :  { %3326 = vmatpush1.bf16.msra.mxu1 %v5424_v17  ;;  %v3727_v17 = vld [vmem:[#allocation7 + $0x30] sm:$0xff] }
 0x24a   :  { %3327 = vmatprep.subr.bf16.mxu1 %v5433_v18  ;;  %4167 = vmatpush1.bf16.msra.mxu0 %v3949_v39 }
 0x24b   :  { %4168 = vmatprep.subr.bf16.mxu0 %v3954_v46 }
 0x24d   :  { %3328 = vmatpush1.bf16.msra.mxu1 %v5432_v32 }
 0x24e   :  { %3340 = vmatprep.subr.bf16.mxu1 %v5441_v48  ;;  %4169 = vmatpush1.bf16.msra.mxu0 %v3953_v6  ;;  %v3732_v48 = vld [vmem:[#allocation7 + $0x58] sm:$0xff] }
 0x24f   :  { %4170 = vmatprep.subr.bf16.mxu0 %v3958_v20  ;;  %v3872_v43 = vunpack.c.h.s8.bf16 %v3732_v48 }
 0x250   :  { %3330 = vmatmul.mubr.bf16.vlgmr.msra.gmra.mrb[8].mxu1 %v6529_v40  ;;  %v5466_v40 = vpack.c.bf16 %v3537_v25, %v3533_v54  ;;  %v3736_v54 = vld [vmem:[#allocation7 + $0x78] sm:$0xff]  ;;  %v3981_v25 = vunpack.c.h.s8.bf16 %v3785_v29 }
 0x251   :  { %3341 = vmatpush1.bf16.msra.mxu1 %v5440_v9  ;;  %3372 = vmatprep.mubr.bf16.mxu1 %v7493_v34  ;;  %v3969_v34 = vunpack.c.l.s8.bf16 %v3781_v37  ;;  %v3863_v9 = vunpack.c.h.s8.bf16 %v3727_v17  ;;  %v3876_v37 = vunpack.c.l.s8.bf16 %v3736_v54  ;;  %v3880_v50 = vunpack.c.h.s8.bf16 %v3736_v54 }
 0x252   :  { %5465 = vmatprep.subr.msk.bf16.mxu1 %vm6954_vm3, %v5463_v27  ;;  %4171 = vmatpush1.bf16.msra.mxu0 %v3957_v8  ;;  %v3731_v8 = vld [vmem:[#allocation7 + $0x50] sm:$0xff] }
 0x253   :  { %4172 = vmatprep.subr.bf16.mxu0 %v3962_v5 }
 0x256   :  { %4173 = vmatpush1.bf16.msra.mxu0 %v3961_v47  ;;  %v3867_v47 = vunpack.c.l.s8.bf16 %v3731_v8 }
 0x257   :  { %4174 = vmatprep.subr.bf16.mxu0 %v3966_v61  ;;  %v3790_v61 = vld [vmem:[#allocation7 + $0x228] sm:$0xff] }
 0x25a   :  { %4175 = vmatpush1.bf16.msra.mxu0 %v3965_v13  ;;  %v3986_v13 = vunpack.c.l.s8.bf16 %v3790_v61 }
 0x25b   :  { %4176 = vmatprep.subr.bf16.mxu0 %v3970_v28  ;;  %v3871_v28 = vunpack.c.h.s8.bf16 %v3731_v8 }
 0x25c   :  { %5445 = vmatmul.mubr.msk.bf16.vlgmr.msra.gmra.mrb[8].mxu1 %vm2691_vm0, %v6553_v24  ;;  %v3978_v24 = vunpack.c.l.s8.bf16 %v7078_v21  ;;  %v3794_v21 = vld [vmem:[#allocation7 + $0x248] sm:$0xff] }
 0x25d   :  { %5468 = vmatpush1.bf16.msk.msra.mxu1 %vm6954_vm3, %v5466_v40  ;;  %3700 = vmatprep.mubr.f32.mxu1 %v5764_v7  ;;  %v3735_v40 = vld [vmem:[#allocation7 + $0x70] sm:$0xff] }
 0x25e   :  { %4277 = vmatprep.subr.bf16.mxu1 %v3852_v53  ;;  %4177 = vmatpush1.bf16.msra.mxu0 %v3969_v34  ;;  %v3985_v53 = vunpack.c.l.s8.bf16 %v3789_v10  ;;  %v3990_v34 = vunpack.c.h.s8.bf16 %v3790_v61  ;;  %v3751_v61 = vld [vmem:[#allocation7 + $0xf0] sm:$0xff] }
 0x25f   :  { %4178 = vmatprep.subr.bf16.mxu0 %v3974_v15  ;;  %v3875_v15 = vunpack.c.l.s8.bf16 %v3735_v40 }
 0x262   :  { %4179 = vmatpush1.bf16.msra.mxu0 %v3973_v30  ;;  %v3740_v30 = vld [vmem:[#allocation7 + $0x98] sm:$0xff] }
 0x263   :  { %v3030_v59 = vpop.f32.mrb[4].mxu1  ;;  %4191 = vmatprep.subr.bf16.mxu0 %v3978_v24  ;;  %v3989_v24 = vunpack.c.h.s8.bf16 %v3789_v10 }
 0x264   :  { %v3427_v11 = vmul.f32 %v3396_v31, %v3030_v59  ;;  %5452 = vmatmul.mubr.msk.f32.vlgmr.msra.gmra.mrb[12].mxu1 %vm3539_vm4, %v6988_v1  ;;  %v3032_v2 = vpop.f32.mrb[5].mxu1 }
 0x265   :  { %4278 = vmatpush1.bf16.msra.mxu1 %v3851_v41  ;;  %v3428_v60 = vmul.f32 %v3400_v16, %v3032_v2  ;;  %v3034_v38 = vpop.f32.mrb[6].mxu1  ;;  %3706 = vmatprep.mubr.f32.mxu1 %v5764_v7  ;;  %v3859_v7 = vunpack.c.l.s8.bf16 %v3727_v17  ;;  %v3793_v41 = vld [vmem:[#allocation7 + $0x240] sm:$0xff]  ;;  %v3888_v2 = vunpack.c.h.s8.bf16 %v3740_v30 }
 0x266   :  { %v3485_v58 = vadd.f32 %v3454_v62, %v3427_v11  ;;  %v3435_v55 = vmul.f32 %v3396_v31, %v3034_v38  ;;  %v3036_v26 = vpop.f32.mrb[7].mxu1  ;;  %4279 = vmatprep.subr.bf16.mxu1 %v3856_v42  ;;  %v3994_v31 = vunpack.c.l.s8.bf16 %v3794_v21  ;;  %v3739_v42 = vld [vmem:[#allocation7 + $0x90] sm:$0xff]  ;;  %v3993_v59 = vunpack.c.l.s8.bf16 %v3793_v41  ;;  %v3798_v11 = vld [vmem:[#allocation7 + $0x268] sm:$0xff] }
 0x267   :  { %v3486_v23 = vadd.f32 %v3458_v3, %v3428_v60  ;;  %v3436_v18 = vmul.f32 %v3400_v16, %v3036_v26  ;;  %v3879_v16 = vunpack.c.h.s8.bf16 %v3735_v40  ;;  %v3883_v14 = vunpack.c.l.s8.bf16 %v3739_v42  ;;  %v3744_v60 = vld [vmem:[#allocation7 + $0xb8] sm:$0xff] }
 0x268   :  { %v3501_v35 = vmul.f32 0.2, %v3485_v58  ;;  %v3493_v0 = vadd.f32 %v3454_v62, %v3435_v55  ;;  %5453 = vmatmul.mubr.msk.f32.gmra.mrb[14].mxu1 %vm3539_vm4, %v7006_v12  ;;  %v3868_v12 = vunpack.c.l.s8.bf16 %v3732_v48  ;;  %v3884_v62 = vunpack.c.l.s8.bf16 %v3740_v30  ;;  %v3747_v48 = vld [vmem:[#allocation7 + $0xd0] sm:$0xff] }
 0x269   :  { %v3502_v1 = vmul.f32 0.2, %v3486_v23  ;;  %v3494_v39 = vadd.f32 %v3458_v3, %v3436_v18  ;;  %4280 = vmatpush1.bf16.msra.mxu1 %v3855_v36  ;;  %4309 = vmatprep.mubr.bf16.mxu1 %v7019_v44  ;;  %v3977_v44 = vunpack.c.l.s8.bf16 %v3785_v29  ;;  %v3998_v3 = vunpack.c.h.s8.bf16 %v3794_v21  ;;  %v3755_v21 = vld [vmem:[#allocation7 + $0x110] sm:$0xff] }
 0x26a   :  { %v3509_v46 = vmul.f32 0.2, %v3493_v0  ;;  %4281 = vmatprep.subr.bf16.mxu1 %v3860_v33  ;;  %v3517_v6 = vmax.f32 %v3485_v58, %v3501_v35  ;;  %v3997_v38 = vunpack.c.h.s8.bf16 %v3793_v41  ;;  %v4002_v36 = vunpack.c.l.s8.bf16 %v3798_v11  ;;  %v3797_v58 = vld [vmem:[#allocation7 + $0x260] sm:$0xff]  ;;  %v3743_v33 = vld [vmem:[#allocation7 + $0xb0] sm:$0xff]  ;;  %v3802_v35 = vld [vmem:[#allocation7 + $0x288] sm:$0xff] }
 0x26b   :  { %v3510_v32 = vmul.f32 0.2, %v3494_v39  ;;  %v3518_v20 = vmax.f32 %v3486_v23, %v3502_v1  ;;  %v3887_v55 = vunpack.c.h.s8.bf16 %v3739_v42  ;;  %v3892_v26 = vunpack.c.l.s8.bf16 %v3744_v60  ;;  %v3748_v1 = vld [vmem:[#allocation7 + $0xd8] sm:$0xff] }
 0x26c   :  { %v3525_v52 = vmax.f32 %v3493_v0, %v3509_v46  ;;  %v4001_v17 = vunpack.c.l.s8.bf16 %v3797_v58  ;;  %v4006_v23 = vunpack.c.h.s8.bf16 %v3798_v11  ;;  %v3891_v18 = vunpack.c.l.s8.bf16 %v3743_v33  ;;  %v3801_v46 = vld [vmem:[#allocation7 + $0x280] sm:$0xff]  ;;  %v3759_v11 = vld [vmem:[#allocation7 + $0x130] sm:$0xff] }
 0x26d   :  { %v3526_v19 = vmax.f32 %v3494_v39, %v3510_v32  ;;  %4282 = vmatpush1.bf16.msra.mxu1 %v3859_v7  ;;  %v3896_v0 = vunpack.c.h.s8.bf16 %v3744_v60  ;;  %v4005_v39 = vunpack.c.h.s8.bf16 %v3797_v58  ;;  %v4010_v7 = vunpack.c.l.s8.bf16 %v3802_v35  ;;  %v7111_v58 = vld [vmem:[#allocation7 + $0x308] sm:$0xff] }
 0x26e   :  { %v7101_v27 = vpack.c.bf16 %v3525_v52, %v3517_v6  ;;  %4283 = vmatprep.subr.bf16.mxu1 %v3864_v51  ;;  %v3895_v51 = vunpack.c.h.s8.bf16 %v3743_v33  ;;  %v3900_v32 = vunpack.c.l.s8.bf16 %v3748_v1  ;;  %v4009_v6 = vunpack.c.l.s8.bf16 %v3801_v46 }
 0x26f   :  { %v7103_v5 = vpack.c.bf16 %v3526_v19, %v3518_v20  ;;  %v4014_v52 = vunpack.c.h.s8.bf16 %v3802_v35  ;;  %v3899_v29 = vunpack.c.l.s8.bf16 %v3747_v48  ;;  %v3806_v20 = vld [vmem:[#allocation7 + $0x2a8] sm:$0xff]  ;;  %v3904_v19 = vunpack.c.h.s8.bf16 %v3748_v1  ;;  %v3763_v1 = vld [vmem:[#allocation7 + $0x150] sm:$0xff] }
 0x270   :  { %v4018_v8 = vunpack.c.l.s8.bf16 %v3806_v20  ;;  %v4022_v54 = vunpack.c.h.s8.bf16 %v3806_v20  ;;  %v4042_v33 = vunpack.c.l.s8.bf16 %v7111_v58 }
 0x271   :  { %4284 = vmatpush1.bf16.msra.mxu1 %v3863_v9  ;;  %4180 = vmatprep.mubr.bf16.mxu0 %v7103_v5  ;;  %v3752_v9 = vld [vmem:[#allocation7 + $0xf8] sm:$0xff] }
 0x272   :  { %4181 = vmatmul.mubr.bf16.vlgmr.msra.gmra.mrb[12].mxu0 %v7101_v27  ;;  %4285 = vmatprep.subr.bf16.mxu1 %v3868_v12  ;;  %v4013_v12 = vunpack.c.h.s8.bf16 %v3801_v46  ;;  %v3912_v10 = vunpack.c.h.s8.bf16 %v3752_v9 }
 0x273   :  { %4192 = vmatpush1.bf16.msra.mxu0 %v3977_v44  ;;  %v3805_v44 = vld [vmem:[#allocation7 + $0x2a0] sm:$0xff] }
 0x274   :  { %4193 = vmatprep.subr.bf16.mxu0 %v3982_v4  ;;  %v3903_v4 = vunpack.c.h.s8.bf16 %v3747_v48 }
 0x275   :  { %4286 = vmatpush1.bf16.msra.mxu1 %v3867_v47  ;;  %v3908_v47 = vunpack.c.l.s8.bf16 %v3752_v9 }
 0x276   :  { %4287 = vmatprep.subr.bf16.mxu1 %v3872_v43  ;;  %v4017_v43 = vunpack.c.l.s8.bf16 %v3805_v44 }
 0x277   :  { %4194 = vmatpush1.bf16.msra.mxu0 %v3981_v25  ;;  %v3907_v25 = vunpack.c.l.s8.bf16 %v3751_v61 }
 0x278   :  { %4195 = vmatprep.subr.bf16.mxu0 %v3986_v13  ;;  %v3810_v13 = vld [vmem:[#allocation7 + $0x2c8] sm:$0xff] }
 0x279   :  { %4288 = vmatpush1.bf16.msra.mxu1 %v3871_v28  ;;  %v3756_v28 = vld [vmem:[#allocation7 + $0x118] sm:$0xff]  ;;  %v4026_v40 = vunpack.c.l.s8.bf16 %v3810_v13  ;;  %v4030_v30 = vunpack.c.h.s8.bf16 %v3810_v13 }
 0x27a   :  { %4289 = vmatprep.subr.bf16.mxu1 %v3876_v37  ;;  %v4021_v37 = vunpack.c.h.s8.bf16 %v3805_v44  ;;  %v3920_v41 = vunpack.c.h.s8.bf16 %v3756_v28 }
 0x27b   :  { %4196 = vmatpush1.bf16.msra.mxu0 %v3985_v53  ;;  %v3809_v53 = vld [vmem:[#allocation7 + $0x2c0] sm:$0xff] }
 0x27c   :  { %4197 = vmatprep.subr.bf16.mxu0 %v3990_v34  ;;  %v3911_v34 = vunpack.c.h.s8.bf16 %v3751_v61 }
 0x27d   :  { %4290 = vmatpush1.bf16.msra.mxu1 %v3875_v15  ;;  %v3916_v15 = vunpack.c.l.s8.bf16 %v3756_v28 }
 0x27e   :  { %4291 = vmatprep.subr.bf16.mxu1 %v3880_v50  ;;  %v4025_v50 = vunpack.c.l.s8.bf16 %v3809_v53 }
 0x27f   :  { %4198 = vmatpush1.bf16.msra.mxu0 %v3989_v24  ;;  %v3915_v24 = vunpack.c.l.s8.bf16 %v3755_v21 }
 0x280   :  { %4199 = vmatprep.subr.bf16.mxu0 %v3994_v31  ;;  %v3814_v31 = vld [vmem:[#allocation7 + $0x2e8] sm:$0xff] }
 0x281   :  { %4292 = vmatpush1.bf16.msra.mxu1 %v3879_v16  ;;  %v3760_v16 = vld [vmem:[#allocation7 + $0x138] sm:$0xff]  ;;  %v4034_v42 = vunpack.c.l.s8.bf16 %v3814_v31  ;;  %v4038_v60 = vunpack.c.h.s8.bf16 %v3814_v31 }
 0x282   :  { %4293 = vmatprep.subr.bf16.mxu1 %v3884_v62  ;;  %v4029_v62 = vunpack.c.h.s8.bf16 %v3809_v53 }
 0x283   :  { %4200 = vmatpush1.bf16.msra.mxu0 %v3993_v59  ;;  %v3813_v59 = vld [vmem:[#allocation7 + $0x2e0] sm:$0xff] }
 0x284   :  { %4201 = vmatprep.subr.bf16.mxu0 %v3998_v3  ;;  %v3919_v3 = vunpack.c.h.s8.bf16 %v3755_v21  ;;  %v3817_v21 = vld [vmem:[#allocation7 + $0x300] sm:$0xff] }
 0x285   :  { %4294 = vmatpush1.bf16.msra.mxu1 %v3883_v14  ;;  %v3924_v14 = vunpack.c.l.s8.bf16 %v3760_v16 }
 0x286   :  { %4295 = vmatprep.subr.bf16.mxu1 %v3888_v2  ;;  %v4033_v2 = vunpack.c.l.s8.bf16 %v3813_v59 }
 0x287   :  { %4202 = vmatpush1.bf16.msra.mxu0 %v3997_v38  ;;  %v3923_v38 = vunpack.c.l.s8.bf16 %v3759_v11 }
 0x288   :  { %4203 = vmatprep.subr.bf16.mxu0 %v4002_v36  ;;  %v3403_v36 = vsub.s32 4, %v6969_v45 }
 0x289   :  { %4296 = vmatpush1.bf16.msra.mxu1 %v3887_v55  ;;  %v3407_v55 = vsub.s32 5, %v6969_v45 }
 0x28a   :  { %4297 = vmatprep.subr.bf16.mxu1 %v3892_v26  ;;  %v3764_v26 = vld [vmem:[#allocation7 + $0x158] sm:$0xff] }
 0x28b   :  { %4204 = vmatpush1.bf16.msra.mxu0 %v4001_v17  ;;  %v7115_v17 = vld [vmem:[#allocation12 + $0x8] sm:$0xff]  ;;  %v3936_v20 = vunpack.c.h.s8.bf16 %v3764_v26 }
 0x28c   :  { %4205 = vmatprep.subr.bf16.mxu0 %v4006_v23  ;;  %v3404_v23 = vrot.slane %v7115_v17, %v3403_v36  ;;  %v3408_v35 = vrot.slane %v7115_v17, %v3407_v55 }
 0x28d   :  { %4298 = vmatpush1.bf16.msra.mxu1 %v3891_v18  ;;  %v3927_v18 = vunpack.c.h.s8.bf16 %v3759_v11  ;;  %v3771_v11 = vld [vmem:[#allocation7 + $0x190] sm:$0xff] }
 0x28e   :  { %4299 = vmatprep.subr.bf16.mxu1 %v3896_v0  ;;  %v3932_v0 = vunpack.c.l.s8.bf16 %v3764_v26  ;;  %v3776_v26 = vld [vmem:[#allocation7 + $0x1b8] sm:$0xff] }
 0x28f   :  { %4206 = vmatpush1.bf16.msra.mxu0 %v4005_v39  ;;  %v7119_v39 = vld [vmem:[#allocation12] sm:$0xff] }
 0x290   :  { %4207 = vmatprep.subr.bf16.mxu0 %v4010_v7  ;;  %v3462_v7 = vrot.slane %v7119_v39, %v3403_v36 }
 0x291   :  { %4300 = vmatpush1.bf16.msra.mxu1 %v3895_v51  ;;  %v3466_v51 = vrot.slane %v7119_v39, %v3407_v55 }
 0x292   :  { %4301 = vmatprep.subr.bf16.mxu1 %v3900_v32 }
 0x293   :  { %4208 = vmatpush1.bf16.msra.mxu0 %v4009_v6  ;;  %v3931_v6 = vunpack.c.l.s8.bf16 %v3763_v1 }
 0x294   :  { %4209 = vmatprep.subr.bf16.mxu0 %v4014_v52 }
 0x295   :  { %4302 = vmatpush1.bf16.msra.mxu1 %v3899_v29 }
 0x296   :  { %4303 = vmatprep.subr.bf16.mxu1 %v3904_v19 }
 0x297   :  { %4210 = vmatpush1.bf16.msra.mxu0 %v4013_v12 }
 0x298   :  { %4211 = vmatprep.subr.bf16.mxu0 %v4018_v8  ;;  %v3768_v8 = vld [vmem:[#allocation7 + $0x178] sm:$0xff] }
 0x299   :  { %4304 = vmatpush1.bf16.msra.mxu1 %v3903_v4  ;;  %v3940_v13 = vunpack.c.l.s8.bf16 %v3768_v8  ;;  %v3944_v31 = vunpack.c.h.s8.bf16 %v3768_v8 }
 0x29a   :  { %4305 = vmatprep.subr.bf16.mxu1 %v3908_v47 }
 0x29b   :  { %4212 = vmatpush1.bf16.msra.mxu0 %v4017_v43  ;;  %v3935_v43 = vunpack.c.h.s8.bf16 %v3763_v1 }
 0x29c   :  { %4213 = vmatprep.subr.bf16.mxu0 %v4022_v54 }
 0x29d   :  { %4306 = vmatpush1.bf16.msra.mxu1 %v3907_v25 }
 0x29e   :  { %4307 = vmatprep.subr.bf16.mxu1 %v3912_v10  ;;  %v3767_v10 = vld [vmem:[#allocation7 + $0x170] sm:$0xff] }
 0x29f   :  { %4214 = vmatpush1.bf16.msra.mxu0 %v4021_v37 }
 0x2a0   :  { %4215 = vmatprep.subr.bf16.mxu0 %v4026_v40 }
 0x2a1   :  { %4308 = vmatpush1.bf16.msra.mxu1 %v3911_v34 }
 0x2a2   :  { %4320 = vmatprep.subr.bf16.mxu1 %v3916_v15  ;;  %v3939_v15 = vunpack.c.l.s8.bf16 %v3767_v10 }
 0x2a3   :  { %4216 = vmatpush1.bf16.msra.mxu0 %v4025_v50 }
 0x2a4   :  { %4310 = vmatmul.mubr.bf16.vlgmr.msra.gmra.mrb[16].mxu1 %v7017_v56  ;;  %4217 = vmatprep.subr.bf16.mxu0 %v4030_v30  ;;  %v3928_v56 = vunpack.c.h.s8.bf16 %v3760_v16  ;;  %v3772_v16 = vld [vmem:[#allocation7 + $0x198] sm:$0xff] }
 0x2a5   :  { %4321 = vmatpush1.bf16.msra.mxu1 %v3915_v24  ;;  %4352 = vmatprep.mubr.bf16.mxu1 %v7103_v5  ;;  %v4037_v5 = vunpack.c.h.s8.bf16 %v3813_v59  ;;  %v3943_v59 = vunpack.c.h.s8.bf16 %v3767_v10  ;;  %v3952_v55 = vunpack.c.h.s8.bf16 %v3772_v16 }
 0x2a6   :  { %4322 = vmatprep.subr.bf16.mxu1 %v3920_v41 }
 0x2a7   :  { %4218 = vmatpush1.bf16.msra.mxu0 %v4029_v62 }
 0x2a8   :  { %4219 = vmatprep.subr.bf16.mxu0 %v4034_v42  ;;  %v4041_v42 = vunpack.c.l.s8.bf16 %v3817_v21 }
 0x2a9   :  { %4323 = vmatpush1.bf16.msra.mxu1 %v3919_v3  ;;  %v4046_v3 = vunpack.c.h.s8.bf16 %v7111_v58 }
 0x2aa   :  { %4324 = vmatprep.subr.bf16.mxu1 %v3924_v14  ;;  %v3948_v14 = vunpack.c.l.s8.bf16 %v3772_v16 }
 0x2ab   :  { %4220 = vmatpush1.bf16.msra.mxu0 %v4033_v2  ;;  %v3822_v2 = vld [vmem:[#allocation7 + $0x328] sm:$0xff] }
 0x2ac   :  { %4221 = vmatprep.subr.bf16.mxu0 %v4038_v60  ;;  %v4045_v60 = vunpack.c.h.s8.bf16 %v3817_v21  ;;  %v4050_v36 = vunpack.c.l.s8.bf16 %v3822_v2  ;;  %v3833_v21 = vld [vmem:[#allocation7 + $0x380] sm:$0xff] }
 0x2ad   :  { %4325 = vmatpush1.bf16.msra.mxu1 %v3923_v38  ;;  %v3947_v38 = vunpack.c.l.s8.bf16 %v3771_v11 }
 0x2ae   :  { %4326 = vmatprep.subr.bf16.mxu1 %v3928_v56  ;;  %v3821_v56 = vld [vmem:[#allocation7 + $0x320] sm:$0xff] }
 0x2af   :  { %4222 = vmatpush1.bf16.msra.mxu0 %v4037_v5  ;;  %v4049_v58 = vunpack.c.l.s8.bf16 %v3821_v56  ;;  %v3951_v5 = vunpack.c.h.s8.bf16 %v3771_v11  ;;  %v4077_v11 = vunpack.c.h.s8.bf16 %v3833_v21 }
 0x2b0   :  { %v3202_v46 = vpop.f32.mrb[4].mxu0  ;;  %4234 = vmatprep.subr.bf16.mxu0 %v4042_v33  ;;  %v4054_v33 = vunpack.c.h.s8.bf16 %v3822_v2 }
 0x2b1   :  { %v3429_v32 = vmul.f32 %v3404_v23, %v3202_v46  ;;  %v3204_v48 = vpop.f32.mrb[5].mxu0  ;;  %4327 = vmatpush1.bf16.msra.mxu1 %v3927_v18  ;;  %v3775_v18 = vld [vmem:[#allocation7 + $0x1b0] sm:$0xff]  ;;  %v3825_v46 = vld [vmem:[#allocation7 + $0x340] sm:$0xff] }
 0x2b2   :  { %v3430_v52 = vmul.f32 %v3408_v35, %v3204_v48  ;;  %v3206_v29 = vpop.f32.mrb[6].mxu0  ;;  %4328 = vmatprep.subr.bf16.mxu1 %v3932_v0  ;;  %v4053_v0 = vunpack.c.h.s8.bf16 %v3821_v56  ;;  %v3955_v1 = vunpack.c.l.s8.bf16 %v3775_v18  ;;  %v4057_v48 = vunpack.c.l.s8.bf16 %v3825_v46  ;;  %v3792_v56 = vld [vmem:[#allocation7 + $0x238] sm:$0xff] }
 0x2b3   :  { %v3487_v19 = vadd.f32 %v3462_v7, %v3429_v32  ;;  %v3437_v9 = vmul.f32 %v3404_v23, %v3206_v29  ;;  %v3208_v12 = vpop.f32.mrb[7].mxu0  ;;  %v3956_v23 = vunpack.c.l.s8.bf16 %v3776_v26  ;;  %v3780_v32 = vld [vmem:[#allocation7 + $0x1d8] sm:$0xff]  ;;  %v4061_v8 = vunpack.c.h.s8.bf16 %v3825_v46 }
 0x2b4   :  { %v3488_v44 = vadd.f32 %v3466_v51, %v3430_v52  ;;  %v3438_v4 = vmul.f32 %v3408_v35, %v3208_v12  ;;  %v3826_v35 = vld [vmem:[#allocation7 + $0x348] sm:$0xff] }
 0x2b5   :  { %v3503_v47 = vmul.f32 0.2, %v3487_v19  ;;  %v3495_v61 = vadd.f32 %v3462_v7, %v3437_v9  ;;  %4329 = vmatpush1.bf16.msra.mxu1 %v3931_v6  ;;  %v4058_v7 = vunpack.c.l.s8.bf16 %v3826_v35  ;;  %v3959_v6 = vunpack.c.h.s8.bf16 %v3775_v18  ;;  %v3830_v9 = vld [vmem:[#allocation7 + $0x368] sm:$0xff] }
 0x2b6   :  { %v3504_v54 = vmul.f32 0.2, %v3488_v44  ;;  %v3496_v25 = vadd.f32 %v3466_v51, %v3438_v4  ;;  %4330 = vmatprep.subr.bf16.mxu1 %v3936_v20  ;;  %v3960_v51 = vunpack.c.h.s8.bf16 %v3776_v26  ;;  %v4062_v52 = vunpack.c.h.s8.bf16 %v3826_v35 }
 0x2b7   :  { %v3511_v28 = vmul.f32 0.2, %v3495_v61  ;;  %v3519_v53 = vmax.f32 %v3487_v19, %v3503_v47  ;;  %v3964_v20 = vunpack.c.l.s8.bf16 %v3780_v32  ;;  %v3779_v19 = vld [vmem:[#allocation7 + $0x1d0] sm:$0xff]  ;;  %v4066_v4 = vunpack.c.l.s8.bf16 %v3830_v9  ;;  %v3829_v47 = vld [vmem:[#allocation7 + $0x360] sm:$0xff] }
 0x2b8   :  { %v3512_v37 = vmul.f32 0.2, %v3496_v25  ;;  %v7123_v40 = vpop.f32.mrb[8].mxu0  ;;  %v3520_v30 = vmax.f32 %v3488_v44, %v3504_v54  ;;  %v3963_v44 = vunpack.c.l.s8.bf16 %v3779_v19  ;;  %v4065_v54 = vunpack.c.l.s8.bf16 %v3829_v47 }
 0x2b9   :  { %v3527_v34 = vmax.f32 %v3495_v61, %v3511_v28  ;;  %4331 = vmatpush1.bf16.msra.mxu1 %v3935_v43  ;;  %v7125_v50 = vpop.f32.mrb[9].mxu0  ;;  %v3968_v61 = vunpack.c.h.s8.bf16 %v3780_v32  ;;  %v3784_v43 = vld [vmem:[#allocation7 + $0x1f8] sm:$0xff]  ;;  %v3783_v28 = vld [vmem:[#allocation7 + $0x1f0] sm:$0xff] }
 0x2ba   :  { %v3528_v24 = vmax.f32 %v3496_v25, %v3512_v37  ;;  %4332 = vmatprep.subr.bf16.mxu1 %v3940_v13  ;;  %v3967_v25 = vunpack.c.h.s8.bf16 %v3779_v19  ;;  %v4070_v13 = vunpack.c.h.s8.bf16 %v3830_v9  ;;  %v3972_v10 = vunpack.c.l.s8.bf16 %v3784_v43  ;;  %v3834_v37 = vld [vmem:[#allocation7 + $0x388] sm:$0xff]  ;;  %v3845_v9 = vld [vmem:[#allocation7 + $0x3e0] sm:$0xff] }
 0x2bb   :  { %v7127_v41 = vpack.c.bf16 %v3527_v34, %v3519_v53  ;;  %v4069_v53 = vunpack.c.h.s8.bf16 %v3829_v47  ;;  %v3971_v34 = vunpack.c.l.s8.bf16 %v3783_v28  ;;  %v3975_v16 = vunpack.c.h.s8.bf16 %v3783_v28  ;;  %v3804_v28 = vld [vmem:[#allocation7 + $0x298] sm:$0xff] }
 0x2bc   :  { %v7129_v62 = vpack.c.bf16 %v3528_v24, %v3520_v30  ;;  %v7134_v29 = vpop.f32.mrb[10].mxu0  ;;  %v3976_v30 = vunpack.c.h.s8.bf16 %v3784_v43  ;;  %v3788_v24 = vld [vmem:[#allocation7 + $0x218] sm:$0xff] }
 0x2bd   :  { %4333 = vmatpush1.bf16.msra.mxu1 %v3939_v15  ;;  %v7136_v12 = vpop.f32.mrb[11].mxu0  ;;  %v4074_v15 = vunpack.c.l.s8.bf16 %v3834_v37 }
 0x2be   :  { %4223 = vmatprep.mubr.bf16.mxu0 %v7129_v62  ;;  %4334 = vmatprep.subr.bf16.mxu1 %v3944_v31  ;;  %v4073_v31 = vunpack.c.l.s8.bf16 %v3833_v21  ;;  %v4016_v21 = vunpack.c.h.s8.bf16 %v3804_v28 }
 0x2bf   :  { %4224 = vmatmul.mubr.bf16.vlgmr.msra.gmra.mrb[12].mxu0 %v7127_v41 }
 0x2c0   :  { %4235 = vmatpush1.bf16.msra.mxu0 %v4041_v42  ;;  %v4078_v42 = vunpack.c.h.s8.bf16 %v3834_v37 }
 0x2c1   :  { %4335 = vmatpush1.bf16.msra.mxu1 %v3943_v59  ;;  %4236 = vmatprep.subr.bf16.mxu0 %v4046_v3  ;;  %v3980_v59 = vunpack.c.l.s8.bf16 %v3788_v24  ;;  %v3787_v3 = vld [vmem:[#allocation7 + $0x210] sm:$0xff] }
 0x2c2   :  { %4336 = vmatprep.subr.bf16.mxu1 %v3948_v14  ;;  %v3838_v14 = vld [vmem:[#allocation7 + $0x3a8] sm:$0xff]  ;;  %v3979_v2 = vunpack.c.l.s8.bf16 %v3787_v3  ;;  %v3983_v26 = vunpack.c.h.s8.bf16 %v3787_v3  ;;  %v3812_v3 = vld [vmem:[#allocation7 + $0x2d8] sm:$0xff] }
 0x2c4   :  { %4237 = vmatpush1.bf16.msra.mxu0 %v4045_v60  ;;  %v3837_v60 = vld [vmem:[#allocation7 + $0x3a0] sm:$0xff] }
 0x2c5   :  { %4337 = vmatpush1.bf16.msra.mxu1 %v3947_v38  ;;  %4238 = vmatprep.subr.bf16.mxu0 %v4050_v36  ;;  %v3984_v38 = vunpack.c.h.s8.bf16 %v3788_v24  ;;  %v4082_v36 = vunpack.c.l.s8.bf16 %v3838_v14  ;;  %v4085_v18 = vunpack.c.h.s8.bf16 %v3837_v60 }
 0x2c6   :  { %4338 = vmatprep.subr.bf16.mxu1 %v3952_v55  ;;  %v4081_v55 = vunpack.c.l.s8.bf16 %v3837_v60 }
 0x2c8   :  { %4239 = vmatpush1.bf16.msra.mxu0 %v4049_v58  ;;  %v4086_v58 = vunpack.c.h.s8.bf16 %v3838_v14 }
 0x2c9   :  { %4339 = vmatpush1.bf16.msra.mxu1 %v3951_v5  ;;  %4240 = vmatprep.subr.bf16.mxu0 %v4054_v33  ;;  %v3988_v5 = vunpack.c.l.s8.bf16 %v3792_v56  ;;  %v3791_v33 = vld [vmem:[#allocation7 + $0x230] sm:$0xff] }
 0x2ca   :  { %4340 = vmatprep.subr.bf16.mxu1 %v3956_v23  ;;  %v3842_v23 = vld [vmem:[#allocation7 + $0x3c8] sm:$0xff]  ;;  %v3987_v35 = vunpack.c.l.s8.bf16 %v3791_v33 }
 0x2cc   :  { %4241 = vmatpush1.bf16.msra.mxu0 %v4053_v0  ;;  %v4090_v0 = vunpack.c.l.s8.bf16 %v3842_v23 }
 0x2cd   :  { %4341 = vmatpush1.bf16.msra.mxu1 %v3955_v1  ;;  %4242 = vmatprep.subr.bf16.mxu0 %v4058_v7  ;;  %v3841_v1 = vld [vmem:[#allocation7 + $0x3c0] sm:$0xff]  ;;  %v3796_v7 = vld [vmem:[#allocation7 + $0x258] sm:$0xff] }
 0x2ce   :  { %4342 = vmatprep.subr.bf16.mxu1 %v3960_v51  ;;  %v4089_v46 = vunpack.c.l.s8.bf16 %v3841_v1  ;;  %v4094_v51 = vunpack.c.h.s8.bf16 %v3842_v23  ;;  %v3996_v32 = vunpack.c.l.s8.bf16 %v3796_v7 }
 0x2d0   :  { %4243 = vmatpush1.bf16.msra.mxu0 %v4057_v48  ;;  %v3795_v48 = vld [vmem:[#allocation7 + $0x250] sm:$0xff] }
 0x2d1   :  { %4343 = vmatpush1.bf16.msra.mxu1 %v3959_v6  ;;  %4244 = vmatprep.subr.bf16.mxu0 %v4062_v52  ;;  %v3846_v6 = vld [vmem:[#allocation7 + $0x3e8] sm:$0xff]  ;;  %v4093_v52 = vunpack.c.h.s8.bf16 %v3841_v1  ;;  %v3999_v47 = vunpack.c.h.s8.bf16 %v3795_v48 }
 0x2d2   :  { %4344 = vmatprep.subr.bf16.mxu1 %v3964_v20  ;;  %v3995_v20 = vunpack.c.l.s8.bf16 %v3795_v48  ;;  %v4098_v19 = vunpack.c.l.s8.bf16 %v3846_v6  ;;  %v3415_v48 = vsub.s32 7, %v6969_v45 }
 0x2d4   :  { %4245 = vmatpush1.bf16.msra.mxu0 %v4061_v8  ;;  %v4000_v8 = vunpack.c.h.s8.bf16 %v3796_v7 }
 0x2d5   :  { %4345 = vmatpush1.bf16.msra.mxu1 %v3963_v44  ;;  %4246 = vmatprep.subr.bf16.mxu0 %v4066_v4  ;;  %v3800_v44 = vld [vmem:[#allocation7 + $0x278] sm:$0xff]  ;;  %v4097_v4 = vunpack.c.l.s8.bf16 %v3845_v9 }
 0x2d6   :  { %4346 = vmatprep.subr.bf16.mxu1 %v3968_v61  ;;  %v4102_v61 = vunpack.c.h.s8.bf16 %v3846_v6  ;;  %v4004_v43 = vunpack.c.l.s8.bf16 %v3800_v44 }
 0x2d8   :  { %4247 = vmatpush1.bf16.msra.mxu0 %v4065_v54  ;;  %v3799_v54 = vld [vmem:[#allocation7 + $0x270] sm:$0xff] }
 0x2d9   :  { %4347 = vmatpush1.bf16.msra.mxu1 %v3967_v25  ;;  %4248 = vmatprep.subr.bf16.mxu0 %v4070_v13  ;;  %v4101_v25 = vunpack.c.h.s8.bf16 %v3845_v9  ;;  %v4003_v13 = vunpack.c.l.s8.bf16 %v3799_v54  ;;  %v4007_v37 = vunpack.c.h.s8.bf16 %v3799_v54 }
 0x2da   :  { %4348 = vmatprep.subr.bf16.mxu1 %v3972_v10  ;;  %v4008_v10 = vunpack.c.h.s8.bf16 %v3800_v44  ;;  %v3827_v44 = vld [vmem:[#allocation7 + $0x350] sm:$0xff] }
 0x2dc   :  { %4249 = vmatpush1.bf16.msra.mxu0 %v4069_v53  ;;  %v4012_v53 = vunpack.c.l.s8.bf16 %v3804_v28 }
 0x2dd   :  { %4349 = vmatpush1.bf16.msra.mxu1 %v3971_v34  ;;  %4250 = vmatprep.subr.bf16.mxu0 %v4074_v15  ;;  %v3803_v34 = vld [vmem:[#allocation7 + $0x290] sm:$0xff] }
 0x2de   :  { %4350 = vmatprep.subr.bf16.mxu1 %v3976_v30  ;;  %v4011_v15 = vunpack.c.l.s8.bf16 %v3803_v34  ;;  %v3808_v30 = vld [vmem:[#allocation7 + $0x2b8] sm:$0xff]  ;;  %v4015_v24 = vunpack.c.h.s8.bf16 %v3803_v34 }
 0x2df   :  { %v3832_v34 = vld [vmem:[#allocation7 + $0x378] sm:$0xff] }
 0x2e0   :  { %4251 = vmatpush1.bf16.msra.mxu0 %v4073_v31  ;;  %v4020_v31 = vunpack.c.l.s8.bf16 %v3808_v30 }
 0x2e1   :  { %4351 = vmatpush1.bf16.msra.mxu1 %v3975_v16  ;;  %4252 = vmatprep.subr.bf16.mxu0 %v4078_v42  ;;  %v3807_v16 = vld [vmem:[#allocation7 + $0x2b0] sm:$0xff] }
 0x2e2   :  { %4363 = vmatprep.subr.bf16.mxu1 %v3980_v59  ;;  %v4019_v42 = vunpack.c.l.s8.bf16 %v3807_v16  ;;  %v4024_v59 = vunpack.c.h.s8.bf16 %v3808_v30  ;;  %v4023_v14 = vunpack.c.h.s8.bf16 %v3807_v16  ;;  %v4068_v16 = vunpack.c.l.s8.bf16 %v3832_v34 }
 0x2e4   :  { %4353 = vmatmul.mubr.bf16.vlgmr.msra.gmra.mrb[16].mxu1 %v7101_v27  ;;  %4253 = vmatpush1.bf16.msra.mxu0 %v4077_v11  ;;  %v3992_v27 = vunpack.c.h.s8.bf16 %v3792_v56  ;;  %v4028_v11 = vunpack.c.l.s8.bf16 %v3812_v3 }
 0x2e5   :  { %4364 = vmatpush1.bf16.msra.mxu1 %v3979_v2  ;;  %4395 = vmatprep.mubr.bf16.mxu1 %v7129_v62  ;;  %v3991_v62 = vunpack.c.h.s8.bf16 %v3791_v33  ;;  %v3811_v2 = vld [vmem:[#allocation7 + $0x2d0] sm:$0xff]  ;;  %v3820_v33 = vld [vmem:[#allocation7 + $0x318] sm:$0xff] }
 0x2e6   :  { %4365 = vmatprep.subr.bf16.mxu1 %v3984_v38  ;;  %4254 = vmatprep.subr.bf16.mxu0 %v4082_v36  ;;  %v4027_v60 = vunpack.c.l.s8.bf16 %v3811_v2  ;;  %v4032_v38 = vunpack.c.h.s8.bf16 %v3812_v3  ;;  %v3816_v36 = vld [vmem:[#allocation7 + $0x2f8] sm:$0xff]  ;;  %v4031_v56 = vunpack.c.h.s8.bf16 %v3811_v2  ;;  %v4048_v1 = vunpack.c.h.s8.bf16 %v3820_v33 }
 0x2e8   :  { %4255 = vmatpush1.bf16.msra.mxu0 %v4081_v55  ;;  %v4036_v55 = vunpack.c.l.s8.bf16 %v3816_v36 }
 0x2e9   :  { %4366 = vmatpush1.bf16.msra.mxu1 %v3983_v26  ;;  %4256 = vmatprep.subr.bf16.mxu0 %v4086_v58  ;;  %v3815_v26 = vld [vmem:[#allocation7 + $0x2f0] sm:$0xff] }
 0x2ea   :  { %4367 = vmatprep.subr.bf16.mxu1 %v3988_v5  ;;  %v4035_v58 = vunpack.c.l.s8.bf16 %v3815_v26  ;;  %v4040_v5 = vunpack.c.h.s8.bf16 %v3816_v36  ;;  %v4039_v23 = vunpack.c.h.s8.bf16 %v3815_v26  ;;  %v4072_v26 = vunpack.c.h.s8.bf16 %v3832_v34 }
 0x2ec   :  { %4257 = vmatpush1.bf16.msra.mxu0 %v4085_v18  ;;  %v4044_v18 = vunpack.c.l.s8.bf16 %v3820_v33 }
 0x2ed   :  { %4368 = vmatpush1.bf16.msra.mxu1 %v3987_v35  ;;  %4258 = vmatprep.subr.bf16.mxu0 %v4090_v0  ;;  %v3819_v35 = vld [vmem:[#allocation7 + $0x310] sm:$0xff] }
 0x2ee   :  { %4369 = vmatprep.subr.bf16.mxu1 %v3992_v27  ;;  %v4043_v0 = vunpack.c.l.s8.bf16 %v3819_v35  ;;  %v3824_v27 = vld [vmem:[#allocation7 + $0x338] sm:$0xff]  ;;  %v4047_v7 = vunpack.c.h.s8.bf16 %v3819_v35  ;;  %v3835_v35 = vld [vmem:[#allocation7 + $0x390] sm:$0xff] }
 0x2ef   :  { %v4056_v6 = vunpack.c.h.s8.bf16 %v3824_v27 }
 0x2f0   :  { %4259 = vmatpush1.bf16.msra.mxu0 %v4089_v46  ;;  %v4052_v46 = vunpack.c.l.s8.bf16 %v3824_v27  ;;  %v3840_v27 = vld [vmem:[#allocation7 + $0x3b8] sm:$0xff] }
 0x2f1   :  { %4370 = vmatpush1.bf16.msra.mxu1 %v3991_v62  ;;  %4260 = vmatprep.subr.bf16.mxu0 %v4094_v51  ;;  %v3823_v62 = vld [vmem:[#allocation7 + $0x330] sm:$0xff]  ;;  %v3411_v51 = vsub.s32 6, %v6969_v45 }
 0x2f2   :  { %4371 = vmatprep.subr.bf16.mxu1 %v3996_v32  ;;  %v4051_v32 = vunpack.c.l.s8.bf16 %v3823_v62 }
 0x2f3   :  { %v3470_v9 = vrot.slane %v7119_v39, %v3411_v51 }
 0x2f4   :  { %4261 = vmatpush1.bf16.msra.mxu0 %v4093_v52  ;;  %v3828_v52 = vld [vmem:[#allocation7 + $0x358] sm:$0xff] }
 0x2f5   :  { %4372 = vmatpush1.bf16.msra.mxu1 %v3995_v20  ;;  %4262 = vmatprep.subr.bf16.mxu0 %v4098_v19  ;;  %v3412_v20 = vrot.slane %v7115_v17, %v3411_v51  ;;  %v3416_v19 = vrot.slane %v7115_v17, %v3415_v48  ;;  %v4064_v17 = vunpack.c.h.s8.bf16 %v3828_v52 }
 0x2f6   :  { %4373 = vmatprep.subr.bf16.mxu1 %v4000_v8  ;;  %v4060_v8 = vunpack.c.l.s8.bf16 %v3828_v52 }
 0x2f8   :  { %4263 = vmatpush1.bf16.msra.mxu0 %v4097_v4 }
 0x2f9   :  { %4374 = vmatpush1.bf16.msra.mxu1 %v3999_v47  ;;  %4264 = vmatprep.subr.bf16.mxu0 %v4102_v61  ;;  %v3474_v47 = vrot.slane %v7119_v39, %v3415_v48  ;;  %v4063_v39 = vunpack.c.h.s8.bf16 %v3827_v44  ;;  %v3844_v48 = vld [vmem:[#allocation7 + $0x3d8] sm:$0xff] }
 0x2fa   :  { %4375 = vmatprep.subr.bf16.mxu1 %v4004_v43  ;;  %v4092_v52 = vunpack.c.l.s8.bf16 %v3844_v48 }
 0x2fc   :  { %4265 = vmatpush1.bf16.msra.mxu0 %v4101_v25  ;;  %v4059_v25 = vunpack.c.l.s8.bf16 %v3827_v44 }
 0x2fd   :  { %4376 = vmatpush1.bf16.msra.mxu1 %v4003_v13 }
 0x2fe   :  { %4377 = vmatprep.subr.bf16.mxu1 %v4008_v10 }
 0x301   :  { %4378 = vmatpush1.bf16.msra.mxu1 %v4007_v37 }
 0x302   :  { %4379 = vmatprep.subr.bf16.mxu1 %v4012_v53 }
 0x305   :  { %4380 = vmatpush1.bf16.msra.mxu1 %v4011_v15 }
 0x306   :  { %4381 = vmatprep.subr.bf16.mxu1 %v4016_v21 }
 0x309   :  { %4382 = vmatpush1.bf16.msra.mxu1 %v4015_v24 }
 0x30a   :  { %4383 = vmatprep.subr.bf16.mxu1 %v4020_v31 }
 0x30d   :  { %4384 = vmatpush1.bf16.msra.mxu1 %v4019_v42  ;;  %v3831_v42 = vld [vmem:[#allocation7 + $0x370] sm:$0xff] }
 0x30e   :  { %4385 = vmatprep.subr.bf16.mxu1 %v4024_v59  ;;  %v4067_v36 = vunpack.c.l.s8.bf16 %v3831_v42 }
 0x311   :  { %4386 = vmatpush1.bf16.msra.mxu1 %v4023_v14 }
 0x312   :  { %4387 = vmatprep.subr.bf16.mxu1 %v4028_v11 }
 0x315   :  { %4388 = vmatpush1.bf16.msra.mxu1 %v4027_v60 }
 0x316   :  { %4389 = vmatprep.subr.bf16.mxu1 %v4032_v38 }
 0x319   :  { %4390 = vmatpush1.bf16.msra.mxu1 %v4031_v56 }
 0x31a   :  { %4391 = vmatprep.subr.bf16.mxu1 %v4036_v55 }
 0x31d   :  { %4392 = vmatpush1.bf16.msra.mxu1 %v4035_v58  ;;  %v3836_v58 = vld [vmem:[#allocation7 + $0x398] sm:$0xff] }
 0x31e   :  { %4393 = vmatprep.subr.bf16.mxu1 %v4040_v5 }
 0x321   :  { %4394 = vmatpush1.bf16.msra.mxu1 %v4039_v23  ;;  %v4071_v23 = vunpack.c.h.s8.bf16 %v3831_v42 }
 0x322   :  { %4406 = vmatprep.subr.bf16.mxu1 %v4044_v18  ;;  %v4076_v18 = vunpack.c.l.s8.bf16 %v3836_v58 }
 0x324   :  { %4396 = vmatmul.mubr.bf16.vlgmr.msra.gmra.mrb[16].mxu1 %v7127_v41  ;;  %v4055_v41 = vunpack.c.h.s8.bf16 %v3823_v62  ;;  %v3839_v62 = vld [vmem:[#allocation7 + $0x3b0] sm:$0xff] }
 0x325   :  { %4407 = vmatpush1.bf16.msra.mxu1 %v4043_v0  ;;  %v4075_v0 = vunpack.c.l.s8.bf16 %v3835_v35  ;;  %v4083_v51 = vunpack.c.l.s8.bf16 %v3839_v62 }
 0x326   :  { %4408 = vmatprep.subr.bf16.mxu1 %v4048_v1  ;;  %v4080_v1 = vunpack.c.h.s8.bf16 %v3836_v58 }
 0x329   :  { %4409 = vmatpush1.bf16.msra.mxu1 %v4047_v7  ;;  %v4079_v7 = vunpack.c.h.s8.bf16 %v3835_v35  ;;  %v4705_v35 = vld [vmem:[#allocation9 + $0x58] sm:$0xff] }
 0x32a   :  { %4410 = vmatprep.subr.bf16.mxu1 %v4052_v46  ;;  %v4084_v46 = vunpack.c.l.s8.bf16 %v3840_v27 }
 0x32d   :  { %4411 = vmatpush1.bf16.msra.mxu1 %v4051_v32  ;;  %v4088_v32 = vunpack.c.h.s8.bf16 %v3840_v27 }
 0x32e   :  { %4412 = vmatprep.subr.bf16.mxu1 %v4056_v6  ;;  %v4087_v6 = vunpack.c.h.s8.bf16 %v3839_v62  ;;  %v4707_v62 = vld [vmem:[#allocation9 + $0x68] sm:$0xff] }
 0x32f   :  { %v3374_v4 = vpop.f32.mrb[8].mxu1 }
 0x330   :  { %v3431_v61 = vmul.f32 %v3412_v20, %v3374_v4  ;;  %v3376_v43 = vpop.f32.mrb[9].mxu1  ;;  %v3847_v4 = vld [vmem:[#allocation7 + $0x3f0] sm:$0xff] }
 0x331   :  { %v3432_v45 = vmul.f32 %v3416_v19, %v3376_v43  ;;  %4413 = vmatpush1.bf16.msra.mxu1 %v4055_v41  ;;  %v3378_v54 = vpop.f32.mrb[10].mxu1  ;;  %v4096_v41 = vunpack.c.h.s8.bf16 %v3844_v48  ;;  %v4103_v43 = vunpack.c.h.s8.bf16 %v3847_v4 }
 0x332   :  { %v3489_v13 = vadd.f32 %v3470_v9, %v3431_v61  ;;  %v3439_v10 = vmul.f32 %v3412_v20, %v3378_v54  ;;  %v3380_v28 = vpop.f32.mrb[11].mxu1  ;;  %4414 = vmatprep.subr.bf16.mxu1 %v4060_v8  ;;  %v3843_v20 = vld [vmem:[#allocation7 + $0x3d0] sm:$0xff] }
 0x333   :  { %v3490_v37 = vadd.f32 %v3474_v47, %v3432_v45  ;;  %v3440_v53 = vmul.f32 %v3416_v19, %v3380_v28  ;;  %v4091_v19 = vunpack.c.l.s8.bf16 %v3843_v20  ;;  %v4095_v8 = vunpack.c.h.s8.bf16 %v3843_v20  ;;  %v4695_v45 = vld [vmem:[#allocation9 + $0x8] sm:$0xff]  ;;  %v4709_v20 = vld [vmem:[#allocation9 + $0x78] sm:$0xff] }
 0x334   :  { %v3505_v15 = vmul.f32 0.2, %v3489_v13  ;;  %v3497_v21 = vadd.f32 %v3470_v9, %v3439_v10  ;;  %v3848_v9 = vld [vmem:[#allocation7 + $0x3f8] sm:$0xff]  ;;  %v4727_v54 = vunpack.c.l.s8.bf16 %v4695_v45  ;;  %v4729_v10 = vunpack.c.h.s8.bf16 %v4695_v45 }
 0x335   :  { %v3506_v30 = vmul.f32 0.2, %v3490_v37  ;;  %v3498_v24 = vadd.f32 %v3474_v47, %v3440_v53  ;;  %4415 = vmatpush1.bf16.msra.mxu1 %v4059_v25  ;;  %v4100_v44 = vunpack.c.l.s8.bf16 %v3848_v9  ;;  %v4099_v47 = vunpack.c.l.s8.bf16 %v3847_v4  ;;  %v4694_v25 = vld [vmem:[#allocation9] sm:$0xff]  ;;  %v4696_v53 = vld [vmem:[#allocation9 + $0x10] sm:$0xff]  ;;  %v7155_v4 = vld [vmem:[#allocation9 + $0x88] sm:$0xff] }
 0x336   :  { %v3513_v31 = vmul.f32 0.2, %v3497_v21  ;;  %4416 = vmatprep.subr.bf16.mxu1 %v4064_v17  ;;  %v3521_v14 = vmax.f32 %v3489_v13, %v3505_v15  ;;  %v4104_v61 = vunpack.c.h.s8.bf16 %v3848_v9  ;;  %v4726_v13 = vunpack.c.l.s8.bf16 %v4694_v25  ;;  %4790 = vmatprep.subr.bf16.mxu0 %v4727_v54  ;;  %v4697_v17 = vld [vmem:[#allocation9 + $0x18] sm:$0xff] }
 0x337   :  { %v3514_v59 = vmul.f32 0.2, %v3498_v24  ;;  %v7147_v3 = vpop.f32.mrb[12].mxu1  ;;  %v3522_v60 = vmax.f32 %v3490_v37, %v3506_v30  ;;  %v4728_v28 = vunpack.c.h.s8.bf16 %v4694_v25  ;;  %v4731_v37 = vunpack.c.l.s8.bf16 %v4697_v17  ;;  %v4699_v30 = vld [vmem:[#allocation9 + $0x28] sm:$0xff]  ;;  %v7160_v25 = vld [vmem:[#allocation12 + $0x10] sm:$0xf] }
 0x338   :  { %v3529_v11 = vmax.f32 %v3497_v21, %v3513_v31  ;;  %v7149_v2 = vpop.f32.mrb[13].mxu1  ;;  %v4730_v34 = vunpack.c.l.s8.bf16 %v4696_v53  ;;  %v4733_v15 = vunpack.c.h.s8.bf16 %v4697_v17  ;;  %v4732_v21 = vunpack.c.h.s8.bf16 %v4696_v53 }
 0x339   :  { %v3530_v38 = vmax.f32 %v3498_v24, %v3514_v59  ;;  %4417 = vmatpush1.bf16.msra.mxu1 %v4063_v39  ;;  %v4735_v24 = vunpack.c.l.s8.bf16 %v4699_v30  ;;  %v4698_v39 = vld [vmem:[#allocation9 + $0x20] sm:$0xff]  ;;  %v4701_v59 = vld [vmem:[#allocation9 + $0x38] sm:$0xff]  ;;  %v4492_v53 = vrot.slane %v7160_v25, %v6979_v57 }
 0x33a   :  { %v3719_v56 = vpack.c.bf16 %v3529_v11, %v3521_v14  ;;  %4418 = vmatprep.subr.bf16.mxu1 %v4068_v16  ;;  %v4734_v31 = vunpack.c.l.s8.bf16 %v4698_v39  ;;  %v4737_v16 = vunpack.c.h.s8.bf16 %v4699_v30  ;;  %v4736_v42 = vunpack.c.h.s8.bf16 %v4698_v39  ;;  %v4700_v11 = vld [vmem:[#allocation9 + $0x30] sm:$0xff] }
 0x33b   :  { %v3720_v55 = vpack.c.bf16 %v3530_v38, %v3522_v60  ;;  %v7151_v5 = vpop.f32.mrb[14].mxu1  ;;  %v4739_v14 = vunpack.c.l.s8.bf16 %v4701_v59  ;;  %v4738_v60 = vunpack.c.l.s8.bf16 %v4700_v11  ;;  %v4741_v38 = vunpack.c.h.s8.bf16 %v4701_v59 }
 0x33c   :  { %v7153_v33 = vpop.f32.mrb[15].mxu1  ;;  %v4496_v30 = vrot.slane %v7160_v25, %v6984_v22 }
 0x33d   :  { %4419 = vmatpush1.bf16.msra.mxu1 %v4067_v36  ;;  %4266 = vmatprep.mubr.bf16.mxu0 %v3720_v55  ;;  %v4740_v36 = vunpack.c.h.s8.bf16 %v4700_v11 }
 0x33e   :  { %4438 = vmatprep.mubr.bf16.mxu1 %v3720_v55  ;;  %4267 = vmatmul.mubr.bf16.vlgmr.msra.gmra.mrb[12].mxu0 %v3719_v56 }
 0x33f   :  { %4420 = vmatprep.subr.bf16.mxu1 %v4072_v26  ;;  %4791 = vmatpush1.bf16.msra.mxu0 %v4726_v13  ;;  %v4702_v26 = vld [vmem:[#allocation9 + $0x40] sm:$0xff] }
 0x340   :  { %4792 = vmatprep.subr.bf16.mxu0 %v4729_v10  ;;  %v4742_v58 = vunpack.c.l.s8.bf16 %v4702_v26 }
 0x341   :  { %4421 = vmatpush1.bf16.msra.mxu1 %v4071_v23 }
 0x342   :  { %4422 = vmatprep.subr.bf16.mxu1 %v4076_v18  ;;  %v4744_v18 = vunpack.c.h.s8.bf16 %v4702_v26 }
 0x343   :  { %4793 = vmatpush1.bf16.msra.mxu0 %v4728_v28 }
 0x344   :  { %4794 = vmatprep.subr.bf16.mxu0 %v4731_v37 }
 0x345   :  { %4423 = vmatpush1.bf16.msra.mxu1 %v4075_v0  ;;  %v4747_v0 = vunpack.c.l.s8.bf16 %v4705_v35 }
 0x346   :  { %4424 = vmatprep.subr.bf16.mxu1 %v4080_v1  ;;  %v4704_v1 = vld [vmem:[#allocation9 + $0x50] sm:$0xff] }
 0x347   :  { %4795 = vmatpush1.bf16.msra.mxu0 %v4730_v34  ;;  %v4746_v27 = vunpack.c.l.s8.bf16 %v4704_v1 }
 0x348   :  { %4796 = vmatprep.subr.bf16.mxu0 %v4733_v15 }
 0x349   :  { %4425 = vmatpush1.bf16.msra.mxu1 %v4079_v7  ;;  %v4749_v7 = vunpack.c.h.s8.bf16 %v4705_v35 }
 0x34a   :  { %4426 = vmatprep.subr.bf16.mxu1 %v4084_v46  ;;  %v4748_v46 = vunpack.c.h.s8.bf16 %v4704_v1 }
 0x34b   :  { %4797 = vmatpush1.bf16.msra.mxu0 %v4732_v21 }
 0x34c   :  { %4798 = vmatprep.subr.bf16.mxu0 %v4735_v24 }
 0x34d   :  { %4427 = vmatpush1.bf16.msra.mxu1 %v4083_v51  ;;  %v4751_v51 = vunpack.c.l.s8.bf16 %v4707_v62 }
 0x34e   :  { %4428 = vmatprep.subr.bf16.mxu1 %v4088_v32  ;;  %v4706_v32 = vld [vmem:[#allocation9 + $0x60] sm:$0xff] }
 0x34f   :  { %4799 = vmatpush1.bf16.msra.mxu0 %v4734_v31  ;;  %v4750_v48 = vunpack.c.l.s8.bf16 %v4706_v32 }
 0x350   :  { %4800 = vmatprep.subr.bf16.mxu0 %v4737_v16 }
 0x351   :  { %4429 = vmatpush1.bf16.msra.mxu1 %v4087_v6  ;;  %v4753_v6 = vunpack.c.h.s8.bf16 %v4707_v62 }
 0x352   :  { %4430 = vmatprep.subr.bf16.mxu1 %v4092_v52  ;;  %v4752_v52 = vunpack.c.h.s8.bf16 %v4706_v32 }
 0x353   :  { %4801 = vmatpush1.bf16.msra.mxu0 %v4736_v42 }
 0x354   :  { %4802 = vmatprep.subr.bf16.mxu0 %v4739_v14 }
 0x355   :  { %4431 = vmatpush1.bf16.msra.mxu1 %v4091_v19  ;;  %v4755_v19 = vunpack.c.l.s8.bf16 %v4709_v20 }
 0x356   :  { %4432 = vmatprep.subr.bf16.mxu1 %v4096_v41  ;;  %v4708_v41 = vld [vmem:[#allocation9 + $0x70] sm:$0xff] }
 0x357   :  { %4803 = vmatpush1.bf16.msra.mxu0 %v4738_v60  ;;  %v4754_v9 = vunpack.c.l.s8.bf16 %v4708_v41 }
 0x358   :  { %4804 = vmatprep.subr.bf16.mxu0 %v4741_v38 }
 0x359   :  { %4433 = vmatpush1.bf16.msra.mxu1 %v4095_v8  ;;  %v4757_v8 = vunpack.c.h.s8.bf16 %v4709_v20 }
 0x35a   :  { %4434 = vmatprep.subr.bf16.mxu1 %v4100_v44  ;;  %v4756_v44 = vunpack.c.h.s8.bf16 %v4708_v41 }
 0x35b   :  { %4805 = vmatpush1.bf16.msra.mxu0 %v4740_v36 }
 0x35d   :  { %4435 = vmatpush1.bf16.msra.mxu1 %v4099_v47  ;;  %v4759_v47 = vunpack.c.l.s8.bf16 %v7155_v4 }
 0x35e   :  { %4436 = vmatprep.subr.bf16.mxu1 %v4104_v61  ;;  %v4449_v61 = vld [vmem:[#allocation12 + $0x14] sm:$0xf] }
 0x35f   :  { %v4458_v45 = vrot.slane %v4449_v61, %v6984_v22 }
 0x361   :  { %4437 = vmatpush1.bf16.msra.mxu1 %v4103_v43  ;;  %v4454_v43 = vrot.slane %v4449_v61, %v6979_v57 }
 0x364   :  { %4439 = vmatmul.mubr.bf16.vlgmr.msra.gmra.mrb[16].mxu1 %v3719_v56  ;;  %v4703_v56 = vld [vmem:[#allocation9 + $0x48] sm:$0xff] }
 0x365   :  { %v4743_v55 = vunpack.c.l.s8.bf16 %v4703_v56  ;;  %v4745_v23 = vunpack.c.h.s8.bf16 %v4703_v56 }
 0x367   :  { %4806 = vmatprep.subr.bf16.mxu0 %v4743_v55 }
 0x368   :  { %4807 = vmatpush1.bf16.msra.mxu0 %v4742_v58 }
 0x369   :  { %4808 = vmatprep.subr.bf16.mxu0 %v4745_v23 }
 0x36c   :  { %4809 = vmatpush1.bf16.msra.mxu0 %v4744_v18 }
 0x36d   :  { %4810 = vmatprep.subr.bf16.mxu0 %v4747_v0 }
 0x370   :  { %4811 = vmatpush1.bf16.msra.mxu0 %v4746_v27 }
 0x371   :  { %4812 = vmatprep.subr.bf16.mxu0 %v4749_v7 }
 0x374   :  { %4813 = vmatpush1.bf16.msra.mxu0 %v4748_v46 }
 0x375   :  { %4814 = vmatprep.subr.bf16.mxu0 %v4751_v51 }
 0x378   :  { %4815 = vmatpush1.bf16.msra.mxu0 %v4750_v48 }
 0x379   :  { %4816 = vmatprep.subr.bf16.mxu0 %v4753_v6 }
 0x37c   :  { %4817 = vmatpush1.bf16.msra.mxu0 %v4752_v52 }
 0x37d   :  { %4818 = vmatprep.subr.bf16.mxu0 %v4755_v19 }
 0x380   :  { %4819 = vmatpush1.bf16.msra.mxu0 %v4754_v9 }
 0x381   :  { %4820 = vmatprep.subr.bf16.mxu0 %v4757_v8 }
 0x384   :  { %4821 = vmatpush1.bf16.msra.mxu0 %v4756_v44  ;;  %v4462_v44 = vrot.slane %v4449_v61, %v7076_v49 }
 0x385   :  { %4833 = vmatprep.subr.bf16.mxu0 %v4759_v47 }
 0x411   :  { %v4268_v54 = vpop.f32.mrb[12].mxu0 }
 0x412   :  { %v4471_v13 = vmul.f32 %v4454_v43, %v4268_v54  ;;  %v4270_v10 = vpop.f32.mrb[13].mxu0 }
 0x413   :  { %v4472_v28 = vmul.f32 %v4458_v45, %v4270_v10  ;;  %v4272_v17 = vpop.f32.mrb[14].mxu0 }
 0x414   :  { %v4479_v37 = vadd.f32 %v4471_v13, %v7123_v40  ;;  %v4475_v34 = vmul.f32 %v4454_v43, %v4272_v17  ;;  %v4274_v15 = vpop.f32.mrb[15].mxu0  ;;  %v4466_v43 = vrot.slane %v4449_v61, %v7084_v63  ;;  %v4500_v17 = vrot.slane %v7160_v25, %v7076_v49 }
 0x415   :  { %v4480_v21 = vadd.f32 %v4472_v28, %v7125_v50  ;;  %v4476_v24 = vmul.f32 %v4458_v45, %v4274_v15 }
 0x416   :  { %v4483_v39 = vadd.f32 %v4475_v34, %v7134_v29  ;;  %v4509_v16 = vadd.f32 %v4492_v53, %v4479_v37 }
 0x417   :  { %v4484_v31 = vadd.f32 %v4476_v24, %v7136_v12  ;;  %v4510_v59 = vadd.f32 %v4496_v30, %v4480_v21 }
 0x418   :  { %v4513_v42 = vadd.f32 %v4492_v53, %v4483_v39 }
 0x419   :  { %v4514_v14 = vadd.f32 %v4496_v30, %v4484_v31 }
 0x41a   :  { %v4519_v40 = vadd.f32 %v4513_v42, %v4509_v16 }
 0x41b   :  { %v4526_v11 = vadd.f32 %v4514_v14, %v4510_v59 }
 0x41c   :  { %v4520_v60 = vrot.slane %v4519_v40, 4 }
 0x41d   :  { %v4527_v38 = vrot.slane %v4526_v11, 4 }
 0x41e   :  { %v4521_v36 = vadd.f32 %v4520_v60, %v4519_v40 }
 0x41f   :  { %v4528_v56 = vadd.f32 %v4527_v38, %v4526_v11 }
 0x420   :  { %v4522_v55 = vrot.slane %v4521_v36, 2 }
 0x421   :  { %v4529_v50 = vrot.slane %v4528_v56, 2 }
 0x422   :  { %v4523_v26 = vadd.f32 %v4522_v55, %v4521_v36 }
 0x423   :  { %v4530_v58 = vadd.f32 %v4529_v50, %v4528_v56 }
 0x424   :  { %v4524_v23 = vrot.slane %v4523_v26, 1 }
 0x425   :  { %v4531_v18 = vrot.slane %v4530_v58, 1 }
 0x426   :  { %v4525_v35 = vadd.f32 %v4524_v23, %v4523_v26 }
 0x427   :  { %v4532_v29 = vadd.f32 %v4531_v18, %v4530_v58  ;;  %v7196_v18 = vld [vmem:[#allocation12 + $0x18] sm:$0xf] }
 0x428   :  { %v4548_v0 = vmul.f32 0.0625, %v4525_v35 }
 0x429   :  { %v4549_v12 = vmul.f32 0.0625, %v4532_v29 }
 0x42a   :  { %v7170_v1 = vsub.f32 %v4509_v16, %v4548_v0  ;;  %v7172_v27 = vsub.f32 %v4513_v42, %v4548_v0  ;;  %v4504_v16 = vrot.slane %v7160_v25, %v7084_v63  ;;  %v7198_v0 = vld [vmem:[#allocation12 + $0x1c] sm:$0xf] }
 0x42b   :  { %v7174_v7 = vsub.f32 %v4510_v59, %v4549_v12  ;;  %v7176_v46 = vsub.f32 %v4514_v14, %v4549_v12 }
 0x42c   :  { %v4560_v62 = vmul.f32 %v7170_v1, %v7170_v1  ;;  %v4564_v51 = vmul.f32 %v7172_v27, %v7172_v27 }
 0x42d   :  { %v4561_v32 = vmul.f32 %v7174_v7, %v7174_v7  ;;  %v4565_v48 = vmul.f32 %v7176_v46, %v7176_v46 }
 0x42e   :  { %v4568_v6 = vadd.f32 %v4564_v51, %v4560_v62 }
 0x42f   :  { %v4575_v52 = vadd.f32 %v4565_v48, %v4561_v32  ;;  %v4624_v32 = vrot.slane %v7196_v18, %v6984_v22 }
 0x430   :  { %v4569_v20 = vrot.slane %v4568_v6, 4 }
 0x431   :  { %v4576_v19 = vrot.slane %v4575_v52, 4 }
 0x432   :  { %v4570_v41 = vadd.f32 %v4569_v20, %v4568_v6 }
 0x433   :  { %v4577_v9 = vadd.f32 %v4576_v19, %v4575_v52  ;;  %v4649_v19 = vrot.slane %v7198_v0, %v6979_v57 }
 0x434   :  { %v4571_v8 = vrot.slane %v4570_v41, 2 }
 0x435   :  { %v4578_v47 = vrot.slane %v4577_v9, 2 }
 0x436   :  { %v4572_v45 = vadd.f32 %v4571_v8, %v4570_v41 }
 0x437   :  { %v4579_v54 = vadd.f32 %v4578_v47, %v4577_v9  ;;  %v4440_v13 = vpop.f32.mrb[16].mxu1 }
 0x438   :  { %v4573_v10 = vrot.slane %v4572_v45, 1  ;;  %v4473_v28 = vmul.f32 %v4462_v44, %v4440_v13  ;;  %v4442_v37 = vpop.f32.mrb[17].mxu1 }
 0x439   :  { %v4580_v53 = vrot.slane %v4579_v54, 1  ;;  %v4474_v34 = vmul.f32 %v4466_v43, %v4442_v37  ;;  %v4444_v15 = vpop.f32.mrb[18].mxu1 }
 0x43a   :  { %v4574_v21 = vadd.f32 %v4573_v10, %v4572_v45  ;;  %v4481_v30 = vadd.f32 %v4473_v28, %v7147_v3  ;;  %v4477_v24 = vmul.f32 %v4462_v44, %v4444_v15  ;;  %v4446_v39 = vpop.f32.mrb[19].mxu1  ;;  %v4653_v44 = vrot.slane %v7198_v0, %v6984_v22 }
 0x43b   :  { %v4581_v31 = vadd.f32 %v4580_v53, %v4579_v54  ;;  %v4482_v61 = vadd.f32 %v4474_v34, %v7149_v2  ;;  %v4478_v42 = vmul.f32 %v4466_v43, %v4446_v39 }
 0x43c   :  { %v4596_v59 = vmul.f32 0.0625, %v4574_v21  ;;  %v4511_v14 = vadd.f32 %v4500_v17, %v4481_v30  ;;  %v4485_v40 = vadd.f32 %v4477_v24, %v7151_v5 }
 0x43d   :  { %v4597_v11 = vmul.f32 0.0625, %v4581_v31  ;;  %v4486_v60 = vadd.f32 %v4478_v42, %v7153_v33  ;;  %v4512_v3 = vadd.f32 %v4504_v16, %v4482_v61  ;;  %v4620_v33 = vrot.slane %v7196_v18, %v6979_v57 }
 0x43e   :  { %v4600_v38 = vadd.f32 1e-05, %v4596_v59  ;;  %v4515_v36 = vadd.f32 %v4500_v17, %v4485_v40 }
 0x43f   :  { %v4601_v56 = vadd.f32 1e-05, %v4597_v11  ;;  %v4516_v55 = vadd.f32 %v4504_v16, %v4486_v60 }
 0x440   :  { %5563 = vrsqrt.f32 %v4600_v38  ;;  %v4533_v50 = vadd.f32 %v4515_v36, %v4511_v14 }
 0x441   :  { %5565 = vrsqrt.f32 %v4601_v56  ;;  %v4540_v2 = vadd.f32 %v4516_v55, %v4512_v3 }
 0x442   :  { %v4534_v26 = vrot.slane %v4533_v50, 4 }
 0x443   :  { %v4541_v58 = vrot.slane %v4540_v2, 4 }
 0x444   :  { %v4535_v25 = vadd.f32 %v4534_v26, %v4533_v50 }
 0x445   :  { %v4542_v23 = vadd.f32 %v4541_v58, %v4540_v2  ;;  %v4761_v2 = vunpack.c.h.s8.bf16 %v7155_v4  ;;  %v4713_v58 = vld [vmem:[#allocation9 + $0x98] sm:$0xff] }
 0x446   :  { %v4536_v35 = vrot.slane %v4535_v25, 2  ;;  %v4765_v4 = vunpack.c.h.s8.bf16 %v4713_v58 }
 0x447   :  { %v4543_v5 = vrot.slane %v4542_v23, 2 }
 0x448   :  { %v4537_v29 = vadd.f32 %v4536_v35, %v4535_v25 }
 0x449   :  { %v4544_v12 = vadd.f32 %v4543_v5, %v4542_v23 }
 0x44a   :  { %v5564_v62 = vpop.eup %5563  ;;  %v4538_v51 = vrot.slane %v4537_v29, 1 }
 0x44b   :  { %v5566_v48 = vpop.eup %5565  ;;  %v4608_v6 = vmul.f32 %v5564_v62, %v7170_v1  ;;  %v4612_v52 = vmul.f32 %v5564_v62, %v7172_v27  ;;  %v4545_v20 = vrot.slane %v4544_v12, 1 }
 0x44c   :  { %v4613_v41 = vmul.f32 %v5566_v48, %v7176_v46  ;;  %v4539_v9 = vadd.f32 %v4538_v51, %v4537_v29  ;;  %v4609_v8 = vmul.f32 %v5566_v48, %v7174_v7  ;;  %v4763_v29 = vunpack.c.l.s8.bf16 %v4713_v58 }
 0x44d   :  { %v4641_v47 = vmul.f32 %v4620_v33, %v4612_v52  ;;  %v4546_v43 = vadd.f32 %v4545_v20, %v4544_v12  ;;  %v4637_v45 = vmul.f32 %v4620_v33, %v4608_v6  ;;  %v4712_v33 = vld [vmem:[#allocation9 + $0x90] sm:$0xff]  ;;  %v4715_v52 = vld [vmem:[#allocation9 + $0xa8] sm:$0xff] }
 0x44e   :  { %v4550_v54 = vmul.f32 0.0625, %v4539_v9  ;;  %v4638_v13 = vmul.f32 %v4624_v32, %v4609_v8  ;;  %v4642_v1 = vmul.f32 %v4624_v32, %v4613_v41  ;;  %v4762_v32 = vunpack.c.l.s8.bf16 %v4712_v33 }
 0x44f   :  { %v4551_v10 = vmul.f32 0.0625, %v4546_v43  ;;  %v4666_v27 = vadd.f32 %v4649_v19, %v4637_v45  ;;  %v4670_v28 = vadd.f32 %v4649_v19, %v4641_v47  ;;  %v4764_v41 = vunpack.c.h.s8.bf16 %v4712_v33 }
 0x450   :  { %v7212_v17 = vsub.f32 %v4511_v14, %v4550_v54  ;;  %v7214_v37 = vsub.f32 %v4515_v36, %v4550_v54  ;;  %v4667_v46 = vadd.f32 %v4653_v44, %v4638_v13  ;;  %v4671_v53 = vadd.f32 %v4653_v44, %v4642_v1  ;;  %v4710_v14 = vld [vmem:[#allocation9 + $0x80] sm:$0xff]  ;;  %v4717_v13 = vld [vmem:[#allocation9 + $0xb8] sm:$0xff] }
 0x451   :  { %v7216_v34 = vsub.f32 %v4512_v3, %v4551_v10  ;;  %v7218_v7 = vsub.f32 %v4516_v55, %v4551_v10  ;;  %v4674_v15 = vmul.f32 0.2, %v4666_v27  ;;  %v4678_v21 = vmul.f32 0.2, %v4670_v28  ;;  %v4714_v44 = vld [vmem:[#allocation9 + $0xa0] sm:$0xff] }
 0x452   :  { %v4562_v30 = vmul.f32 %v7212_v17, %v7212_v17  ;;  %v4566_v24 = vmul.f32 %v7214_v37, %v7214_v37  ;;  %v4675_v39 = vmul.f32 0.2, %v4667_v46  ;;  %v4679_v31 = vmul.f32 0.2, %v4671_v53 }
 0x453   :  { %v4563_v61 = vmul.f32 %v7216_v34, %v7216_v34  ;;  %v4567_v16 = vmul.f32 %v7218_v7, %v7218_v7  ;;  %v4682_v42 = vmax.f32 %v4666_v27, %v4674_v15  ;;  %v4686_v59 = vmax.f32 %v4670_v28, %v4678_v21  ;;  %v4716_v27 = vld [vmem:[#allocation9 + $0xb0] sm:$0xff]  ;;  %v4719_v21 = vld [vmem:[#allocation9 + $0xc8] sm:$0xff] }
 0x454   :  { %v4582_v40 = vadd.f32 %v4566_v24, %v4562_v30  ;;  %v4683_v11 = vmax.f32 %v4667_v46, %v4675_v39  ;;  %v4687_v60 = vmax.f32 %v4671_v53, %v4679_v31  ;;  %v4758_v55 = vunpack.c.l.s8.bf16 %v4710_v14 }
 0x455   :  { %v4589_v38 = vadd.f32 %v4567_v16, %v4563_v61  ;;  %v4690_v36 = vpack.c.bf16 %v4686_v59, %v4682_v42  ;;  %v4760_v35 = vunpack.c.h.s8.bf16 %v4710_v14  ;;  %v4767_v8 = vunpack.c.l.s8.bf16 %v4715_v52 }
 0x456   :  { %v4583_v56 = vrot.slane %v4582_v40, 4  ;;  %v4691_v3 = vpack.c.bf16 %v4687_v60, %v4683_v11  ;;  %v4766_v45 = vunpack.c.l.s8.bf16 %v4714_v44  ;;  %v4769_v54 = vunpack.c.h.s8.bf16 %v4715_v52  ;;  %v4718_v11 = vld [vmem:[#allocation9 + $0xc0] sm:$0xff] }
 0x457   :  { %v4590_v50 = vrot.slane %v4589_v38, 4  ;;  %v4768_v1 = vunpack.c.h.s8.bf16 %v4714_v44  ;;  %v4771_v10 = vunpack.c.l.s8.bf16 %v4717_v13  ;;  %v4770_v28 = vunpack.c.l.s8.bf16 %v4716_v27 }
 0x458   :  { %v4584_v26 = vadd.f32 %v4583_v56, %v4582_v40  ;;  %4822 = vmatprep.mubr.bf16.mxu0 %v4691_v3  ;;  %v4628_v46 = vrot.slane %v7196_v18, %v7076_v49  ;;  %v4773_v53 = vunpack.c.h.s8.bf16 %v4717_v13  ;;  %v4632_v30 = vrot.slane %v7196_v18, %v7084_v63 }
 0x459   :  { %v4591_v25 = vadd.f32 %v4590_v50, %v4589_v38  ;;  %4823 = vmatmul.mubr.bf16.vlgmr.msra.gmra.mrb[16].mxu0 %v4690_v36  ;;  %v4657_v61 = vrot.slane %v7198_v0, %v7076_v49  ;;  %v4772_v42 = vunpack.c.h.s8.bf16 %v4716_v27  ;;  %v4661_v14 = vrot.slane %v7198_v0, %v7084_v63  ;;  %v4721_v63 = vld [vmem:[#allocation9 + $0xd8] sm:$0xff] }
 0x45a   :  { %v4585_v23 = vrot.slane %v4584_v26, 2  ;;  %4834 = vmatpush1.bf16.msra.mxu0 %v4758_v55  ;;  %v4775_v18 = vunpack.c.l.s8.bf16 %v4719_v21  ;;  %v4774_v49 = vunpack.c.l.s8.bf16 %v4718_v11  ;;  %v4777_v3 = vunpack.c.h.s8.bf16 %v4719_v21 }
 0x45b   :  { %v4592_v5 = vrot.slane %v4591_v25, 2  ;;  %4835 = vmatprep.subr.bf16.mxu0 %v4761_v2  ;;  %v4776_v58 = vunpack.c.h.s8.bf16 %v4718_v11 }
 0x45c   :  { %v4586_v12 = vadd.f32 %v4585_v23, %v4584_v26 }
 0x45d   :  { %v4593_v62 = vadd.f32 %v4592_v5, %v4591_v25  ;;  %v4720_v5 = vld [vmem:[#allocation9 + $0xd0] sm:$0xff] }
 0x45e   :  { %v4587_v51 = vrot.slane %v4586_v12, 1  ;;  %4836 = vmatpush1.bf16.msra.mxu0 %v4760_v35  ;;  %v4779_v35 = vunpack.c.l.s8.bf16 %v4721_v63 }
 0x45f   :  { %v4594_v48 = vrot.slane %v4593_v62, 1  ;;  %4837 = vmatprep.subr.bf16.mxu0 %v4763_v29 }
 0x460   :  { %v4588_v6 = vadd.f32 %v4587_v51, %v4586_v12  ;;  %v4778_v12 = vunpack.c.l.s8.bf16 %v4720_v5  ;;  %v4723_v51 = vld [vmem:[#allocation9 + $0xe8] sm:$0xff] }
 0x461   :  { %v4595_v20 = vadd.f32 %v4594_v48, %v4593_v62  ;;  %v4781_v62 = vunpack.c.h.s8.bf16 %v4721_v63  ;;  %v4783_v48 = vunpack.c.l.s8.bf16 %v4723_v51  ;;  %v4785_v52 = vunpack.c.h.s8.bf16 %v4723_v51 }
 0x462   :  { %v4598_v19 = vmul.f32 0.0625, %v4588_v6  ;;  %4838 = vmatpush1.bf16.msra.mxu0 %v4762_v32  ;;  %v4780_v32 = vunpack.c.h.s8.bf16 %v4720_v5 }
 0x463   :  { %v4599_v9 = vmul.f32 0.0625, %v4595_v20  ;;  %4839 = vmatprep.subr.bf16.mxu0 %v4765_v4  ;;  %v4722_v4 = vld [vmem:[#allocation9 + $0xe0] sm:$0xff]  ;;  %v4725_v20 = vld [vmem:[#allocation9 + $0xf8] sm:$0xff] }
 0x464   :  { %v4602_v47 = vadd.f32 1e-05, %v4598_v19  ;;  %v4782_v6 = vunpack.c.l.s8.bf16 %v4722_v4  ;;  %v4784_v19 = vunpack.c.h.s8.bf16 %v4722_v4  ;;  %v4789_v44 = vunpack.c.h.s8.bf16 %v4725_v20 }
 0x465   :  { %v4603_v43 = vadd.f32 1e-05, %v4599_v9  ;;  %v4724_v9 = vld [vmem:[#allocation9 + $0xf0] sm:$0xff] }
 0x466   :  { %5567 = vrsqrt.f32 %v4602_v47  ;;  %4840 = vmatpush1.bf16.msra.mxu0 %v4764_v41  ;;  %v4787_v41 = vunpack.c.l.s8.bf16 %v4725_v20  ;;  %v4788_v47 = vunpack.c.h.s8.bf16 %v4724_v9 }
 0x467   :  { %5569 = vrsqrt.f32 %v4603_v43  ;;  %4841 = vmatprep.subr.bf16.mxu0 %v4767_v8  ;;  %v4786_v8 = vunpack.c.l.s8.bf16 %v4724_v9  ;;  %v4876_v43 = vld [vmem:[#allocation12 + $0x22] sm:$0x3] }
 0x468   :  { %v4885_v13 = vrot.slane %v4876_v43, %v6984_v22 }
 0x46a   :  { %4842 = vmatpush1.bf16.msra.mxu0 %v4766_v45  ;;  %v4881_v45 = vrot.slane %v4876_v43, %v6979_v57 }
 0x46b   :  { %4843 = vmatprep.subr.bf16.mxu0 %v4769_v54  ;;  %v4892_v54 = vld [vmem:[#allocation12 + $0x20] sm:$0x3] }
 0x46c   :  { %v4897_v27 = vrot.slane %v4892_v54, %v6979_v57 }
 0x46e   :  { %4844 = vmatpush1.bf16.msra.mxu0 %v4768_v1 }
 0x46f   :  { %4845 = vmatprep.subr.bf16.mxu0 %v4771_v10 }
 0x470   :  { %v5568_v15 = vpop.eup %5567 }
 0x471   :  { %v5570_v24 = vpop.eup %5569  ;;  %v4610_v39 = vmul.f32 %v5568_v15, %v7212_v17  ;;  %v4614_v31 = vmul.f32 %v5568_v15, %v7214_v37 }
 0x472   :  { %v4615_v16 = vmul.f32 %v5570_v24, %v7218_v7  ;;  %4846 = vmatpush1.bf16.msra.mxu0 %v4770_v28  ;;  %v4611_v59 = vmul.f32 %v5570_v24, %v7216_v34 }
 0x473   :  { %v4643_v40 = vmul.f32 %v4628_v46, %v4614_v31  ;;  %4847 = vmatprep.subr.bf16.mxu0 %v4773_v53  ;;  %v4639_v60 = vmul.f32 %v4628_v46, %v4610_v39  ;;  %v4901_v53 = vrot.slane %v4892_v54, %v6984_v22 }
 0x474   :  { %v4640_v17 = vmul.f32 %v4632_v30, %v4611_v59  ;;  %v4644_v38 = vmul.f32 %v4632_v30, %v4615_v16 }
 0x475   :  { %v4668_v37 = vadd.f32 %v4657_v61, %v4639_v60  ;;  %v4672_v36 = vadd.f32 %v4657_v61, %v4643_v40 }
 0x476   :  { %4848 = vmatpush1.bf16.msra.mxu0 %v4772_v42  ;;  %v4669_v56 = vadd.f32 %v4661_v14, %v4640_v17  ;;  %v4673_v7 = vadd.f32 %v4661_v14, %v4644_v38 }
 0x477   :  { %4849 = vmatprep.subr.bf16.mxu0 %v4775_v18  ;;  %v4676_v55 = vmul.f32 0.2, %v4668_v37  ;;  %v4680_v34 = vmul.f32 0.2, %v4672_v36 }
 0x478   :  { %v4677_v50 = vmul.f32 0.2, %v4669_v56  ;;  %v4681_v2 = vmul.f32 0.2, %v4673_v7 }
 0x479   :  { %v4684_v0 = vmax.f32 %v4668_v37, %v4676_v55  ;;  %v4688_v26 = vmax.f32 %v4672_v36, %v4680_v34 }
 0x47a   :  { %4850 = vmatpush1.bf16.msra.mxu0 %v4774_v49  ;;  %v4685_v25 = vmax.f32 %v4669_v56, %v4677_v50  ;;  %v4689_v23 = vmax.f32 %v4673_v7, %v4681_v2 }
 0x47b   :  { %4851 = vmatprep.subr.bf16.mxu0 %v4777_v3  ;;  %v4692_v29 = vpack.c.bf16 %v4688_v26, %v4684_v0 }
 0x47c   :  { %v4693_v33 = vpack.c.bf16 %v4689_v23, %v4685_v25 }
 0x47e   :  { %4852 = vmatpush1.bf16.msra.mxu0 %v4776_v58  ;;  %4865 = vmatprep.mubr.bf16.mxu0 %v4693_v33 }
 0x47f   :  { %4853 = vmatprep.subr.bf16.mxu0 %v4779_v35 }
 0x482   :  { %4854 = vmatpush1.bf16.msra.mxu0 %v4778_v12 }
 0x483   :  { %4855 = vmatprep.subr.bf16.mxu0 %v4781_v62 }
 0x486   :  { %4856 = vmatpush1.bf16.msra.mxu0 %v4780_v32 }
 0x487   :  { %4857 = vmatprep.subr.bf16.mxu0 %v4783_v48 }
 0x48a   :  { %4858 = vmatpush1.bf16.msra.mxu0 %v4782_v6 }
 0x48b   :  { %4859 = vmatprep.subr.bf16.mxu0 %v4785_v52 }
 0x48e   :  { %4860 = vmatpush1.bf16.msra.mxu0 %v4784_v19 }
 0x48f   :  { %4861 = vmatprep.subr.bf16.mxu0 %v4787_v41 }
 0x492   :  { %4862 = vmatpush1.bf16.msra.mxu0 %v4786_v8 }
 0x493   :  { %4863 = vmatprep.subr.bf16.mxu0 %v4789_v44  ;;  %v4908_v44 = vld [vmem:[#allocation12 + $0x24] sm:$0x3] }
 0x494   :  { %v4962_v43 = vrot.slane %v4908_v44, %v6979_v57  ;;  %v4966_v54 = vrot.slane %v4908_v44, %v6984_v22 }
 0x496   :  { %4864 = vmatpush1.bf16.msra.mxu0 %v4788_v47  ;;  %v4909_v47 = vld [vmem:[#allocation12 + $0x26] sm:$0x3] }
 0x499   :  { %4866 = vmatmul.mubr.bf16.vlgmr.msra.gmra.mrb[16].mxu0 %v4692_v29 }
 0x56c   :  { %v4867_v1 = vpop.f32.mrb[16].mxu0 }
 0x56d   :  { %v4888_v10 = vmul.f32 %v4881_v45, %v4867_v1  ;;  %v4869_v28 = vpop.f32.mrb[17].mxu0 }
 0x56e   :  { %v4889_v46 = vmul.f32 %v4885_v13, %v4869_v28  ;;  %v4871_v15 = vpop.f32.mrb[18].mxu0 }
 0x56f   :  { %v4890_v21 = vmul.f32 %v4881_v45, %v4871_v15  ;;  %v4873_v30 = vpop.f32.mrb[19].mxu0  ;;  %v4904_v39 = vadd.f32 %v4897_v27, %v4888_v10 }
 0x570   :  { %v4891_v24 = vmul.f32 %v4885_v13, %v4873_v30  ;;  %v4905_v61 = vadd.f32 %v4901_v53, %v4889_v46 }
 0x571   :  { %v4906_v31 = vadd.f32 %v4897_v27, %v4890_v21  ;;  %v4977_v27 = vrot.slane %v4909_v47, %v6979_v57 }
 0x572   :  { %v4907_v16 = vadd.f32 %v4901_v53, %v4891_v24  ;;  %v4981_v53 = vrot.slane %v4909_v47, %v6984_v22 }
 0x573   :  { %v4910_v42 = vadd.f32 %v4906_v31, %v4904_v39 }
 0x574   :  { %v4917_v59 = vadd.f32 %v4907_v16, %v4905_v61 }
 0x575   :  { %v4911_v14 = vrot.slane %v4910_v42, 4 }
 0x576   :  { %v4918_v40 = vrot.slane %v4917_v59, 4 }
 0x577   :  { %v4912_v18 = vadd.f32 %v4911_v14, %v4910_v42 }
 0x578   :  { %v4919_v11 = vadd.f32 %v4918_v40, %v4917_v59 }
 0x579   :  { %v4913_v60 = vrot.slane %v4912_v18, 2 }
 0x57a   :  { %v4920_v17 = vrot.slane %v4919_v11, 2 }
 0x57b   :  { %v4914_v38 = vadd.f32 %v4913_v60, %v4912_v18 }
 0x57c   :  { %v4921_v37 = vadd.f32 %v4920_v17, %v4919_v11 }
 0x57d   :  { %v4915_v36 = vrot.slane %v4914_v38, 1 }
 0x57e   :  { %v4922_v49 = vrot.slane %v4921_v37, 1 }
 0x57f   :  { %v4916_v56 = vadd.f32 %v4915_v36, %v4914_v38 }
 0x580   :  { %v4923_v7 = vadd.f32 %v4922_v49, %v4921_v37 }
 0x581   :  { %v4924_v3 = vmul.f32 0.0625, %v4916_v56 }
 0x582   :  { %v4925_v55 = vmul.f32 0.0625, %v4923_v7 }
 0x583   :  { %v4926_v34 = vsub.f32 %v4904_v39, %v4924_v3  ;;  %v4928_v50 = vsub.f32 %v4906_v31, %v4924_v3  ;;  %v4996_v39 = vld [vmem:[#allocation12 + $0x28] sm:$0x3] }
 0x584   :  { %v4927_v2 = vsub.f32 %v4905_v61, %v4925_v55  ;;  %v4929_v63 = vsub.f32 %v4907_v16, %v4925_v55  ;;  %v5002_v14 = vrot.slane %v4996_v39, %v6979_v57  ;;  %v5006_v11 = vrot.slane %v4996_v39, %v6984_v22 }
 0x585   :  { %v4930_v0 = vmul.f32 %v4926_v34, %v4926_v34  ;;  %v4932_v26 = vmul.f32 %v4928_v50, %v4928_v50 }
 0x586   :  { %v4931_v58 = vmul.f32 %v4927_v2, %v4927_v2  ;;  %v4933_v25 = vmul.f32 %v4929_v63, %v4929_v63 }
 0x587   :  { %v4934_v23 = vadd.f32 %v4932_v26, %v4930_v0 }
 0x588   :  { %v4941_v35 = vadd.f32 %v4933_v25, %v4931_v58 }
 0x589   :  { %v4935_v5 = vrot.slane %v4934_v23, 4 }
 0x58a   :  { %v4942_v29 = vrot.slane %v4941_v35, 4 }
 0x58b   :  { %v4936_v33 = vadd.f32 %v4935_v5, %v4934_v23 }
 0x58c   :  { %v4943_v12 = vadd.f32 %v4942_v29, %v4941_v35 }
 0x58d   :  { %v4937_v62 = vrot.slane %v4936_v33, 2 }
 0x58e   :  { %v4944_v51 = vrot.slane %v4943_v12, 2 }
 0x58f   :  { %v4938_v32 = vadd.f32 %v4937_v62, %v4936_v33 }
 0x590   :  { %v4945_v48 = vadd.f32 %v4944_v51, %v4943_v12 }
 0x591   :  { %v4939_v4 = vrot.slane %v4938_v32, 1 }
 0x592   :  { %v4946_v6 = vrot.slane %v4945_v48, 1 }
 0x593   :  { %v4940_v52 = vadd.f32 %v4939_v4, %v4938_v32 }
 0x594   :  { %v4947_v20 = vadd.f32 %v4946_v6, %v4945_v48 }
 0x595   :  { %v4948_v19 = vmul.f32 0.0625, %v4940_v52 }
 0x596   :  { %v4949_v41 = vmul.f32 0.0625, %v4947_v20 }
 0x597   :  { %v4950_v9 = vadd.f32 1e-05, %v4948_v19 }
 0x598   :  { %v4951_v8 = vadd.f32 1e-05, %v4949_v41 }
 0x599   :  { %5571 = vrsqrt.f32 %v4950_v9 }
 0x59a   :  { %5573 = vrsqrt.f32 %v4951_v8 }
 0x5a3   :  { %v5572_v45 = vpop.eup %5571 }
 0x5a4   :  { %v5574_v13 = vpop.eup %5573  ;;  %v4956_v1 = vmul.f32 %v5572_v45, %v4928_v50  ;;  %v4954_v10 = vmul.f32 %v5572_v45, %v4926_v34  ;;  %v5454_v50 = vld [vmem:[#allocation12 + $0x2a] ss:$0 sm:$0xff] }
 0x5a5   :  { %v4957_v28 = vmul.f32 %v5574_v13, %v4929_v63  ;;  %v4955_v46 = vmul.f32 %v5574_v13, %v4927_v2 }
 0x5a6   :  { %v4971_v15 = vmul.f32 %v4962_v43, %v4956_v1  ;;  %v4969_v21 = vmul.f32 %v4962_v43, %v4954_v10 }
 0x5a7   :  { %v4972_v30 = vmul.f32 %v4966_v54, %v4957_v28  ;;  %v4970_v24 = vmul.f32 %v4966_v54, %v4955_v46 }
 0x5a8   :  { %v4984_v31 = vadd.f32 %v4977_v27, %v4969_v21  ;;  %v4986_v61 = vadd.f32 %v4977_v27, %v4971_v15 }
 0x5a9   :  { %v4985_v16 = vadd.f32 %v4981_v53, %v4970_v24  ;;  %v4987_v42 = vadd.f32 %v4981_v53, %v4972_v30 }
 0x5aa   :  { %v4988_v59 = vmul.f32 0.2, %v4984_v31  ;;  %v4990_v40 = vmul.f32 0.2, %v4986_v61 }
 0x5ab   :  { %v4989_v18 = vmul.f32 0.2, %v4985_v16  ;;  %v4991_v60 = vmul.f32 0.2, %v4987_v42 }
 0x5ac   :  { %v4992_v17 = vmax.f32 %v4984_v31, %v4988_v59  ;;  %v4994_v38 = vmax.f32 %v4986_v61, %v4990_v40 }
 0x5ad   :  { %v4993_v37 = vmax.f32 %v4985_v16, %v4989_v18  ;;  %v4995_v36 = vmax.f32 %v4987_v42, %v4991_v60 }
 0x5ae   :  { %v5009_v49 = vmul.f32 %v5002_v14, %v4992_v17  ;;  %v5011_v56 = vmul.f32 %v5002_v14, %v4994_v38 }
 0x5af   :  { %v5010_v7 = vmul.f32 %v5006_v11, %v4993_v37  ;;  %v5012_v3 = vmul.f32 %v5006_v11, %v4995_v36 }
 0x5b1   :  { %v5013_v55 = vadd.f32 %v5010_v7, %v5009_v49  ;;  %v5016_v34 = vadd.f32 %v5012_v3, %v5011_v56 }
 0x5b3   :  { %5014 = vadd.xlane.f32.xlu0 %v5013_v55 }
 0x5b7   :  { %5017 = vadd.xlane.f32.xlu0 %v5016_v34 }
 0x640   :  { %v5015_v2 = vpop.xlane.xlu0 %5014 }
 0x641   :  { %v5025_v57 = vadd.f32 %v5454_v50, %v5015_v2 }
 0x643   :  { %v5455_v63 = vmul.f32 -1.442695, %v5025_v57 }
 0x644   :  { %v5018_v0 = vpop.xlane.xlu0 %5017 }
 0x645   :  { %5575 = vpow2.f32 %v5455_v63  ;;  %v5026_v22 = vadd.f32 %v5454_v50, %v5018_v0 }
 0x647   :  { %v5456_v26 = vmul.f32 -1.442695, %v5026_v22 }
 0x649   :  { %5577 = vpow2.f32 %v5456_v26 }
 0x64f   :  { %v5576_v58 = vpop.eup %5575 }
 0x650   :  { %v5033_v25 = vadd.f32 1.0, %v5576_v58 }
 0x652   :  { %5579 = vrcp.f32 %v5033_v25 }
 0x653   :  { %v5578_v23 = vpop.eup %5577 }
 0x654   :  { %v5034_v35 = vadd.f32 1.0, %v5578_v23 }
 0x656   :  { %5581 = vrcp.f32 %v5034_v35 }
 0x65c   :  { %v5580_v5 = vpop.eup %5579 }
 0x65d   :  { %5040 = vst.msk [vmem:[%s7264_s7] sm:$0xff] %vm5039_vm5, %v5580_v5 }
 0x660   :  { %v5582_v29 = vpop.eup %5581 }
 0x661   :  { %5041 = vst.msk [vmem:[%s7264_s7 + $0x8] sm:$0xff] %vm5039_vm5, %v5582_v29 }
 0x662   :  { %5046 = vsyncpa [#allocation3], 1 }
 0x663   :  { %5047 = vsyncpa [#allocation5], 1 }
 0x664   :  { %5048 = vsyncpa [#allocation8], 1 }
 0x665   :  { %5049 = vsyncpa [#allocation11], 1 }

</bundles_post_ra>
